<compile_context>
chip_gen: v7x
topology: tpu7x:2x2x1
jax: 0.10.0
libtpu: 0.0.40
codegen_flags: <defaults>
</compile_context>

<pallas_src>
import functools

import jax
import jax.numpy as jnp
from jax.experimental import pallas as pl
from jax.experimental.pallas import tpu as pltpu

LATENT_DIM = 100
NEG_SLOPE = 0.2
BN_EPS = 0.8                      # nn.BatchNorm1d(output_dim, 0.8) -> eps=0.8
H1, H2, H3, H4 = 128, 256, 512, 1024   # MLP trunk widths
MAX_TN = 512                      # max output-column tile streamed per step


def _round_up(x, m):
    return ((x + m - 1) // m) * m


def _leaky_relu(x):
    return jnp.where(x > 0, x, NEG_SLOPE * x)


def _bn_train(x, gamma, beta):
    # training-mode BatchNorm1d: batch mean, biased batch variance
    mean = jnp.mean(x, axis=0, keepdims=True)
    var = jnp.mean(jnp.square(x - mean), axis=0, keepdims=True)
    inv = jax.lax.rsqrt(var + BN_EPS)
    return (x - mean) * inv * gamma + beta


def generator_kernel(
    x_ref,                 # (B, 128)   padded gen_input, f32 (resident)
    w1_ref,                # (128, 128) bf16, contraction dim zero-padded
    w2_ref,                # (128, 256) bf16
    w3_ref,                # (256, 512) bf16
    w4_ref,                # (512, 1024) bf16
    vec_ref,               # (8, 1024)  f32: [b1, g2, be2, g3, be3, g4, be4, 0]
    b5_ref,                # (1, img_dim_pad) f32 final bias (resident)
    w5_ref,                # (1024, TN) bf16 slab of the final weight (streamed)
    out_ref,               # (B, TN)    f32 output tile
    *, tn,
):
    # --- trunk (recomputed per step; ~11 MFLOP, hidden under the w5 DMA) ---
    x = x_ref[...].astype(jnp.bfloat16)
    b1 = vec_ref[0:1, :H1]
    g2, be2 = vec_ref[1:2, :H2], vec_ref[2:3, :H2]
    g3, be3 = vec_ref[3:4, :H3], vec_ref[4:5, :H3]
    g4, be4 = vec_ref[5:6, :H4], vec_ref[6:7, :H4]

    # block 1: Linear + LeakyReLU (no normalize)
    h = jnp.dot(x, w1_ref[...], preferred_element_type=jnp.float32) + b1
    h = _leaky_relu(h)

    # blocks 2-4: Linear + BatchNorm1d(train) + LeakyReLU.
    # Linear biases omitted on purpose: exactly cancelled by the batch-mean
    # subtraction inside the training-mode BatchNorm that follows.
    h = jnp.dot(h.astype(jnp.bfloat16), w2_ref[...],
                preferred_element_type=jnp.float32)
    h = _leaky_relu(_bn_train(h, g2, be2))

    h = jnp.dot(h.astype(jnp.bfloat16), w3_ref[...],
                preferred_element_type=jnp.float32)
    h = _leaky_relu(_bn_train(h, g3, be3))

    h = jnp.dot(h.astype(jnp.bfloat16), w4_ref[...],
                preferred_element_type=jnp.float32)
    h = _leaky_relu(_bn_train(h, g4, be4))
    h4 = h.astype(jnp.bfloat16)

    # --- final Linear tile + Tanh ---
    start = pl.multiple_of(pl.program_id(0) * tn, tn)
    b5 = b5_ref[0:1, pl.ds(start, tn)]
    out = jnp.dot(h4, w5_ref[...], preferred_element_type=jnp.float32) + b5
    # TODO(synk): on v6e/v7x a bf16 tanh/output halves EUP work + writeback,
    # but v5e has no bf16 EUP/VPU, so the generation-safe choice is f32.
    out_ref[...] = jnp.tanh(out)


def init_generator_params(key, channels=1, img_size=32, n_classes=10):
    """Deterministic parameter init mimicking PyTorch defaults (shapes exact)."""
    img_dim = channels * img_size * img_size
    dims = [LATENT_DIM + n_classes, H1, H2, H3, H4, img_dim]

    keys = jax.random.split(key, 16)
    ki = iter(keys)

    def linear(in_d, out_d, k):
        kw, kb = jax.random.split(k)
        bound = 1.0 / jnp.sqrt(in_d)
        # stored as (in, out) so kernel computes x @ W + b
        w = jax.random.uniform(kw, (in_d, out_d), jnp.float32, -bound, bound)
        b = jax.random.uniform(kb, (out_d,), jnp.float32, -bound, bound)
        return w, b

    params = {}
    params["emb"] = jax.random.normal(next(ki), (n_classes, n_classes), jnp.float32)
    params["w1"], params["b1"] = linear(dims[0], dims[1], next(ki))
    params["w2"], params["b2"] = linear(dims[1], dims[2], next(ki))
    params["w3"], params["b3"] = linear(dims[2], dims[3], next(ki))
    params["w4"], params["b4"] = linear(dims[3], dims[4], next(ki))
    params["w5"], params["b5"] = linear(dims[4], dims[5], next(ki))
    for name, d in (("2", dims[2]), ("3", dims[3]), ("4", dims[4])):
        params["g" + name] = jnp.ones((d,), jnp.float32)    # BN weight
        params["be" + name] = jnp.zeros((d,), jnp.float32)  # BN bias
    return params


def pack_generator_params(params, channels=1, img_size=32):
    """One-time repack: bf16 weights, lane padding, packed small vectors,
    and w5 re-laid-out into contiguous (n_tiles, 1024, TN) slabs."""
    img_dim = channels * img_size * img_size
    tn = min(MAX_TN, _round_up(img_dim, 128))
    img_dim_pad = _round_up(img_dim, tn)
    n_tiles = img_dim_pad // tn
    k_in = params["w1"].shape[0]          # 100 + n_classes

    def row(v):
        return jnp.pad(v.astype(jnp.float32), (0, H4 - v.shape[0]))

    w5 = jnp.pad(params["w5"],
                 ((0, 0), (0, img_dim_pad - img_dim))).astype(jnp.bfloat16)
    # Contiguous per-tile slabs: slab[j] == w5[:, j*tn:(j+1)*tn], so each grid
    # step is ONE full-burst DMA instead of 1024 strided 2*tn-byte chunks.
    w5 = w5.reshape(H4, n_tiles, tn).transpose(1, 0, 2)       # (n_tiles, H4, tn)

    return {
        "emb": params["emb"].astype(jnp.float32),
        "w1": jnp.pad(params["w1"], ((0, H1 - k_in), (0, 0))).astype(jnp.bfloat16),
        "w2": params["w2"].astype(jnp.bfloat16),
        "w3": params["w3"].astype(jnp.bfloat16),
        "w4": params["w4"].astype(jnp.bfloat16),
        "w5": w5,
        "b5": jnp.pad(params["b5"],
                      (0, img_dim_pad - img_dim))[None, :].astype(jnp.float32),
        # b2/b3/b4 intentionally not packed (cancelled by training-mode BN).
        "vec": jnp.stack([
            row(params["b1"]),
            row(params["g2"]), row(params["be2"]),
            row(params["g3"]), row(params["be3"]),
            row(params["g4"]), row(params["be4"]),
            jnp.zeros((H4,), jnp.float32),
        ]),
    }


@functools.partial(jax.jit, static_argnames=("channels", "img_size"))
def generator_forward(packed, z, labels, channels=1, img_size=32):
    B = z.shape[0]
    img_dim = channels * img_size * img_size
    n_tiles, _, tn = packed["w5"].shape
    img_dim_pad = n_tiles * tn

    # glue: embedding lookup + concat (matches torch.cat((emb(labels), z), -1)),
    # zero-padded to 128 lanes for a lane-dense first contraction.
    emb = jnp.take(packed["emb"], labels, axis=0)            # (B, n_classes)
    gen_input = jnp.concatenate([emb, z], axis=-1)           # (B, 110)
    x = jnp.pad(gen_input, ((0, 0), (0, H1 - gen_input.shape[1])))  # (B, 128)

    grid_spec = pltpu.PrefetchScalarGridSpec(
        num_scalar_prefetch=0,
        grid=(n_tiles,),
        in_specs=[
            pl.BlockSpec((B, H1), lambda j: (0, 0)),          # x        (resident)
            pl.BlockSpec((H1, H1), lambda j: (0, 0)),         # w1       (resident)
            pl.BlockSpec((H1, H2), lambda j: (0, 0)),         # w2       (resident)
            pl.BlockSpec((H2, H3), lambda j: (0, 0)),         # w3       (resident)
            pl.BlockSpec((H3, H4), lambda j: (0, 0)),         # w4       (resident)
            pl.BlockSpec((8, H4), lambda j: (0, 0)),          # packed vectors
            pl.BlockSpec((1, img_dim_pad), lambda j: (0, 0)),  # b5      (resident)
            pl.BlockSpec((None, H4, tn), lambda j: (j, 0, 0)),  # w5 slab (streamed)
        ],
        out_specs=pl.BlockSpec((B, tn), lambda j: (0, j)),
    )

    flat = pl.pallas_call(
        functools.partial(generator_kernel, tn=tn),
        out_shape=jax.ShapeDtypeStruct((B, img_dim_pad), jnp.float32),
        grid_spec=grid_spec,
        # No cross-step state (trunk recomputed per step) -> "parallel":
        # on v7x both TensorCores split the streamed w5 axis.
        compiler_params=pltpu.CompilerParams(
            dimension_semantics=("parallel",)),
    )(x, packed["w1"], packed["w2"], packed["w3"], packed["w4"],
      packed["vec"], packed["b5"], packed["w5"])

    # img.view(B, C, H, W) -> NCHW
    return flat[:, :img_dim].reshape(B, channels, img_size, img_size)


def reference_forward(params, z, labels, channels=1, img_size=32):
    """Pure-JAX reference: module semantics with the same bf16 weight
    quantization / f32 accumulation as the kernel (biases kept everywhere)."""
    def dot_bf16(a, w):
        return jnp.dot(a.astype(jnp.bfloat16), w.astype(jnp.bfloat16),
                       preferred_element_type=jnp.float32)

    emb = jnp.take(params["emb"], labels, axis=0)
    h = jnp.concatenate([emb, z], axis=-1)

    h = _leaky_relu(dot_bf16(h, params["w1"]) + params["b1"])
    h = _leaky_relu(_bn_train(dot_bf16(h, params["w2"]) + params["b2"],
                              params["g2"], params["be2"]))
    h = _leaky_relu(_bn_train(dot_bf16(h, params["w3"]) + params["b3"],
                              params["g3"], params["be3"]))
    h = _leaky_relu(_bn_train(dot_bf16(h, params["w4"]) + params["b4"],
                              params["g4"], params["be4"]))
    h = jnp.tanh(dot_bf16(h, params["w5"]) + params["b5"])
    return h.reshape(z.shape[0], channels, img_size, img_size)


if __name__ == "__main__":
    B = 8
    CHANNELS = 1
    IMG_SIZE = 32   # module default -> output (B, 1, 32, 32), exercises 2 w5 tiles
    N_CLASSES = 10

    key = jax.random.PRNGKey(0)
    k_params, k_z, k_lab = jax.random.split(key, 3)

    params = init_generator_params(k_params, channels=CHANNELS,
                                   img_size=IMG_SIZE, n_classes=N_CLASSES)
    packed = pack_generator_params(params, channels=CHANNELS, img_size=IMG_SIZE)

    z = jax.random.normal(k_z, (B, LATENT_DIM), jnp.float32)
    labels = jax.random.randint(k_lab, (B,), 0, N_CLASSES, jnp.int32)

    img = generator_forward(packed, z, labels, channels=CHANNELS, img_size=IMG_SIZE)
    img = jax.block_until_ready(img)

    ref = reference_forward(params, z, labels, channels=CHANNELS, img_size=IMG_SIZE)
    assert img.shape == (B, CHANNELS, IMG_SIZE, IMG_SIZE), img.shape
    # Tolerance accounts for bf16 intermediate casts / transcendental impl
    # differences; the kernel's bias-drop before train-mode BN is exact.
    assert jnp.allclose(img, ref, atol=1e-2, rtol=1e-2), "mismatch vs reference"

    print("KERNEL_OK")
</pallas_src>

<mosaic_0001>
module attributes {stable_mosaic.version = 11 : i64} {
  func.func @generator_kernel(%arg0: i32, %arg1: memref<8x128xf32, #tpu.memory_space<vmem>>, %arg2: memref<128x128xbf16, #tpu.memory_space<vmem>>, %arg3: memref<128x256xbf16, #tpu.memory_space<vmem>>, %arg4: memref<256x512xbf16, #tpu.memory_space<vmem>>, %arg5: memref<512x1024xbf16, #tpu.memory_space<vmem>>, %arg6: memref<8x1024xf32, #tpu.memory_space<vmem>>, %arg7: memref<1x1024xf32, #tpu.memory_space<vmem>>, %arg8: memref<1x1024x512xbf16, #tpu.memory_space<vmem>>, %arg9: memref<8x512xf32, #tpu.memory_space<vmem>>) attributes {dimension_semantics = [#tpu.dimension_semantics<parallel>], iteration_bounds = array<i64: 2>, scalar_prefetch = 0 : i64, scratch_operands = 0 : i64, tpu.core_type = #tpu.core_type<tc>, window_params = [{pipeline_mode = #tpu.pipeline_mode<synchronous>, transform_indices = @transform_0, window_bounds = array<i64: 8, 128>}, {pipeline_mode = #tpu.pipeline_mode<synchronous>, transform_indices = @transform_1, window_bounds = array<i64: 128, 128>}, {pipeline_mode = #tpu.pipeline_mode<synchronous>, transform_indices = @transform_2, window_bounds = array<i64: 128, 256>}, {pipeline_mode = #tpu.pipeline_mode<synchronous>, transform_indices = @transform_3, window_bounds = array<i64: 256, 512>}, {pipeline_mode = #tpu.pipeline_mode<synchronous>, transform_indices = @transform_4, window_bounds = array<i64: 512, 1024>}, {pipeline_mode = #tpu.pipeline_mode<synchronous>, transform_indices = @transform_5, window_bounds = array<i64: 8, 1024>}, {pipeline_mode = #tpu.pipeline_mode<synchronous>, transform_indices = @transform_6, window_bounds = array<i64: 1, 1024>}, {transform_indices = @transform_7, window_bounds = array<i64: 1, 1024, 512>}, {transform_indices = @transform_8, window_bounds = array<i64: 8, 512>}]} {
    %c0 = arith.constant 0 : index
    %c0_0 = arith.constant 0 : index
    %0 = vector.load %arg1[%c0, %c0_0] : memref<8x128xf32, #tpu.memory_space<vmem>>, vector<8x128xf32>
    %1 = arith.truncf %0 : vector<8x128xf32> to vector<8x128xbf16>
    %c0_1 = arith.constant 0 : index
    %c0_2 = arith.constant 0 : index
    %2 = vector.load %arg6[%c0_1, %c0_2] : memref<8x1024xf32, #tpu.memory_space<vmem>>, vector<1x128xf32>
    %c1 = arith.constant 1 : index
    %c0_3 = arith.constant 0 : index
    %3 = vector.load %arg6[%c1, %c0_3] : memref<8x1024xf32, #tpu.memory_space<vmem>>, vector<1x256xf32>
    %c2 = arith.constant 2 : index
    %c0_4 = arith.constant 0 : index
    %4 = vector.load %arg6[%c2, %c0_4] : memref<8x1024xf32, #tpu.memory_space<vmem>>, vector<1x256xf32>
    %c3 = arith.constant 3 : index
    %c0_5 = arith.constant 0 : index
    %5 = vector.load %arg6[%c3, %c0_5] : memref<8x1024xf32, #tpu.memory_space<vmem>>, vector<1x512xf32>
    %c4 = arith.constant 4 : index
    %c0_6 = arith.constant 0 : index
    %6 = vector.load %arg6[%c4, %c0_6] : memref<8x1024xf32, #tpu.memory_space<vmem>>, vector<1x512xf32>
    %c5 = arith.constant 5 : index
    %c0_7 = arith.constant 0 : index
    %7 = vector.load %arg6[%c5, %c0_7] : memref<8x1024xf32, #tpu.memory_space<vmem>>, vector<1x1024xf32>
    %c6 = arith.constant 6 : index
    %c0_8 = arith.constant 0 : index
    %8 = vector.load %arg6[%c6, %c0_8] : memref<8x1024xf32, #tpu.memory_space<vmem>>, vector<1x1024xf32>
    %c0_9 = arith.constant 0 : index
    %c0_10 = arith.constant 0 : index
    %9 = vector.load %arg2[%c0_9, %c0_10] : memref<128x128xbf16, #tpu.memory_space<vmem>>, vector<128x128xbf16>
    %cst = arith.constant dense<0.000000e+00> : vector<8x128xf32>
    %10 = tpu.matmul %1, %9, %cst {dimension_numbers = #tpu.dot_dimension_numbers<[1], [0], [0], [1], [0, 0, 1, 1], [], []>} : vector<8x128xbf16>, vector<128x128xbf16>, vector<8x128xf32> -> vector<8x128xf32>
    %11 = vector.broadcast %2 : vector<1x128xf32> to vector<8x128xf32>
    %12 = arith.addf %10, %11 : vector<8x128xf32>
    %cst_11 = arith.constant 0.000000e+00 : f32
    %13 = vector.broadcast %cst_11 : f32 to vector<8x128xf32>
    %14 = arith.cmpf ogt, %12, %13 : vector<8x128xf32>
    %cst_12 = arith.constant 2.000000e-01 : f32
    %15 = vector.broadcast %cst_12 : f32 to vector<8x128xf32>
    %16 = arith.mulf %15, %12 : vector<8x128xf32>
    %17 = arith.select %14, %12, %16 : vector<8x128xi1>, vector<8x128xf32>
    %18 = arith.truncf %17 : vector<8x128xf32> to vector<8x128xbf16>
    %c0_13 = arith.constant 0 : index
    %c0_14 = arith.constant 0 : index
    %19 = vector.load %arg3[%c0_13, %c0_14] : memref<128x256xbf16, #tpu.memory_space<vmem>>, vector<128x256xbf16>
    %cst_15 = arith.constant dense<0.000000e+00> : vector<8x256xf32>
    %20 = tpu.matmul %18, %19, %cst_15 {dimension_numbers = #tpu.dot_dimension_numbers<[1], [0], [0], [1], [0, 0, 1, 1], [], []>} : vector<8x128xbf16>, vector<128x256xbf16>, vector<8x256xf32> -> vector<8x256xf32>
    %cst_16 = arith.constant dense<0.000000e+00> : vector<256xf32>
    %21 = vector.multi_reduction <add>, %20, %cst_16 [0] : vector<8x256xf32> to vector<256xf32>
    %22 = vector.shape_cast %21 : vector<256xf32> to vector<1x256xf32>
    %cst_17 = arith.constant 8.000000e+00 : f32
    %23 = vector.broadcast %cst_17 : f32 to vector<1x256xf32>
    %24 = arith.divf %22, %23 : vector<1x256xf32>
    %25 = vector.broadcast %24 : vector<1x256xf32> to vector<8x256xf32>
    %26 = arith.subf %20, %25 : vector<8x256xf32>
    %27 = arith.mulf %26, %26 : vector<8x256xf32>
    %cst_18 = arith.constant dense<0.000000e+00> : vector<256xf32>
    %28 = vector.multi_reduction <add>, %27, %cst_18 [0] : vector<8x256xf32> to vector<256xf32>
    %29 = vector.shape_cast %28 : vector<256xf32> to vector<1x256xf32>
    %cst_19 = arith.constant 8.000000e+00 : f32
    %30 = vector.broadcast %cst_19 : f32 to vector<1x256xf32>
    %31 = arith.divf %29, %30 : vector<1x256xf32>
    %cst_20 = arith.constant 8.000000e-01 : f32
    %32 = vector.broadcast %cst_20 : f32 to vector<1x256xf32>
    %33 = arith.addf %31, %32 : vector<1x256xf32>
    %34 = math.rsqrt %33 : vector<1x256xf32>
    %35 = vector.broadcast %24 : vector<1x256xf32> to vector<8x256xf32>
    %36 = arith.subf %20, %35 : vector<8x256xf32>
    %37 = vector.broadcast %34 : vector<1x256xf32> to vector<8x256xf32>
    %38 = arith.mulf %36, %37 : vector<8x256xf32>
    %39 = vector.broadcast %3 : vector<1x256xf32> to vector<8x256xf32>
    %40 = arith.mulf %38, %39 : vector<8x256xf32>
    %41 = vector.broadcast %4 : vector<1x256xf32> to vector<8x256xf32>
    %42 = arith.addf %40, %41 : vector<8x256xf32>
    %cst_21 = arith.constant 0.000000e+00 : f32
    %43 = vector.broadcast %cst_21 : f32 to vector<8x256xf32>
    %44 = arith.cmpf ogt, %42, %43 : vector<8x256xf32>
    %cst_22 = arith.constant 2.000000e-01 : f32
    %45 = vector.broadcast %cst_22 : f32 to vector<8x256xf32>
    %46 = arith.mulf %45, %42 : vector<8x256xf32>
    %47 = arith.select %44, %42, %46 : vector<8x256xi1>, vector<8x256xf32>
    %48 = arith.truncf %47 : vector<8x256xf32> to vector<8x256xbf16>
    %c0_23 = arith.constant 0 : index
    %c0_24 = arith.constant 0 : index
    %49 = vector.load %arg4[%c0_23, %c0_24] : memref<256x512xbf16, #tpu.memory_space<vmem>>, vector<256x512xbf16>
    %cst_25 = arith.constant dense<0.000000e+00> : vector<8x512xf32>
    %50 = tpu.matmul %48, %49, %cst_25 {dimension_numbers = #tpu.dot_dimension_numbers<[1], [0], [0], [1], [0, 0, 1, 1], [], []>} : vector<8x256xbf16>, vector<256x512xbf16>, vector<8x512xf32> -> vector<8x512xf32>
    %cst_26 = arith.constant dense<0.000000e+00> : vector<512xf32>
    %51 = vector.multi_reduction <add>, %50, %cst_26 [0] : vector<8x512xf32> to vector<512xf32>
    %52 = vector.shape_cast %51 : vector<512xf32> to vector<1x512xf32>
    %cst_27 = arith.constant 8.000000e+00 : f32
    %53 = vector.broadcast %cst_27 : f32 to vector<1x512xf32>
    %54 = arith.divf %52, %53 : vector<1x512xf32>
    %55 = vector.broadcast %54 : vector<1x512xf32> to vector<8x512xf32>
    %56 = arith.subf %50, %55 : vector<8x512xf32>
    %57 = arith.mulf %56, %56 : vector<8x512xf32>
    %cst_28 = arith.constant dense<0.000000e+00> : vector<512xf32>
    %58 = vector.multi_reduction <add>, %57, %cst_28 [0] : vector<8x512xf32> to vector<512xf32>
    %59 = vector.shape_cast %58 : vector<512xf32> to vector<1x512xf32>
    %cst_29 = arith.constant 8.000000e+00 : f32
    %60 = vector.broadcast %cst_29 : f32 to vector<1x512xf32>
    %61 = arith.divf %59, %60 : vector<1x512xf32>
    %cst_30 = arith.constant 8.000000e-01 : f32
    %62 = vector.broadcast %cst_30 : f32 to vector<1x512xf32>
    %63 = arith.addf %61, %62 : vector<1x512xf32>
    %64 = math.rsqrt %63 : vector<1x512xf32>
    %65 = vector.broadcast %54 : vector<1x512xf32> to vector<8x512xf32>
    %66 = arith.subf %50, %65 : vector<8x512xf32>
    %67 = vector.broadcast %64 : vector<1x512xf32> to vector<8x512xf32>
    %68 = arith.mulf %66, %67 : vector<8x512xf32>
    %69 = vector.broadcast %5 : vector<1x512xf32> to vector<8x512xf32>
    %70 = arith.mulf %68, %69 : vector<8x512xf32>
    %71 = vector.broadcast %6 : vector<1x512xf32> to vector<8x512xf32>
    %72 = arith.addf %70, %71 : vector<8x512xf32>
    %cst_31 = arith.constant 0.000000e+00 : f32
    %73 = vector.broadcast %cst_31 : f32 to vector<8x512xf32>
    %74 = arith.cmpf ogt, %72, %73 : vector<8x512xf32>
    %cst_32 = arith.constant 2.000000e-01 : f32
    %75 = vector.broadcast %cst_32 : f32 to vector<8x512xf32>
    %76 = arith.mulf %75, %72 : vector<8x512xf32>
    %77 = arith.select %74, %72, %76 : vector<8x512xi1>, vector<8x512xf32>
    %78 = arith.truncf %77 : vector<8x512xf32> to vector<8x512xbf16>
    %c0_33 = arith.constant 0 : index
    %c0_34 = arith.constant 0 : index
    %79 = vector.load %arg5[%c0_33, %c0_34] : memref<512x1024xbf16, #tpu.memory_space<vmem>>, vector<512x1024xbf16>
    %cst_35 = arith.constant dense<0.000000e+00> : vector<8x1024xf32>
    %80 = tpu.matmul %78, %79, %cst_35 {dimension_numbers = #tpu.dot_dimension_numbers<[1], [0], [0], [1], [0, 0, 1, 1], [], []>} : vector<8x512xbf16>, vector<512x1024xbf16>, vector<8x1024xf32> -> vector<8x1024xf32>
    %cst_36 = arith.constant dense<0.000000e+00> : vector<1024xf32>
    %81 = vector.multi_reduction <add>, %80, %cst_36 [0] : vector<8x1024xf32> to vector<1024xf32>
    %82 = vector.shape_cast %81 : vector<1024xf32> to vector<1x1024xf32>
    %cst_37 = arith.constant 8.000000e+00 : f32
    %83 = vector.broadcast %cst_37 : f32 to vector<1x1024xf32>
    %84 = arith.divf %82, %83 : vector<1x1024xf32>
    %85 = vector.broadcast %84 : vector<1x1024xf32> to vector<8x1024xf32>
    %86 = arith.subf %80, %85 : vector<8x1024xf32>
    %87 = arith.mulf %86, %86 : vector<8x1024xf32>
    %cst_38 = arith.constant dense<0.000000e+00> : vector<1024xf32>
    %88 = vector.multi_reduction <add>, %87, %cst_38 [0] : vector<8x1024xf32> to vector<1024xf32>
    %89 = vector.shape_cast %88 : vector<1024xf32> to vector<1x1024xf32>
    %cst_39 = arith.constant 8.000000e+00 : f32
    %90 = vector.broadcast %cst_39 : f32 to vector<1x1024xf32>
    %91 = arith.divf %89, %90 : vector<1x1024xf32>
    %cst_40 = arith.constant 8.000000e-01 : f32
    %92 = vector.broadcast %cst_40 : f32 to vector<1x1024xf32>
    %93 = arith.addf %91, %92 : vector<1x1024xf32>
    %94 = math.rsqrt %93 : vector<1x1024xf32>
    %95 = vector.broadcast %84 : vector<1x1024xf32> to vector<8x1024xf32>
    %96 = arith.subf %80, %95 : vector<8x1024xf32>
    %97 = vector.broadcast %94 : vector<1x1024xf32> to vector<8x1024xf32>
    %98 = arith.mulf %96, %97 : vector<8x1024xf32>
    %99 = vector.broadcast %7 : vector<1x1024xf32> to vector<8x1024xf32>
    %100 = arith.mulf %98, %99 : vector<8x1024xf32>
    %101 = vector.broadcast %8 : vector<1x1024xf32> to vector<8x1024xf32>
    %102 = arith.addf %100, %101 : vector<8x1024xf32>
    %cst_41 = arith.constant 0.000000e+00 : f32
    %103 = vector.broadcast %cst_41 : f32 to vector<8x1024xf32>
    %104 = arith.cmpf ogt, %102, %103 : vector<8x1024xf32>
    %cst_42 = arith.constant 2.000000e-01 : f32
    %105 = vector.broadcast %cst_42 : f32 to vector<8x1024xf32>
    %106 = arith.mulf %105, %102 : vector<8x1024xf32>
    %107 = arith.select %104, %102, %106 : vector<8x1024xi1>, vector<8x1024xf32>
    %108 = arith.truncf %107 : vector<8x1024xf32> to vector<8x1024xbf16>
    %c512_i32 = arith.constant 512 : i32
    %109 = arith.muli %arg0, %c512_i32 : i32
    %110 = tpu.assume_multiple %109, 512 : i32
    %c0_43 = arith.constant 0 : index
    %111 = arith.index_cast %110 : i32 to index
    %112 = vector.load %arg7[%c0_43, %111] : memref<1x1024xf32, #tpu.memory_space<vmem>>, vector<1x512xf32>
    %c0_44 = arith.constant 0 : index
    %c0_45 = arith.constant 0 : index
    %c0_46 = arith.constant 0 : index
    %113 = vector.load %arg8[%c0_44, %c0_45, %c0_46] : memref<1x1024x512xbf16, #tpu.memory_space<vmem>>, vector<1x1024x512xbf16>
    %114 = vector.shape_cast %113 : vector<1x1024x512xbf16> to vector<1024x512xbf16>
    %cst_47 = arith.constant dense<0.000000e+00> : vector<8x512xf32>
    %115 = tpu.matmul %108, %114, %cst_47 {dimension_numbers = #tpu.dot_dimension_numbers<[1], [0], [0], [1], [0, 0, 1, 1], [], []>} : vector<8x1024xbf16>, vector<1024x512xbf16>, vector<8x512xf32> -> vector<8x512xf32>
    %116 = vector.broadcast %112 : vector<1x512xf32> to vector<8x512xf32>
    %117 = arith.addf %115, %116 : vector<8x512xf32>
    %118 = math.tanh %117 : vector<8x512xf32>
    %c0_48 = arith.constant 0 : index
    %c0_49 = arith.constant 0 : index
    %119 = vector.load %arg9[%c0_48, %c0_49] : memref<8x512xf32, #tpu.memory_space<vmem>>, vector<8x512xf32>
    tpu.vector_store %arg9[%c0_48, %c0_49], %118 {strides = array<i32>} : memref<8x512xf32, #tpu.memory_space<vmem>>, vector<8x512xf32>,
    return
  }
  func.func @transform_0(%arg0: i32) -> (i32, i32) {
    %c0_i32 = arith.constant 0 : i32
    %c0_i32_0 = arith.constant 0 : i32
    %c0_i32_1 = arith.constant 0 : i32
    return %c0_i32, %c0_i32_0 : i32, i32
  }
  func.func @transform_1(%arg0: i32) -> (i32, i32) {
    %c0_i32 = arith.constant 0 : i32
    %c0_i32_0 = arith.constant 0 : i32
    %c0_i32_1 = arith.constant 0 : i32
    return %c0_i32, %c0_i32_0 : i32, i32
  }
  func.func @transform_2(%arg0: i32) -> (i32, i32) {
    %c0_i32 = arith.constant 0 : i32
    %c0_i32_0 = arith.constant 0 : i32
    %c0_i32_1 = arith.constant 0 : i32
    return %c0_i32, %c0_i32_0 : i32, i32
  }
  func.func @transform_3(%arg0: i32) -> (i32, i32) {
    %c0_i32 = arith.constant 0 : i32
    %c0_i32_0 = arith.constant 0 : i32
    %c0_i32_1 = arith.constant 0 : i32
    return %c0_i32, %c0_i32_0 : i32, i32
  }
  func.func @transform_4(%arg0: i32) -> (i32, i32) {
    %c0_i32 = arith.constant 0 : i32
    %c0_i32_0 = arith.constant 0 : i32
    %c0_i32_1 = arith.constant 0 : i32
    return %c0_i32, %c0_i32_0 : i32, i32
  }
  func.func @transform_5(%arg0: i32) -> (i32, i32) {
    %c0_i32 = arith.constant 0 : i32
    %c0_i32_0 = arith.constant 0 : i32
    %c0_i32_1 = arith.constant 0 : i32
    return %c0_i32, %c0_i32_0 : i32, i32
  }
  func.func @transform_6(%arg0: i32) -> (i32, i32) {
    %c0_i32 = arith.constant 0 : i32
    %c0_i32_0 = arith.constant 0 : i32
    %c0_i32_1 = arith.constant 0 : i32
    return %c0_i32, %c0_i32_0 : i32, i32
  }
  func.func @transform_7(%arg0: i32) -> (i32, i32, i32) {
    %c0_i32 = arith.constant 0 : i32
    %c0_i32_0 = arith.constant 0 : i32
    %c0_i32_1 = arith.constant 0 : i32
    return %arg0, %c0_i32, %c0_i32_0 : i32, i32, i32
  }
  func.func @transform_8(%arg0: i32) -> (i32, i32) {
    %c0_i32 = arith.constant 0 : i32
    %c0_i32_0 = arith.constant 0 : i32
    return %c0_i32, %arg0 : i32, i32
  }
}

</mosaic_0001>

<bundles_post_ra>
// kernel: generator_forward.1
= control target key start
LH: loop header
LB: loop body
LE: loop exit
PB: predicated region body
PF: predicated region fallthrough
CT: control target
= control target key end

     0   :  { %13 = vsyncpa [#allocation3], 0  ;;  %s7919_s0 = inlined_call_operand.vmem [shape: f32[8,128], index: 0, kind: input, shape index: {}]   ;;  %s7920_s1 = inlined_call_operand.hbm [shape: bf16[128,128], index: 1, kind: input, shape index: {}]   ;;  %s7921_s2 = inlined_call_operand.hbm [shape: bf16[128,256], index: 2, kind: input, shape index: {}]   ;;  %s7922_s3 = inlined_call_operand.hbm [shape: bf16[256,512], index: 3, kind: input, shape index: {}]   ;;  %s7923_s4 = inlined_call_operand.hbm [shape: bf16[512,1024], index: 4, kind: input, shape index: {}]   ;;  %s7924_s5 = inlined_call_operand.hbm [shape: f32[8,1024], index: 5, kind: input, shape index: {}]   ;;  %s7925_s6 = inlined_call_operand.hbm [shape: f32[1,1024], index: 6, kind: input, shape index: {}]   ;;  %s7926_s7 = inlined_call_operand.hbm [shape: bf16[2,1024,512], index: 7, kind: input, shape index: {}]   ;;  %s7927_s8 = inlined_call_operand.vmem [shape: f32[8,1024], index: 8, kind: output, shape index: {}]  }
   0x1   :  { %14 = vsyncpa [#allocation5], 0 }
   0x2   :  { %15 = vsyncpa [#allocation8], 0 }
   0x3   :  { %16 = vsyncpa [#allocation11], 0  ;;  %s7195_s27 = smov 0   ;;  %s7197_s28 = smov 0  }
   0x4   :  { %s7199_s29 = smov 0   ;;  %s7201_s30 = smov 0  }
   0x5 LB: > { %s7132_s9 = smov [#allocation2]   ;;  %s7216_s11 = sadd.s32 4294967295, %s7130_s30   ;;  %s7130_s30 = sphi %s7201_s30, %s7949_s30   ;;  %s7126_s29 = sphi %s7199_s29, %s7948_s29   ;;  %s7122_s28 = sphi %s7197_s28, %s7947_s28   ;;  %s7118_s27 = sphi %s7195_s27, %s7946_s27  }
   0x6   : > { %s241_s10 = sshll.u32 %s7132_s9, 4  ;;  %p5525_p0 = scmp.ge.s32.totalorder %s7130_s30, 1  ;;  %s7221_s10 = int_to_ptr.vmem [resolvable:$true] %s241_s10 }
   0x7   : > { %p7928_p1 = scmp.eq.s32.totalorder %s7216_s11, 0  ;;  %p226_p2 = scmp.lt.s32.totalorder %s7130_s30, 3 }
   0x8   : > { %s7133_s13 = smov [#allocation4]   ;;  %s7134_s16 = smov [#allocation7]  }
   0x9   : > { %p7223_p3 = pnand %p5525_p0, %p226_p2  ;;  %s254_s14 = sshll.u32 %s7133_s13, 4  ;;  %s7235_s14 = int_to_ptr.vmem [resolvable:$true] %s254_s14 }
   0xa   : > { %s7237_s17 = sshll.u32 %s7134_s16, 4  ;;  %s6882_s20 = scalar_lea.hbm %s7920_s1, 1024  ;;  %s281_s17 = int_to_ptr.vmem [resolvable:$true] %s7237_s17 }
   0xb   : > { %s7930_s12 = scalar_select %p7223_p3, 1, 0 }
   0xc   : > { %p6249_p4 = pneg %p7223_p3  ;;  %p6883_p6 = scmp.ne.s32.totalorder %s7920_s1, %s6882_s20 }
   0xd   : > { %p6889_p10 = scmp.lt.u32.totalorder %s6882_s20, %s7920_s1 }
   0xe   : > { %p7231_p5 = pnand %p6249_p4, %p7928_p1 }
  0x10   : > { %p7247_p7 = pneg %p7231_p5 }
  0x12   : > { %p6885_p8 = pnand %p7247_p7, %p6883_p6 }
  0x14   : > { %p6886_p9 = pneg %p6885_p8 }
  0x16   : > { %p6891_p11 = pnand %p6889_p10, %p6886_p9 }
  0x18   : > { %6894 = shalt.err (!%p6891_p11)
}
  0x19   : > { %s6895_s26 = scalar_lea.vmem %s7221_s10, 1024  ;;  %p6903_p2 = scmp.lt.s32.totalorder %s7221_s10, %s7221_s10 }
  0x1a   : > { %p6896_p12 = scmp.ne.s32.totalorder %s7221_s10, %s6895_s26  ;;  %p6904_p4 = scmp.lt.s32.totalorder %s6895_s26, %s6895_s26 }
  0x1c   : > { %p6898_p13 = pnand %p6896_p12, %p7247_p7  ;;  %p6905_p6 = por %p6904_p4, %p6903_p2 }
  0x1e   : > { %p6899_p0 = pneg %p6898_p13 }
  0x20   : > { %p6906_p8 = pnand %p6905_p6, %p6899_p0 }
  0x22   : > { %6909 = shalt.err (!%p6906_p8)
}
  0x23   : > { %s7135_s9 = smov 64   ;;  %s7136_s13 = smov 4  }
  0x24   : > { %6252 = dma.hbm_to_vmem [thread:$0]  (!%p7231_p5), %s7920_s1, 1024, %s7221_s10, [#allocation3], %s7135_s9, %s7135_s9, %s7136_s13  }
  0x25   : > { %s6910_s21 = scalar_lea.hbm %s7921_s2, 2048 }
  0x26   : > { %p6911_p9 = scmp.ne.s32.totalorder %s7921_s2, %s6910_s21  ;;  %p6917_p12 = scmp.lt.u32.totalorder %s6910_s21, %s7921_s2 }
  0x28   : > { %p6913_p10 = pnand %p6911_p9, %p7247_p7 }
  0x2a   : > { %p6914_p11 = pneg %p6913_p10 }
  0x2c   : > { %p6919_p13 = pnand %p6917_p12, %p6914_p11 }
  0x2e   : > { %6922 = shalt.err (!%p6919_p13)
}
  0x2f   : > { %s6923_s10 = scalar_lea.vmem %s7235_s14, 2048  ;;  %p6931_p6 = scmp.lt.s32.totalorder %s7235_s14, %s7235_s14 }
  0x30   : > { %p6924_p0 = scmp.ne.s32.totalorder %s7235_s14, %s6923_s10  ;;  %p6932_p8 = scmp.lt.s32.totalorder %s6923_s10, %s6923_s10 }
  0x32   : > { %p6926_p2 = pnand %p6924_p0, %p7247_p7  ;;  %p6933_p9 = por %p6932_p8, %p6931_p6 }
  0x34   : > { %p6927_p4 = pneg %p6926_p2 }
  0x36   : > { %p6934_p10 = pnand %p6933_p9, %p6927_p4 }
  0x38   : > { %6937 = shalt.err (!%p6934_p10)
}
  0x39   : > { %s7137_s9 = smov 128   ;;  %s7138_s13 = smov 8  }
  0x3a   : > { %6255 = dma.hbm_to_vmem [thread:$0]  (!%p7231_p5), %s7921_s2, 2048, %s7235_s14, [#allocation5], %s7137_s9, %s7137_s9, %s7138_s13  }
  0x3b   : > { %s6938_s21 = scalar_lea.hbm %s7923_s4, 32768 }
  0x3c   : > { %p6939_p11 = scmp.ne.s32.totalorder %s7923_s4, %s6938_s21  ;;  %p6945_p0 = scmp.lt.u32.totalorder %s6938_s21, %s7923_s4 }
  0x3e   : > { %p6941_p12 = pnand %p6939_p11, %p7247_p7 }
  0x40   : > { %p6942_p13 = pneg %p6941_p12 }
  0x42   : > { %p6947_p2 = pnand %p6945_p0, %p6942_p13 }
  0x44   : > { %6950 = shalt.err (!%p6947_p2)
}
  0x45   : > { %s6951_s10 = scalar_lea.vmem %s281_s17, 32768  ;;  %p6959_p9 = scmp.lt.s32.totalorder %s281_s17, %s281_s17 }
  0x46   : > { %p6952_p4 = scmp.ne.s32.totalorder %s281_s17, %s6951_s10  ;;  %p6960_p10 = scmp.lt.s32.totalorder %s6951_s10, %s6951_s10 }
  0x48   : > { %p6954_p6 = pnand %p6952_p4, %p7247_p7  ;;  %p6961_p1 = por %p6960_p10, %p6959_p9 }
  0x4a   : > { %p6955_p8 = pneg %p6954_p6 }
  0x4c   : > { %p6962_p3 = pnand %p6961_p1, %p6955_p8 }
  0x4e   : > { %6965 = shalt.err (!%p6962_p3)
}
  0x4f   : > { %s7139_s14 = smov 512   ;;  %s7140_s9 = smov 32  }
  0x50   : > { %6261 = dma.hbm_to_vmem [thread:$0]  (!%p7231_p5), %s7923_s4, 32768, %s281_s17, [#allocation8], %s7139_s14, %s7139_s14, %s7140_s9  }
  0x51   : > { %s7141_s18 = smov [#allocation6]   ;;  %s6966_s22 = scalar_lea.hbm %s7922_s3, 8192 }
  0x52   : > { %s267_s19 = sshll.u32 %s7141_s18, 4  ;;  %p6967_p1 = scmp.ne.s32.totalorder %s7922_s3, %s6966_s22  ;;  %s268_s19 = int_to_ptr.vmem [resolvable:$true] %s267_s19 }
  0x53   : > { %p6973_p12 = scmp.lt.u32.totalorder %s6966_s22, %s7922_s3 }
  0x54   : > { %p6969_p3 = pnand %p6967_p1, %p7247_p7 }
  0x56   : > { %p6970_p11 = pneg %p6969_p3 }
  0x58   : > { %p6975_p13 = pnand %p6973_p12, %p6970_p11 }
  0x5a   : > { %6978 = shalt.err (!%p6975_p13)
}
  0x5b   : > { %s6979_s17 = scalar_lea.vmem %s268_s19, 8192  ;;  %p6987_p6 = scmp.lt.s32.totalorder %s268_s19, %s268_s19 }
  0x5c   : > { %p6980_p0 = scmp.ne.s32.totalorder %s268_s19, %s6979_s17  ;;  %p6988_p8 = scmp.lt.s32.totalorder %s6979_s17, %s6979_s17 }
  0x5e   : > { %p6982_p2 = pnand %p6980_p0, %p7247_p7  ;;  %p6989_p9 = por %p6988_p8, %p6987_p6 }
  0x60   : > { %p6983_p4 = pneg %p6982_p2 }
  0x62   : > { %p6990_p10 = pnand %p6989_p9, %p6983_p4 }
  0x64   : > { %6993 = shalt.err (!%p6990_p10)
}
  0x65   : > { %s7142_s14 = smov 256   ;;  %s7143_s9 = smov 16  }
  0x66   : > { %6258 = dma.hbm_to_vmem [thread:$0]  (!%p7231_p5), %s7922_s3, 8192, %s268_s19, [#allocation5], %s7142_s14, %s7142_s14, %s7143_s9  }
  0x67   : > { %s7144_s18 = smov [#allocation9]   ;;  %s7145_s21 = smov [#allocation10]  }
  0x68   : > { %s294_s20 = sshll.u32 %s7144_s18, 4  ;;  %s305_s22 = sshll.u32 %s7145_s21, 4  ;;  %s295_s20 = int_to_ptr.vmem [resolvable:$true] %s294_s20  ;;  %s7331_s22 = int_to_ptr.vmem [resolvable:$true] %s305_s22 }
  0x69   : > { %s6994_s26 = scalar_lea.hbm %s7924_s5, 1024 }
  0x6a   : > { %p6995_p1 = scmp.ne.s32.totalorder %s7924_s5, %s6994_s26  ;;  %p7001_p12 = scmp.lt.u32.totalorder %s6994_s26, %s7924_s5 }
  0x6c   : > { %p6997_p3 = pnand %p6995_p1, %p7247_p7 }
  0x6e   : > { %p6998_p11 = pneg %p6997_p3 }
  0x70   : > { %p7003_p13 = pnand %p7001_p12, %p6998_p11 }
  0x72   : > { %7006 = shalt.err (!%p7003_p13)
}
  0x73   : > { %s7007_s16 = scalar_lea.vmem %s295_s20, 1024  ;;  %p7015_p6 = scmp.lt.s32.totalorder %s295_s20, %s295_s20 }
  0x74   : > { %p7008_p0 = scmp.ne.s32.totalorder %s295_s20, %s7007_s16  ;;  %p7016_p8 = scmp.lt.s32.totalorder %s7007_s16, %s7007_s16 }
  0x76   : > { %p7010_p2 = pnand %p7008_p0, %p7247_p7  ;;  %p7017_p9 = por %p7016_p8, %p7015_p6 }
  0x78   : > { %p7011_p4 = pneg %p7010_p2 }
  0x7a   : > { %p7018_p10 = pnand %p7017_p9, %p7011_p4 }
  0x7c   : > { %7021 = shalt.err (!%p7018_p10)
}
  0x7d   : > { %6264 = dma.hbm_to_vmem [thread:$0]  (!%p7231_p5), %s7924_s5, 1024, %s295_s20, [#allocation8]  }
  0x7e   : > { %s7022_s26 = scalar_lea.hbm %s7925_s6, 128 }
  0x7f   : > { %p7023_p1 = scmp.ne.s32.totalorder %s7925_s6, %s7022_s26  ;;  %p7029_p12 = scmp.lt.u32.totalorder %s7022_s26, %s7925_s6 }
  0x81   : > { %p7025_p3 = pnand %p7023_p1, %p7247_p7 }
  0x83   : > { %p7026_p11 = pneg %p7025_p3 }
  0x85   : > { %p7031_p13 = pnand %p7029_p12, %p7026_p11 }
  0x87   : > { %7034 = shalt.err (!%p7031_p13)
}
  0x88   : > { %s7035_s20 = scalar_lea.vmem %s7331_s22, 128  ;;  %p7043_p6 = scmp.lt.s32.totalorder %s7331_s22, %s7331_s22 }
  0x89   : > { %p7036_p0 = scmp.ne.s32.totalorder %s7331_s22, %s7035_s20  ;;  %p7044_p8 = scmp.lt.s32.totalorder %s7035_s20, %s7035_s20 }
  0x8b   : > { %p7038_p2 = pnand %p7036_p0, %p7247_p7  ;;  %p7045_p9 = por %p7044_p8, %p7043_p6 }
  0x8d   : > { %p7039_p4 = pneg %p7038_p2 }
  0x8f   : > { %p7046_p10 = pnand %p7045_p9, %p7039_p4 }
  0x91   : > { %7049 = shalt.err (!%p7046_p10)
}
  0x92   : > { %6267 = dma.hbm_to_vmem [thread:$0]  (!%p7231_p5), %s7925_s6, 128, %s7331_s22, [#allocation11]  }
  0x93   : > { %s7375_s15 = sadd.s32 1, %s7130_s30   ;;  %s176_s23 = sadd.s32 1, %s7126_s29 }
  0x94   : > { %s173_s21 = ssub.s32 %s7130_s30, %s7375_s15  ;;  %p183_p7 = scmp.ne.s32.totalorder %s7126_s29, %s7122_s28 }
  0x95   : > { %p174_p1 = scmp.eq.s32.totalorder %s173_s21, 0  ;;  %p184_p3 = scmp.eq.s32.totalorder %s7130_s30, 0 }
  0x96   : > { %p189_p11 = scmp.ne.s32.totalorder %s7122_s28, %s7118_s27  ;;  %p6278_p12 = scmp.lt.s32.totalorder %s7130_s30, 2 }
  0x97   : > { %s7387_s24 = scalar_select %p174_p1, %s7126_s29, %s176_s23  }
  0x98   : > { %p185_p13 = por %p184_p3, %p183_p7  ;;  %p7933_p0 = scmp.eq.s32.totalorder %s7216_s11, 0 }
  0x99   : > { %s316_s26 = sand.u32 1, %s7130_s30   ;;  %s318_s22 = sand.u32 1, %s7126_s29  }
  0x9a   : > { %p7391_p2 = por %p7933_p0, %p189_p11  ;;  %s5533_s10 = sshll.u32 %s318_s22, 11 }
  0x9b   : > { %s6149_s17 = sshll.u32 %s7130_s30, 15  ;;  %s320_s27 = scalar_lea.vmem [#allocation12], %s5533_s10 }
  0x9c   : > { %s7401_s20 = scalar_lea.hbm %s7926_s7, %s6149_s17  ;;  %s327_s16 = sshll.u32 %s320_s27, 4  ;;  %s7403_s16 = int_to_ptr.vmem [resolvable:$true] %s327_s16 }
  0x9d   : > { %p7405_p5 = pnand %p6278_p12, %p185_p13  ;;  %s7409_s30 = scalar_lea.sflag [#allocation3], %s316_s26 }
  0x9e   : > { %s7050_s23 = scalar_lea.hbm %s7401_s20, 32768  ;;  %s7055_s10 = scalar_lea.hbm %s7926_s7, 65536 }
  0x9f   : > { %p7051_p4 = scmp.ne.s32.totalorder %s7401_s20, %s7050_s23  ;;  %p7052_p6 = pneg %p7405_p5 }
  0xa0   : > { %p7056_p10 = scmp.lt.u32.totalorder %s7401_s20, %s7926_s7  ;;  %p7057_p7 = scmp.lt.u32.totalorder %s7055_s10, %s7050_s23 }
  0xa1   : > { %p7053_p8 = pnand %p7052_p6, %p7051_p4  ;;  %p7059_p3 = scmp.lt.u32.totalorder %s7050_s23, %s7401_s20 }
  0xa2   : > { %p7058_p1 = por %p7057_p7, %p7056_p10 }
  0xa3   : > { %p7054_p9 = pneg %p7053_p8 }
  0xa4   : > { %p7060_p11 = por %p7059_p3, %p7058_p1 }
  0xa6   : > { %p7061_p12 = pnand %p7060_p11, %p7054_p9 }
  0xa8   : > { %7064 = shalt.err (!%p7061_p12)
}
  0xa9   : > { %s7065_s26 = scalar_lea.vmem %s7403_s16, 32768  ;;  %s7146_s19 = smov [#allocation12]  }
  0xaa   : > { %p7066_p13 = scmp.ne.s32.totalorder %s7403_s16, %s7065_s26  ;;  %s7070_s27 = sshll.u32 %s7146_s19, 4  ;;  %s7071_s27 = int_to_ptr.vmem [resolvable:$false] %s7070_s27 }
  0xab   : > { %s7072_s21 = scalar_lea.vmem %s7071_s27, 65536  ;;  %p7073_p8 = scmp.lt.s32.totalorder %s7403_s16, %s7071_s27 }
  0xac   : > { %p7068_p0 = pnand %p7066_p13, %p7052_p6  ;;  %p7074_p10 = scmp.lt.s32.totalorder %s7072_s21, %s7065_s26 }
  0xae   : > { %p7069_p4 = pneg %p7068_p0  ;;  %p7075_p7 = por %p7074_p10, %p7073_p8 }
  0xb0   : > { %p7076_p1 = pnand %p7075_p7, %p7069_p4 }
  0xb2   : > { %7079 = shalt.err (!%p7076_p1)
}
  0xb3   : > { %6271 = dma.hbm_to_vmem [thread:$0]  (!%p7405_p5), %s7401_s20, 32768, %s7403_s16, %s7409_s30, %s7142_s14, %s7142_s14, %s7143_s9  }
  0xb4   : > { %p7936_p6 = scmp.ne.s32.totalorder %s7930_s12, 0 }
  0xb5   : > { %p7937_p9 = scmp.eq.s32.totalorder (!%p7936_p6), %s7216_s11, 0 }
  0xb6   : > { %339 = sbr.rel (%p7936_p6) target bundleno = 1752 (0x6d8), region = 52 }
  0xbd   : > { %7097 = dma.done.wait (%p7937_p9), [#allocation3], 1024   ;;  %p7938_p3 = pmov %p7937_p9 }
  0xbf   : > { %7099 = vsyncadd (%p7938_p3), [#allocation3], 4294966272  ;;  %p7939_p11 = pmov %p7938_p3 }
  0xc0   : > { %p7940_p12 = pmov %p7938_p3 }
  0xc1   : > { %7101 = dma.done.wait (%p7939_p11), [#allocation5], 10240  }
  0xc2   : > { %7103 = vsyncadd (%p7940_p12), [#allocation5], 4294957056  ;;  %p7941_p13 = pmov %p7938_p3 }
  0xc3   : > { %p7942_p5 = pmov %p7938_p3 }
  0xc4   : > { %7105 = dma.done.wait (%p7941_p13), [#allocation8], 33792  }
  0xc5   : > { %7107 = vsyncadd (%p7942_p5), [#allocation8], 4294933504  ;;  %p7943_p0 = pmov %p7938_p3 }
  0xc7   : > { %7109 = dma.done.wait (%p7943_p0), [#allocation11], 128   ;;  %p7944_p4 = pmov %p7943_p0 }
  0xc8   : > { %s365_s12 = sand.u32 1, %s7216_s11   ;;  %s367_s14 = sand.u32 1, %s7122_s28  }
  0xc9   : > { %7111 = vsyncadd (%p7944_p4), [#allocation11], 4294967168  ;;  %s5543_s9 = sshll.u32 %s367_s14, 11  ;;  %s366_s20 = scalar_lea.sflag [#allocation3], %s365_s12 }
  0xca   : > { %s7460_s16 = scalar_lea.vmem [#allocation12], %s5543_s9 }
  0xcb   : > { %7113 = dma.done.wait (%p7391_p2), %s366_s20, 32768  }
  0xcc   : > { %7115 = vsyncadd (%p7391_p2), %s366_s20, 4294934528  ;;  %v7147_v0 = vmov 0.0   ;;  %vm7148_vm0 = vmmov 0   ;;  %v6334_v1 = vld [vmem:[#allocation2] sm:$0xff]   ;;  %v6335_v2 = vld [vmem:[#allocation2 + $0x8] sm:$0xff]   ;;  %v7149_v27 = vmov 0  }
  0xcd   : > { %6159 = vmatprep.subr.bf16.mxu0 %v7147_v0  ;;  %6175 = vmatprep.mubr.msk.bf16.mxu0 %vm7148_vm0, %v7147_v0  ;;  %v6336_v3 = vld [vmem:[#allocation2 + $0x10] sm:$0xff]   ;;  %v6342_v4 = vld [vmem:[#allocation4 + $0x4] ss:$8 sps:$4 sm:$0xff]   ;;  %v6344_v5 = vld [vmem:[#allocation4] ss:$8 sps:$4 sm:$0xff]   ;;  %s5890_s30 = sshll.u32 %s7216_s11, 9 }
  0xce   : > { %6160 = vmatpush3.bf16.msra.mxu0 %v6334_v1  ;;  %v6337_v6 = vld [vmem:[#allocation2 + $0x18] sm:$0xff]   ;;  %632 = vmatprep.subr.bf16.mxu1 %v6342_v4  ;;  %v6348_v9 = vld [vmem:[#allocation4 + $0x24] ss:$8 sps:$4 sm:$0xff]   ;;  %v6350_v12 = vld [vmem:[#allocation4 + $0x20] ss:$8 sps:$4 sm:$0xff]   ;;  %s3501_s23 = sshra.s32 %s5890_s30, 7 }
  0xcf   : > { %6161 = vmatprep.subr.bf16.mxu0 %v7147_v0  ;;  %v6345_v7 = vld [vmem:[#allocation4 + $0x14] ss:$8 sps:$4 sm:$0xff]   ;;  %633 = vmatpush1.bf16.msra.mxu1 %v6344_v5  ;;  %v6347_v8 = vld [vmem:[#allocation4 + $0x10] ss:$8 sps:$4 sm:$0xff]   ;;  %v6338_v10 = vld [vmem:[#allocation2 + $0x20] sm:$0xff]   ;;  %s3503_s22 = scalar_lea.vmem [#allocation10], %s3501_s23 }
  0xd0   : > { %634 = vmatprep.subr.bf16.mxu1 %v6345_v7  ;;  %v6339_v11 = vld [vmem:[#allocation2 + $0x28] sm:$0xff]   ;;  %v6351_v13 = vld [vmem:[#allocation4 + $0x34] ss:$8 sps:$4 sm:$0xff]   ;;  %v6353_v14 = vld [vmem:[#allocation4 + $0x30] ss:$8 sps:$4 sm:$0xff]   ;;  %664 = vmatprep.mubr.bf16.mxu1 %v7149_v27  ;;  %s5544_s10 = sshll.u32 %s7216_s11, 2 }
  0xd1   : > { %v6354_v15 = vld [vmem:[#allocation4 + $0x44] ss:$8 sps:$4 sm:$0xff]   ;;  %v6340_v16 = vld [vmem:[#allocation2 + $0x30] sm:$0xff]   ;;  %v6356_v17 = vld [vmem:[#allocation4 + $0x40] ss:$8 sps:$4 sm:$0xff]   ;;  %p7897_p2 = scmp.lt.s32.totalorder %s5544_s10, 7 }
  0xd2   : > { %6162 = vmatpush3.bf16.msra.mxu0 %v6335_v2  ;;  %v6357_v18 = vld [vmem:[#allocation4 + $0x54] ss:$8 sps:$4 sm:$0xff]   ;;  %v409_v20 = vld [vmem:[%s7919_s0] sm:$0xff]  ;;  %v6359_v21 = vld [vmem:[#allocation4 + $0x50] ss:$8 sps:$4 sm:$0xff]  }
  0xd3   : > { %6163 = vmatprep.subr.bf16.mxu0 %v7147_v0  ;;  %635 = vmatpush1.bf16.msra.mxu1 %v6347_v8  ;;  %v6341_v19 = vld [vmem:[#allocation2 + $0x38] sm:$0xff]   ;;  %v410_v22 = vpack.c.bf16 %v409_v20, %v409_v20  ;;  %v6360_v23 = vld [vmem:[#allocation4 + $0x64] ss:$8 sps:$4 sm:$0xff]   ;;  %v6362_v24 = vld [vmem:[#allocation4 + $0x60] ss:$8 sps:$4 sm:$0xff]   ;;  %s7951_s10 = smov (!%p7897_p2, %s5544_s10), 7 }
  0xd4   : > { %636 = vmatprep.subr.bf16.mxu1 %v6348_v9  ;;  %v6363_v25 = vld [vmem:[#allocation4 + $0x74] ss:$8 sps:$4 sm:$0xff]   ;;  %v6365_v26 = vld [vmem:[#allocation4 + $0x70] ss:$8 sps:$4 sm:$0xff]   ;;  %v411_v33 = vld [vmem:[#allocation9] ss:$0 sm:$0xff] }
  0xd5   : > { %v6366_v28 = vld [vmem:[#allocation6] ss:$16 sps:$4 sm:$0xff]   ;;  %v6368_v29 = vld [vmem:[#allocation6 + $0x4] ss:$16 sps:$4 sm:$0xff]   ;;  %v6371_v30 = vld [vmem:[#allocation6 + $0xc] ss:$16 sps:$4 sm:$0xff]  }
  0xd6   : > { %6164 = vmatpush3.bf16.msra.mxu0 %v6336_v3  ;;  %v6374_v31 = vld [vmem:[#allocation6 + $0x24] ss:$16 sps:$4 sm:$0xff]   ;;  %v6372_v32 = vld [vmem:[#allocation6 + $0x20] ss:$16 sps:$4 sm:$0xff]   ;;  %v6369_v41 = vld [vmem:[#allocation6 + $0x8] ss:$16 sps:$4 sm:$0xff]  }
  0xd7   : > { %6165 = vmatprep.subr.bf16.mxu0 %v7147_v0  ;;  %637 = vmatpush1.bf16.msra.mxu1 %v6350_v12  ;;  %v6377_v43 = vld [vmem:[#allocation6 + $0x2c] ss:$16 sps:$4 sm:$0xff]   ;;  %v6375_v44 = vld [vmem:[#allocation6 + $0x28] ss:$16 sps:$4 sm:$0xff]   ;;  %v6380_v45 = vld [vmem:[#allocation6 + $0x44] ss:$16 sps:$4 sm:$0xff]  }
  0xd8   : > { %638 = vmatprep.subr.bf16.mxu1 %v6351_v13  ;;  %v6383_v46 = vld [vmem:[#allocation6 + $0x4c] ss:$16 sps:$4 sm:$0xff]   ;;  %v6378_v47 = vld [vmem:[#allocation6 + $0x40] ss:$16 sps:$4 sm:$0xff]   ;;  %v6381_v48 = vld [vmem:[#allocation6 + $0x48] ss:$16 sps:$4 sm:$0xff]  }
  0xd9   : > { %v6386_v49 = vld [vmem:[#allocation6 + $0x64] ss:$16 sps:$4 sm:$0xff]   ;;  %v6389_v50 = vld [vmem:[#allocation6 + $0x6c] ss:$16 sps:$4 sm:$0xff]   ;;  %v6384_v51 = vld [vmem:[#allocation6 + $0x60] ss:$16 sps:$4 sm:$0xff]  }
  0xda   : > { %6166 = vmatpush3.bf16.msra.mxu0 %v6337_v6  ;;  %v6387_v52 = vld [vmem:[#allocation6 + $0x68] ss:$16 sps:$4 sm:$0xff]   ;;  %v6392_v53 = vld [vmem:[#allocation6 + $0x84] ss:$16 sps:$4 sm:$0xff]   ;;  %v6395_v54 = vld [vmem:[#allocation6 + $0x8c] ss:$16 sps:$4 sm:$0xff]  }
  0xdb   : > { %6167 = vmatprep.subr.bf16.mxu0 %v7147_v0  ;;  %639 = vmatpush1.bf16.msra.mxu1 %v6353_v14  ;;  %v6390_v55 = vld [vmem:[#allocation6 + $0x80] ss:$16 sps:$4 sm:$0xff]   ;;  %v6393_v56 = vld [vmem:[#allocation6 + $0x88] ss:$16 sps:$4 sm:$0xff]   ;;  %v6398_v57 = vld [vmem:[#allocation6 + $0xa4] ss:$16 sps:$4 sm:$0xff]  }
  0xdc   : > { %640 = vmatprep.subr.bf16.mxu1 %v6354_v15  ;;  %v6401_v58 = vld [vmem:[#allocation6 + $0xac] ss:$16 sps:$4 sm:$0xff]   ;;  %v6396_v59 = vld [vmem:[#allocation6 + $0xa0] ss:$16 sps:$4 sm:$0xff]   ;;  %v6399_v60 = vld [vmem:[#allocation6 + $0xa8] ss:$16 sps:$4 sm:$0xff]  }
  0xdd   : > { %v6404_v61 = vld [vmem:[#allocation6 + $0xc4] ss:$16 sps:$4 sm:$0xff]   ;;  %v6407_v62 = vld [vmem:[#allocation6 + $0xcc] ss:$16 sps:$4 sm:$0xff]   ;;  %v6402_v63 = vld [vmem:[#allocation6 + $0xc0] ss:$16 sps:$4 sm:$0xff]  }
  0xde   : > { %6168 = vmatpush3.bf16.msra.mxu0 %v6338_v10  ;;  %v6410_v1 = vld [vmem:[#allocation6 + $0xe4] ss:$16 sps:$4 sm:$0xff]   ;;  %v6413_v2 = vld [vmem:[#allocation6 + $0xec] ss:$16 sps:$4 sm:$0xff]   ;;  %v6408_v3 = vld [vmem:[#allocation6 + $0xe0] ss:$16 sps:$4 sm:$0xff]  }
  0xdf   : > { %6169 = vmatprep.subr.bf16.mxu0 %v7147_v0  ;;  %641 = vmatpush1.bf16.msra.mxu1 %v6356_v17  ;;  %v6411_v4 = vld [vmem:[#allocation6 + $0xe8] ss:$16 sps:$4 sm:$0xff]   ;;  %v6416_v5 = vld [vmem:[#allocation6 + $0x104] ss:$16 sps:$4 sm:$0xff]   ;;  %v6419_v6 = vld [vmem:[#allocation6 + $0x10c] ss:$16 sps:$4 sm:$0xff]  }
  0xe0   : > { %642 = vmatprep.subr.bf16.mxu1 %v6357_v18  ;;  %v6414_v7 = vld [vmem:[#allocation6 + $0x100] ss:$16 sps:$4 sm:$0xff]   ;;  %v6417_v8 = vld [vmem:[#allocation6 + $0x108] ss:$16 sps:$4 sm:$0xff]   ;;  %v6422_v9 = vld [vmem:[#allocation6 + $0x124] ss:$16 sps:$4 sm:$0xff]  }
  0xe1   : > { %v6425_v10 = vld [vmem:[#allocation6 + $0x12c] ss:$16 sps:$4 sm:$0xff]   ;;  %v6423_v12 = vld [vmem:[#allocation6 + $0x128] ss:$16 sps:$4 sm:$0xff]   ;;  %v6428_v13 = vld [vmem:[#allocation6 + $0x144] ss:$16 sps:$4 sm:$0xff]  }
  0xe2   : > { %6170 = vmatpush3.bf16.msra.mxu0 %v6339_v11  ;;  %v6420_v11 = vld [vmem:[#allocation6 + $0x120] ss:$16 sps:$4 sm:$0xff]   ;;  %v6431_v14 = vld [vmem:[#allocation6 + $0x14c] ss:$16 sps:$4 sm:$0xff]   ;;  %v6434_v17 = vld [vmem:[#allocation6 + $0x164] ss:$16 sps:$4 sm:$0xff]  }
  0xe3   : > { %6171 = vmatprep.subr.bf16.mxu0 %v7147_v0  ;;  %643 = vmatpush1.bf16.msra.mxu1 %v6359_v21  ;;  %v6426_v15 = vld [vmem:[#allocation6 + $0x140] ss:$16 sps:$4 sm:$0xff]   ;;  %v6437_v18 = vld [vmem:[#allocation6 + $0x16c] ss:$16 sps:$4 sm:$0xff]   ;;  %v6435_v20 = vld [vmem:[#allocation6 + $0x168] ss:$16 sps:$4 sm:$0xff]  }
  0xe4   : > { %644 = vmatprep.subr.bf16.mxu1 %v6360_v23  ;;  %v6440_v21 = vld [vmem:[#allocation6 + $0x184] ss:$16 sps:$4 sm:$0xff]   ;;  %v6438_v23 = vld [vmem:[#allocation6 + $0x180] ss:$16 sps:$4 sm:$0xff]   ;;  %s5545_s11 = sshll.u32 %s7951_s10, 3 }
  0xe5   : > { %v6444_v27 = vld [vmem:[#allocation6 + $0x1a0] ss:$16 sps:$4 sm:$0xff]   ;;  %s406_s19 = scalar_lea.vmem %s7927_s8, %s5545_s11 }
  0xe6   : > { %6172 = vmatpush3.bf16.msra.mxu0 %v6340_v16  ;;  %v6429_v16 = vld [vmem:[#allocation6 + $0x148] ss:$16 sps:$4 sm:$0xff]  }
  0xe7   : > { %6173 = vmatprep.subr.bf16.mxu0 %v7147_v0  ;;  %645 = vmatpush1.bf16.msra.mxu1 %v6362_v24  ;;  %v6405_v0 = vld [vmem:[#allocation6 + $0xc8] ss:$16 sps:$4 sm:$0xff]  }
  0xe8   : > { %646 = vmatprep.subr.bf16.mxu1 %v6363_v25  ;;  %v6441_v24 = vld [vmem:[#allocation6 + $0x188] ss:$16 sps:$4 sm:$0xff]   ;;  %v6446_v25 = vld [vmem:[#allocation6 + $0x1a4] ss:$16 sps:$4 sm:$0xff]  }
  0xea   : > { %6174 = vmatpush3.bf16.msra.mxu0 %v6341_v19  ;;  %v6432_v19 = vld [vmem:[#allocation6 + $0x160] ss:$16 sps:$4 sm:$0xff]  }
  0xeb   : > { %647 = vmatpush1.bf16.msra.mxu1 %v6365_v26  ;;  %1130 = vmatprep.subr.bf16.mxu0 %v6368_v29  ;;  %v6449_v26 = vld [vmem:[#allocation6 + $0x1ac] ss:$16 sps:$4 sm:$0xff]   ;;  %v6452_v29 = vld [vmem:[#allocation6 + $0x1c4] ss:$16 sps:$4 sm:$0xff]  }
  0xec   : > { %1171 = vmatprep.subr.bf16.mxu1 %v6371_v30  ;;  %v6455_v30 = vld [vmem:[#allocation6 + $0x1cc] ss:$16 sps:$4 sm:$0xff]  }
  0xed   : > { %6176 = vmatmul.mubr.bf16.vlgmr.msra.gmra.mrb[0].mxu0 %v410_v22  ;;  %v6443_v22 = vld [vmem:[#allocation6 + $0x18c] ss:$16 sps:$4 sm:$0xff]  }
  0xee   : > { %1131 = vmatpush1.bf16.msra.mxu0 %v6366_v28  ;;  %v6447_v28 = vld [vmem:[#allocation6 + $0x1a8] ss:$16 sps:$4 sm:$0xff]  }
  0xef   : > { %1132 = vmatprep.subr.bf16.mxu0 %v6374_v31  ;;  %v6450_v31 = vld [vmem:[#allocation6 + $0x1c0] ss:$16 sps:$4 sm:$0xff]  }
  0xf2   : > { %1133 = vmatpush1.bf16.msra.mxu0 %v6372_v32  ;;  %v6453_v32 = vld [vmem:[#allocation6 + $0x1c8] ss:$16 sps:$4 sm:$0xff]  }
  0xf3   : > { %1134 = vmatprep.subr.bf16.mxu0 %v6380_v45 }
  0xf6   : > { %1135 = vmatpush1.bf16.msra.mxu0 %v6378_v47 }
  0xf7   : > { %1136 = vmatprep.subr.bf16.mxu0 %v6386_v49 }
  0xfa   : > { %1137 = vmatpush1.bf16.msra.mxu0 %v6384_v51 }
  0xfb   : > { %1138 = vmatprep.subr.bf16.mxu0 %v6392_v53 }
  0xfe   : > { %1139 = vmatpush1.bf16.msra.mxu0 %v6390_v55 }
  0xff   : > { %1140 = vmatprep.subr.bf16.mxu0 %v6398_v57 }
 0x102   : > { %1141 = vmatpush1.bf16.msra.mxu0 %v6396_v59 }
 0x103   : > { %1142 = vmatprep.subr.bf16.mxu0 %v6404_v61 }
 0x106   : > { %1143 = vmatpush1.bf16.msra.mxu0 %v6402_v63 }
 0x107   : > { %1144 = vmatprep.subr.bf16.mxu0 %v6410_v1 }
 0x10a   : > { %1145 = vmatpush1.bf16.msra.mxu0 %v6408_v3 }
 0x10b   : > { %1146 = vmatprep.subr.bf16.mxu0 %v6416_v5 }
 0x10e   : > { %1147 = vmatpush1.bf16.msra.mxu0 %v6414_v7 }
 0x10f   : > { %1148 = vmatprep.subr.bf16.mxu0 %v6422_v9 }
 0x112   : > { %1149 = vmatpush1.bf16.msra.mxu0 %v6420_v11 }
 0x113   : > { %1150 = vmatprep.subr.bf16.mxu0 %v6428_v13 }
 0x116   : > { %1151 = vmatpush1.bf16.msra.mxu0 %v6426_v15 }
 0x117   : > { %1152 = vmatprep.subr.bf16.mxu0 %v6434_v17 }
 0x11a   : > { %1153 = vmatpush1.bf16.msra.mxu0 %v6432_v19 }
 0x11b   : > { %1154 = vmatprep.subr.bf16.mxu0 %v6440_v21 }
 0x11e   : > { %1155 = vmatpush1.bf16.msra.mxu0 %v6438_v23 }
 0x11f   : > { %1156 = vmatprep.subr.bf16.mxu0 %v6446_v25 }
 0x122   : > { %1157 = vmatpush1.bf16.msra.mxu0 %v6444_v27 }
 0x123   : > { %1158 = vmatprep.subr.bf16.mxu0 %v6452_v29 }
 0x126   : > { %1159 = vmatpush1.bf16.msra.mxu0 %v6450_v31 }
 0x1c0   : > { %v526_v34 = vpop.f32.mrb[0].mxu0 }
 0x1c1   : > { %v527_v35 = vadd.f32 %v526_v34, %v411_v33  ;;  %v6177_v36 = vpop.f32.mrb[1].mxu0  ;;  %v6458_v33 = vld [vmem:[#allocation6 + $0x1e4] ss:$16 sps:$4 sm:$0xff]   ;;  %v6461_v34 = vld [vmem:[#allocation6 + $0x1ec] ss:$16 sps:$4 sm:$0xff]  }
 0x1c2   : > { %v529_v37 = vpop.f32.mrb[2].mxu0  ;;  %v6459_v36 = vld [vmem:[#allocation6 + $0x1e8] ss:$16 sps:$4 sm:$0xff]   ;;  %1160 = vmatprep.subr.bf16.mxu0 %v6458_v33 }
 0x1c3   : > { %vm532_vm1 = vcmp.gt.f32.partialorder %v527_v35, 0.0  ;;  %v533_v38 = vmul.f32 0.2, %v527_v35  ;;  %v6178_v39 = vpop.f32.mrb[3].mxu0  ;;  %v7469_v37 = vld [vmem:[#allocation7] sm:$0xff] }
 0x1c4   : > { %v7473_v39 = vld [vmem:[#allocation7 + $0x8] sm:$0xff] }
 0x1c5   : > { %v534_v40 = vsel %vm532_vm1, %v527_v35, %v533_v38  ;;  %v6456_v35 = vld [vmem:[#allocation6 + $0x1e0] ss:$16 sps:$4 sm:$0xff]  }
 0x1c6   : > { %v535_v42 = vpack.c.bf16 %v534_v40, %v534_v40  ;;  %1161 = vmatpush1.bf16.msra.mxu0 %v6456_v35  ;;  %v7471_v38 = vld [vmem:[#allocation7 + $0x20] sm:$0xff] }
 0x1c7   : > { %v5634_v40 = vcombine.low %v7469_v37, %v7471_v38 }
 0x1c8   : > { %665 = vmatmul.mubr.bf16.vlgmr.msra.gmra.mrb[0].mxu1 %v535_v42  ;;  %v7479_v42 = vld [vmem:[#allocation7 + $0x28] sm:$0xff] }
 0x1c9   : > { %1172 = vmatpush1.bf16.msra.mxu1 %v6369_v41  ;;  %v5635_v41 = vcombine.high %v7469_v37, %v7471_v38  ;;  %v1378_v37 = vld [vmem:[#allocation7 + $0xc0] sm:$0xff] }
 0x1ca   : > { %1173 = vmatprep.subr.bf16.mxu1 %v6377_v43  ;;  %v5636_v43 = vcombine.low %v7473_v39, %v7479_v42  ;;  %v1382_v38 = vld [vmem:[#allocation7 + $0xe0] sm:$0xff] }
 0x1cb   : > { %2890 = vmatprep.subr.bf16.mxu0 %v5635_v41 }
 0x1cd   : > { %1174 = vmatpush1.bf16.msra.mxu1 %v6375_v44  ;;  %v5637_v44 = vcombine.high %v7473_v39, %v7479_v42  ;;  %v1379_v39 = vld [vmem:[#allocation7 + $0xc8] sm:$0xff] }
 0x1ce   : > { %1175 = vmatprep.subr.bf16.mxu1 %v6383_v46  ;;  %v1383_v42 = vld [vmem:[#allocation7 + $0xe8] sm:$0xff] }
 0x1d1   : > { %1176 = vmatpush1.bf16.msra.mxu1 %v6381_v48 }
 0x1d2   : > { %1177 = vmatprep.subr.bf16.mxu1 %v6389_v50 }
 0x1d5   : > { %1178 = vmatpush1.bf16.msra.mxu1 %v6387_v52 }
 0x1d6   : > { %1179 = vmatprep.subr.bf16.mxu1 %v6395_v54 }
 0x1d9   : > { %1180 = vmatpush1.bf16.msra.mxu1 %v6393_v56 }
 0x1da   : > { %1181 = vmatprep.subr.bf16.mxu1 %v6401_v58 }
 0x1dd   : > { %1182 = vmatpush1.bf16.msra.mxu1 %v6399_v60 }
 0x1de   : > { %1183 = vmatprep.subr.bf16.mxu1 %v6407_v62 }
 0x1e1   : > { %1184 = vmatpush1.bf16.msra.mxu1 %v6405_v0 }
 0x1e2   : > { %1185 = vmatprep.subr.bf16.mxu1 %v6413_v2 }
 0x1e5   : > { %1186 = vmatpush1.bf16.msra.mxu1 %v6411_v4 }
 0x1e6   : > { %1187 = vmatprep.subr.bf16.mxu1 %v6419_v6 }
 0x1e9   : > { %1188 = vmatpush1.bf16.msra.mxu1 %v6417_v8 }
 0x1ea   : > { %1189 = vmatprep.subr.bf16.mxu1 %v6425_v10 }
 0x1ed   : > { %1190 = vmatpush1.bf16.msra.mxu1 %v6423_v12 }
 0x1ee   : > { %1191 = vmatprep.subr.bf16.mxu1 %v6431_v14 }
 0x1f1   : > { %1192 = vmatpush1.bf16.msra.mxu1 %v6429_v16  ;;  %v713_v16 = vlaneseq }
 0x1f2   : > { %1193 = vmatprep.subr.bf16.mxu1 %v6437_v18 }
 0x1f5   : > { %1194 = vmatpush1.bf16.msra.mxu1 %v6435_v20  ;;  %v7485_v20 = vshrl.u32 %v713_v16, 7 }
 0x1f6   : > { %1195 = vmatprep.subr.bf16.mxu1 %v6443_v22  ;;  %v413_v22 = vld [vmem:[#allocation9 + $0x1] ss:$8 sm:$0x3] }
 0x1f7   : > { %v7488_v21 = vsub.s32 0, %v7485_v20  ;;  %v7491_v23 = vsub.s32 1, %v7485_v20 }
 0x1f9   : > { %1196 = vmatpush1.bf16.msra.mxu1 %v6441_v24  ;;  %v415_v24 = vld [vmem:[#allocation9 + $0x2] ss:$8 sm:$0x3]  ;;  %v716_v25 = vrot.slane %v413_v22, %v7488_v21  ;;  %v720_v27 = vrot.slane %v413_v22, %v7491_v23 }
 0x1fa   : > { %1197 = vmatprep.subr.bf16.mxu1 %v6449_v26  ;;  %v1406_v22 = vld [vmem:[#allocation7 + $0x1a0] sm:$0xff] }
 0x1fd   : > { %1198 = vmatpush1.bf16.msra.mxu1 %v6447_v28 }
 0x1fe   : > { %1199 = vmatprep.subr.bf16.mxu1 %v6455_v30  ;;  %v729_v30 = vrot.slane %v415_v24, %v7488_v21 }
 0x201   : > { %1200 = vmatpush1.bf16.msra.mxu1 %v6453_v32  ;;  %v733_v32 = vrot.slane %v415_v24, %v7491_v23  ;;  %v1403_v24 = vld [vmem:[#allocation7 + $0x188] sm:$0xff] }
 0x202   : > { %1201 = vmatprep.subr.bf16.mxu1 %v6461_v34 }
 0x205   : > { %1202 = vmatpush1.bf16.msra.mxu1 %v6459_v36 }
 0x206   : > { %2972 = vmatprep.subr.bf16.mxu1 %v5637_v44 }
 0x29b   : > { %v666_v45 = vpop.f32.mrb[0].mxu1 }
 0x29c   : > { %v673_v46 = vrot.slane %v666_v45, 4  ;;  %v668_v47 = vpop.f32.mrb[1].mxu1 }
 0x29d   : > { %v679_v48 = vrot.slane %v668_v47, 4  ;;  %v670_v49 = vpop.f32.mrb[2].mxu1 }
 0x29e   : > { %v674_v50 = vadd.f32 %v673_v46, %v666_v45  ;;  %v671_v51 = vpop.f32.mrb[3].mxu1  ;;  %v1367_v49 = vld [vmem:[#allocation7 + $0x68] sm:$0xff] }
 0x29f   : > { %v680_v52 = vadd.f32 %v679_v48, %v668_v47  ;;  %v1363_v48 = vld [vmem:[#allocation7 + $0x48] sm:$0xff] }
 0x2a0   : > { %v675_v53 = vrot.slane %v674_v50, 2 }
 0x2a1   : > { %v681_v54 = vrot.slane %v680_v52, 2 }
 0x2a2   : > { %v676_v55 = vadd.f32 %v675_v53, %v674_v50 }
 0x2a3   : > { %v682_v56 = vadd.f32 %v681_v54, %v680_v52  ;;  %v5645_v54 = vcombine.high %v1363_v48, %v1367_v49 }
 0x2a4   : > { %v677_v57 = vrot.slane %v676_v55, 1 }
 0x2a5   : > { %v683_v58 = vrot.slane %v682_v56, 1 }
 0x2a6   : > { %v678_v59 = vadd.f32 %v677_v57, %v676_v55  ;;  %v1370_v57 = vld [vmem:[#allocation7 + $0x80] sm:$0xff] }
 0x2a7   : > { %v684_v60 = vadd.f32 %v683_v58, %v682_v56  ;;  %v5644_v56 = vcombine.low %v1363_v48, %v1367_v49  ;;  %v1374_v58 = vld [vmem:[#allocation7 + $0xa0] sm:$0xff]  ;;  %v1423_v48 = vld [vmem:[#allocation7 + $0x228] sm:$0xff] }
 0x2a8   : > { %v686_v61 = vmul.f32 0.125, %v678_v59  ;;  %v1371_v59 = vld [vmem:[#allocation7 + $0x88] sm:$0xff] }
 0x2a9   : > { %v687_v62 = vmul.f32 0.125, %v684_v60  ;;  %v5651_v60 = vcombine.high %v1370_v57, %v1374_v58 }
 0x2aa   : > { %v688_v63 = vsub.f32 %v666_v45, %v686_v61  ;;  %v1362_v45 = vld [vmem:[#allocation7 + $0x40] sm:$0xff]  ;;  %v1375_v61 = vld [vmem:[#allocation7 + $0xa8] sm:$0xff] }
 0x2ab   : > { %v689_v0 = vsub.f32 %v668_v47, %v687_v62  ;;  %v1366_v47 = vld [vmem:[#allocation7 + $0x60] sm:$0xff]  ;;  %v5650_v62 = vcombine.low %v1370_v57, %v1374_v58 }
 0x2ac   : > { %v690_v1 = vmul.f32 %v688_v63, %v688_v63  ;;  %v5643_v53 = vcombine.high %v1362_v45, %v1366_v47  ;;  %v5642_v55 = vcombine.low %v1362_v45, %v1366_v47  ;;  %v1422_v45 = vld [vmem:[#allocation7 + $0x220] sm:$0xff] }
 0x2ad   : > { %v691_v2 = vmul.f32 %v689_v0, %v689_v0 }
 0x2ae   : > { %v692_v3 = vrot.slane %v690_v1, 4 }
 0x2af   : > { %v698_v4 = vrot.slane %v691_v2, 4 }
 0x2b0   : > { %v693_v5 = vadd.f32 %v692_v3, %v690_v1  ;;  %v5660_v1 = vcombine.low %v1379_v39, %v1383_v42  ;;  %v1386_v3 = vld [vmem:[#allocation7 + $0x100] sm:$0xff] }
 0x2b1   : > { %v699_v6 = vadd.f32 %v698_v4, %v691_v2  ;;  %v5661_v2 = vcombine.high %v1379_v39, %v1383_v42  ;;  %v1390_v4 = vld [vmem:[#allocation7 + $0x120] sm:$0xff] }
 0x2b2   : > { %v694_v7 = vrot.slane %v693_v5, 2  ;;  %v1446_v42 = vld [vmem:[#allocation7 + $0x2e0] sm:$0xff] }
 0x2b3   : > { %v700_v8 = vrot.slane %v699_v6, 2 }
 0x2b4   : > { %v695_v9 = vadd.f32 %v694_v7, %v693_v5  ;;  %v1387_v5 = vld [vmem:[#allocation7 + $0x108] sm:$0xff] }
 0x2b5   : > { %v701_v10 = vadd.f32 %v700_v8, %v699_v6  ;;  %v5667_v6 = vcombine.high %v1386_v3, %v1390_v4  ;;  %v1391_v7 = vld [vmem:[#allocation7 + $0x128] sm:$0xff]  ;;  %v5666_v8 = vcombine.low %v1386_v3, %v1390_v4 }
 0x2b6   : > { %v696_v11 = vrot.slane %v695_v9, 1 }
 0x2b7   : > { %v702_v12 = vrot.slane %v701_v10, 1 }
 0x2b8   : > { %v697_v13 = vadd.f32 %v696_v11, %v695_v9  ;;  %v5668_v9 = vcombine.low %v1387_v5, %v1391_v7  ;;  %v1394_v11 = vld [vmem:[#allocation7 + $0x140] sm:$0xff] }
 0x2b9   : > { %v703_v14 = vadd.f32 %v702_v12, %v701_v10  ;;  %v5669_v10 = vcombine.high %v1387_v5, %v1391_v7  ;;  %v1398_v12 = vld [vmem:[#allocation7 + $0x160] sm:$0xff] }
 0x2ba   : > { %v704_v15 = vmul.f32 0.125, %v697_v13  ;;  %v1395_v13 = vld [vmem:[#allocation7 + $0x148] sm:$0xff]  ;;  %v5674_v16 = vcombine.low %v1394_v11, %v1398_v12  ;;  %v1454_v7 = vld [vmem:[#allocation7 + $0x320] sm:$0xff] }
 0x2bb   : > { %v705_v17 = vmul.f32 0.125, %v703_v14  ;;  %v5675_v14 = vcombine.high %v1394_v11, %v1398_v12 }
 0x2bc   : > { %v706_v18 = vadd.f32 0.8, %v704_v15  ;;  %v1399_v15 = vld [vmem:[#allocation7 + $0x168] sm:$0xff] }
 0x2bd   : > { %v707_v19 = vadd.f32 0.8, %v705_v17  ;;  %v5676_v17 = vcombine.low %v1395_v13, %v1399_v15 }
 0x2be   : > { %6846 = vrsqrt.f32 %v706_v18  ;;  %v5677_v18 = vcombine.high %v1395_v13, %v1399_v15  ;;  %v1462_v15 = vld [vmem:[#allocation7 + $0x360] sm:$0xff] }
 0x2bf   : > { %6848 = vrsqrt.f32 %v707_v19  ;;  %v1402_v19 = vld [vmem:[#allocation7 + $0x180] sm:$0xff] }
 0x2c8   : > { %v6847_v26 = vpop.eup %6846 }
 0x2c9   : > { %v6849_v28 = vpop.eup %6848  ;;  %v710_v29 = vmul.f32 %v6847_v26, %v688_v63  ;;  %v5652_v63 = vcombine.low %v1371_v59, %v1375_v61  ;;  %v1407_v26 = vld [vmem:[#allocation7 + $0x1a8] sm:$0xff] }
 0x2ca   : > { %v711_v31 = vmul.f32 %v6849_v28, %v689_v0  ;;  %v5653_v0 = vcombine.high %v1371_v59, %v1375_v61  ;;  %v5684_v28 = vcombine.low %v1403_v24, %v1407_v26  ;;  %v1438_v61 = vld [vmem:[#allocation7 + $0x2a0] sm:$0xff] }
 0x2cb   : > { %v723_v33 = vmul.f32 %v716_v25, %v710_v29  ;;  %v5683_v25 = vcombine.high %v1402_v19, %v1406_v22  ;;  %v5685_v29 = vcombine.high %v1403_v24, %v1407_v26  ;;  %v1470_v26 = vld [vmem:[#allocation7 + $0x3a0] sm:$0xff] }
 0x2cc   : > { %v724_v34 = vmul.f32 %v720_v27, %v711_v31  ;;  %v5682_v27 = vcombine.low %v1402_v19, %v1406_v22  ;;  %v1414_v31 = vld [vmem:[#allocation7 + $0x1e0] sm:$0xff] }
 0x2cd   : > { %v736_v35 = vadd.f32 %v729_v30, %v723_v33  ;;  %v1410_v30 = vld [vmem:[#allocation7 + $0x1c0] sm:$0xff] }
 0x2ce   : > { %v737_v36 = vadd.f32 %v733_v32, %v724_v34  ;;  %v1411_v32 = vld [vmem:[#allocation7 + $0x1c8] sm:$0xff]  ;;  %v5691_v33 = vcombine.high %v1410_v30, %v1414_v31 }
 0x2cf   : > { %vm738_vm2 = vcmp.gt.f32.partialorder %v736_v35, 0.0  ;;  %v740_v41 = vmul.f32 0.2, %v736_v35  ;;  %v1415_v34 = vld [vmem:[#allocation7 + $0x1e8] sm:$0xff] }
 0x2d0   : > { %vm739_vm3 = vcmp.gt.f32.partialorder %v737_v36, 0.0  ;;  %v741_v44 = vmul.f32 0.2, %v737_v36 }
 0x2d1   : > { %v742_v46 = vsel %vm738_vm2, %v736_v35, %v740_v41  ;;  %v5690_v35 = vcombine.low %v1410_v30, %v1414_v31  ;;  %v5693_v41 = vcombine.high %v1411_v32, %v1415_v34 }
 0x2d2   : > { %v743_v50 = vsel %vm739_vm3, %v737_v36, %v741_v44  ;;  %v744_v52 = vpack.c.bf16 %v742_v46, %v742_v46  ;;  %v5692_v36 = vcombine.low %v1411_v32, %v1415_v34  ;;  %v1418_v44 = vld [vmem:[#allocation7 + $0x200] sm:$0xff]  ;;  %v1419_v46 = vld [vmem:[#allocation7 + $0x208] sm:$0xff] }
 0x2d3   : > { %v745_v51 = vpack.c.bf16 %v743_v50, %v743_v50  ;;  %v5699_v47 = vcombine.high %v1418_v44, %v1422_v45  ;;  %v5698_v49 = vcombine.low %v1418_v44, %v1422_v45  ;;  %v5700_v50 = vcombine.low %v1419_v46, %v1423_v48  ;;  %v1478_v34 = vld [vmem:[#allocation7 + $0x3e0] sm:$0xff]  ;;  %v1479_v44 = vld [vmem:[#allocation7 + $0x3e8] sm:$0xff] }
 0x2d5   : > { %1162 = vmatprep.mubr.bf16.mxu0 %v745_v51  ;;  %1203 = vmatprep.mubr.bf16.mxu1 %v745_v51  ;;  %v5701_v51 = vcombine.high %v1419_v46, %v1423_v48  ;;  %v7505_v48 = vld [vmem:[#allocation7 + $0x420] sm:$0xff] }
 0x2d6   : > { %1163 = vmatmul.mubr.bf16.vlgmr.msra.gmra.mrb[4].mxu0 %v744_v52  ;;  %1204 = vmatmul.mubr.bf16.vlgmr.msra.gmra.mrb[4].mxu1 %v744_v52  ;;  %v1426_v52 = vld [vmem:[#allocation7 + $0x240] sm:$0xff] }
 0x2d7   : > { %2891 = vmatpush1.bf16.msra.mxu0 %v5634_v40  ;;  %2973 = vmatpush1.bf16.msra.mxu1 %v5636_v43  ;;  %v5659_v40 = vcombine.high %v1378_v37, %v1382_v38  ;;  %v5658_v43 = vcombine.low %v1378_v37, %v1382_v38 }
 0x2d8   : > { %2892 = vmatprep.subr.bf16.mxu0 %v5643_v53  ;;  %2974 = vmatprep.subr.bf16.mxu1 %v5645_v54  ;;  %v1430_v53 = vld [vmem:[#allocation7 + $0x260] sm:$0xff]  ;;  %v1427_v54 = vld [vmem:[#allocation7 + $0x248] sm:$0xff] }
 0x2d9   : > { %v5706_v57 = vcombine.low %v1426_v52, %v1430_v53 }
 0x2db   : > { %2893 = vmatpush1.bf16.msra.mxu0 %v5642_v55  ;;  %2975 = vmatpush1.bf16.msra.mxu1 %v5644_v56  ;;  %v5707_v55 = vcombine.high %v1426_v52, %v1430_v53  ;;  %v1431_v56 = vld [vmem:[#allocation7 + $0x268] sm:$0xff] }
 0x2dc   : > { %2894 = vmatprep.subr.bf16.mxu0 %v5651_v60  ;;  %2976 = vmatprep.subr.bf16.mxu1 %v5653_v0  ;;  %v5708_v58 = vcombine.low %v1427_v54, %v1431_v56  ;;  %v5709_v59 = vcombine.high %v1427_v54, %v1431_v56  ;;  %v1434_v60 = vld [vmem:[#allocation7 + $0x280] sm:$0xff]  ;;  %v1439_v0 = vld [vmem:[#allocation7 + $0x2a8] sm:$0xff] }
 0x2dd   : > { %v5714_v37 = vcombine.low %v1434_v60, %v1438_v61 }
 0x2df   : > { %2895 = vmatpush1.bf16.msra.mxu0 %v5650_v62  ;;  %2977 = vmatpush1.bf16.msra.mxu1 %v5652_v63  ;;  %v1435_v62 = vld [vmem:[#allocation7 + $0x288] sm:$0xff]  ;;  %v5715_v63 = vcombine.high %v1434_v60, %v1438_v61 }
 0x2e0   : > { %2896 = vmatprep.subr.bf16.mxu0 %v5659_v40  ;;  %2978 = vmatprep.subr.bf16.mxu1 %v5661_v2  ;;  %v5716_v38 = vcombine.low %v1435_v62, %v1439_v0  ;;  %v5717_v39 = vcombine.high %v1435_v62, %v1439_v0  ;;  %v1442_v40 = vld [vmem:[#allocation7 + $0x2c0] sm:$0xff]  ;;  %v1447_v2 = vld [vmem:[#allocation7 + $0x2e8] sm:$0xff] }
 0x2e1   : > { %v5722_v3 = vcombine.low %v1442_v40, %v1446_v42 }
 0x2e3   : > { %2897 = vmatpush1.bf16.msra.mxu0 %v5658_v43  ;;  %2979 = vmatpush1.bf16.msra.mxu1 %v5660_v1  ;;  %v1443_v43 = vld [vmem:[#allocation7 + $0x2c8] sm:$0xff]  ;;  %v5723_v1 = vcombine.high %v1442_v40, %v1446_v42 }
 0x2e4   : > { %2898 = vmatprep.subr.bf16.mxu0 %v5667_v6  ;;  %2980 = vmatprep.subr.bf16.mxu1 %v5669_v10  ;;  %v5724_v4 = vcombine.low %v1443_v43, %v1447_v2  ;;  %v5725_v5 = vcombine.high %v1443_v43, %v1447_v2  ;;  %v1450_v6 = vld [vmem:[#allocation7 + $0x300] sm:$0xff]  ;;  %v1455_v10 = vld [vmem:[#allocation7 + $0x328] sm:$0xff] }
 0x2e5   : > { %v5730_v11 = vcombine.low %v1450_v6, %v1454_v7 }
 0x2e7   : > { %2899 = vmatpush1.bf16.msra.mxu0 %v5666_v8  ;;  %2981 = vmatpush1.bf16.msra.mxu1 %v5668_v9  ;;  %v1451_v8 = vld [vmem:[#allocation7 + $0x308] sm:$0xff]  ;;  %v5731_v9 = vcombine.high %v1450_v6, %v1454_v7 }
 0x2e8   : > { %2900 = vmatprep.subr.bf16.mxu0 %v5675_v14  ;;  %2982 = vmatprep.subr.bf16.mxu1 %v5677_v18  ;;  %v5732_v12 = vcombine.low %v1451_v8, %v1455_v10  ;;  %v5733_v13 = vcombine.high %v1451_v8, %v1455_v10  ;;  %v1458_v14 = vld [vmem:[#allocation7 + $0x340] sm:$0xff]  ;;  %v1463_v18 = vld [vmem:[#allocation7 + $0x368] sm:$0xff] }
 0x2e9   : > { %v5738_v19 = vcombine.low %v1458_v14, %v1462_v15 }
 0x2eb   : > { %2901 = vmatpush1.bf16.msra.mxu0 %v5674_v16  ;;  %2983 = vmatpush1.bf16.msra.mxu1 %v5676_v17  ;;  %v1459_v16 = vld [vmem:[#allocation7 + $0x348] sm:$0xff]  ;;  %v5739_v17 = vcombine.high %v1458_v14, %v1462_v15 }
 0x2ec   : > { %2902 = vmatprep.subr.bf16.mxu0 %v5683_v25  ;;  %2984 = vmatprep.subr.bf16.mxu1 %v5685_v29  ;;  %v5740_v22 = vcombine.low %v1459_v16, %v1463_v18  ;;  %v5741_v24 = vcombine.high %v1459_v16, %v1463_v18  ;;  %v1466_v25 = vld [vmem:[#allocation7 + $0x380] sm:$0xff]  ;;  %v1471_v29 = vld [vmem:[#allocation7 + $0x3a8] sm:$0xff] }
 0x2ed   : > { %v5746_v30 = vcombine.low %v1466_v25, %v1470_v26 }
 0x2ef   : > { %2903 = vmatpush1.bf16.msra.mxu0 %v5682_v27  ;;  %2985 = vmatpush1.bf16.msra.mxu1 %v5684_v28  ;;  %v1467_v27 = vld [vmem:[#allocation7 + $0x388] sm:$0xff]  ;;  %v5747_v28 = vcombine.high %v1466_v25, %v1470_v26 }
 0x2f0   : > { %2904 = vmatprep.subr.bf16.mxu0 %v5691_v33  ;;  %2986 = vmatprep.subr.bf16.mxu1 %v5693_v41  ;;  %v5748_v31 = vcombine.low %v1467_v27, %v1471_v29  ;;  %v5749_v32 = vcombine.high %v1467_v27, %v1471_v29  ;;  %v1474_v33 = vld [vmem:[#allocation7 + $0x3c0] sm:$0xff] }
 0x2f1   : > { %v5755_v41 = vcombine.high %v1474_v33, %v1478_v34 }
 0x2f3   : > { %2905 = vmatpush1.bf16.msra.mxu0 %v5690_v35  ;;  %2987 = vmatpush1.bf16.msra.mxu1 %v5692_v36  ;;  %v1475_v35 = vld [vmem:[#allocation7 + $0x3c8] sm:$0xff]  ;;  %v5754_v36 = vcombine.low %v1474_v33, %v1478_v34 }
 0x2f4   : > { %2906 = vmatprep.subr.bf16.mxu0 %v5699_v47  ;;  %2988 = vmatprep.subr.bf16.mxu1 %v5701_v51  ;;  %v5756_v45 = vcombine.low %v1475_v35, %v1479_v44  ;;  %v5757_v46 = vcombine.high %v1475_v35, %v1479_v44  ;;  %v7503_v47 = vld [vmem:[#allocation7 + $0x400] sm:$0xff]  ;;  %v7511_v51 = vld [vmem:[#allocation7 + $0x428] sm:$0xff] }
 0x2f5   : > { %v5762_v52 = vcombine.low %v7503_v47, %v7505_v48 }
 0x2f7   : > { %2907 = vmatpush1.bf16.msra.mxu0 %v5698_v49  ;;  %2989 = vmatpush1.bf16.msra.mxu1 %v5700_v50  ;;  %v7507_v49 = vld [vmem:[#allocation7 + $0x408] sm:$0xff]  ;;  %v5763_v50 = vcombine.high %v7503_v47, %v7505_v48 }
 0x2f8   : > { %2908 = vmatprep.subr.bf16.mxu0 %v5707_v55  ;;  %2990 = vmatprep.subr.bf16.mxu1 %v5709_v59  ;;  %v5764_v53 = vcombine.low %v7507_v49, %v7511_v51  ;;  %v5765_v54 = vcombine.high %v7507_v49, %v7511_v51 }
 0x2fb   : > { %2909 = vmatpush1.bf16.msra.mxu0 %v5706_v57  ;;  %2991 = vmatpush1.bf16.msra.mxu1 %v5708_v58 }
 0x2fc   : > { %2910 = vmatprep.subr.bf16.mxu0 %v5715_v63  ;;  %2992 = vmatprep.subr.bf16.mxu1 %v5717_v39 }
 0x2ff   : > { %2911 = vmatpush1.bf16.msra.mxu0 %v5714_v37  ;;  %2993 = vmatpush1.bf16.msra.mxu1 %v5716_v38 }
 0x300   : > { %2912 = vmatprep.subr.bf16.mxu0 %v5723_v1  ;;  %2994 = vmatprep.subr.bf16.mxu1 %v5725_v5 }
 0x303   : > { %2913 = vmatpush1.bf16.msra.mxu0 %v5722_v3  ;;  %2995 = vmatpush1.bf16.msra.mxu1 %v5724_v4 }
 0x304   : > { %2914 = vmatprep.subr.bf16.mxu0 %v5731_v9  ;;  %2996 = vmatprep.subr.bf16.mxu1 %v5733_v13 }
 0x307   : > { %2915 = vmatpush1.bf16.msra.mxu0 %v5730_v11  ;;  %2997 = vmatpush1.bf16.msra.mxu1 %v5732_v12 }
 0x308   : > { %2916 = vmatprep.subr.bf16.mxu0 %v5739_v17  ;;  %2998 = vmatprep.subr.bf16.mxu1 %v5741_v24 }
 0x30b   : > { %2917 = vmatpush1.bf16.msra.mxu0 %v5738_v19  ;;  %2999 = vmatpush1.bf16.msra.mxu1 %v5740_v22 }
 0x30c   : > { %2918 = vmatprep.subr.bf16.mxu0 %v5747_v28  ;;  %3000 = vmatprep.subr.bf16.mxu1 %v5749_v32 }
 0x30f   : > { %2919 = vmatpush1.bf16.msra.mxu0 %v5746_v30  ;;  %3001 = vmatpush1.bf16.msra.mxu1 %v5748_v31 }
 0x310   : > { %2920 = vmatprep.subr.bf16.mxu0 %v5755_v41  ;;  %3002 = vmatprep.subr.bf16.mxu1 %v5757_v46 }
 0x313   : > { %2921 = vmatpush1.bf16.msra.mxu0 %v5754_v36  ;;  %3003 = vmatpush1.bf16.msra.mxu1 %v5756_v45 }
 0x314   : > { %2931 = vmatprep.subr.bf16.mxu0 %v5763_v50  ;;  %3013 = vmatprep.subr.bf16.mxu1 %v5765_v54 }
 0x3a9   : > { %v1164_v55 = vpop.f32.mrb[4].mxu0  ;;  %v1205_v56 = vpop.f32.mrb[4].mxu1 }
 0x3aa   : > { %v1212_v57 = vrot.slane %v1164_v55, 4  ;;  %v1224_v58 = vrot.slane %v1205_v56, 4  ;;  %v1166_v59 = vpop.f32.mrb[5].mxu0  ;;  %v1207_v60 = vpop.f32.mrb[5].mxu1 }
 0x3ab   : > { %v1218_v61 = vrot.slane %v1166_v59, 4  ;;  %v1230_v62 = vrot.slane %v1207_v60, 4  ;;  %v1168_v63 = vpop.f32.mrb[6].mxu0  ;;  %v1209_v0 = vpop.f32.mrb[6].mxu1 }
 0x3ac   : > { %v1213_v37 = vadd.f32 %v1212_v57, %v1164_v55  ;;  %v1225_v38 = vadd.f32 %v1224_v58, %v1205_v56  ;;  %v1169_v39 = vpop.f32.mrb[7].mxu0  ;;  %v1210_v40 = vpop.f32.mrb[7].mxu1 }
 0x3ad   : > { %v1219_v42 = vadd.f32 %v1218_v61, %v1166_v59  ;;  %v1231_v43 = vadd.f32 %v1230_v62, %v1207_v60 }
 0x3ae   : > { %v1214_v1 = vrot.slane %v1213_v37, 2  ;;  %v1226_v2 = vrot.slane %v1225_v38, 2 }
 0x3af   : > { %v1220_v3 = vrot.slane %v1219_v42, 2  ;;  %v1232_v4 = vrot.slane %v1231_v43, 2 }
 0x3b0   : > { %v1215_v5 = vadd.f32 %v1214_v1, %v1213_v37  ;;  %v1227_v6 = vadd.f32 %v1226_v2, %v1225_v38 }
 0x3b1   : > { %v1221_v7 = vadd.f32 %v1220_v3, %v1219_v42  ;;  %v1233_v8 = vadd.f32 %v1232_v4, %v1231_v43 }
 0x3b2   : > { %v1216_v9 = vrot.slane %v1215_v5, 1  ;;  %v1228_v10 = vrot.slane %v1227_v6, 1 }
 0x3b3   : > { %v1222_v11 = vrot.slane %v1221_v7, 1  ;;  %v1234_v12 = vrot.slane %v1233_v8, 1 }
 0x3b4   : > { %v1217_v13 = vadd.f32 %v1216_v9, %v1215_v5  ;;  %v1229_v14 = vadd.f32 %v1228_v10, %v1227_v6  ;;  %v417_v6 = vld [vmem:[#allocation9 + $0x3] ss:$8 sm:$0xf]  ;;  %v7523_v9 = vsub.s32 3, %v7485_v20 }
 0x3b5   : > { %v1223_v15 = vadd.f32 %v1222_v11, %v1221_v7  ;;  %v1235_v16 = vadd.f32 %v1234_v12, %v1233_v8  ;;  %v7520_v7 = vsub.s32 2, %v7485_v20  ;;  %v419_v8 = vld [vmem:[#allocation9 + $0x4] ss:$8 sm:$0xf]  ;;  %v1292_v10 = vrot.slane %v417_v6, %v7488_v21 }
 0x3b6   : > { %v1236_v17 = vmul.f32 0.125, %v1217_v13  ;;  %v1238_v18 = vmul.f32 0.125, %v1229_v14 }
 0x3b7   : > { %v1237_v19 = vmul.f32 0.125, %v1223_v15  ;;  %v1239_v22 = vmul.f32 0.125, %v1235_v16  ;;  %v1300_v12 = vrot.slane %v417_v6, %v7520_v7  ;;  %v1317_v15 = vrot.slane %v419_v8, %v7488_v21 }
 0x3b8   : > { %v1240_v24 = vsub.f32 %v1164_v55, %v1236_v17  ;;  %v1242_v25 = vsub.f32 %v1205_v56, %v1238_v18  ;;  %v1296_v16 = vrot.slane %v417_v6, %v7491_v23 }
 0x3b9   : > { %v1241_v26 = vsub.f32 %v1166_v59, %v1237_v19  ;;  %v1243_v27 = vsub.f32 %v1207_v60, %v1239_v22  ;;  %v1325_v19 = vrot.slane %v419_v8, %v7520_v7  ;;  %v1304_v22 = vrot.slane %v417_v6, %v7523_v9  ;;  %v1515_v6 = vld [vmem:[#allocation7 + $0x508] sm:$0xff] }
 0x3ba   : > { %v1244_v28 = vmul.f32 %v1240_v24, %v1240_v24  ;;  %v1246_v29 = vmul.f32 %v1242_v25, %v1242_v25 }
 0x3bb   : > { %v1245_v30 = vmul.f32 %v1241_v26, %v1241_v26  ;;  %v1247_v31 = vmul.f32 %v1243_v27, %v1243_v27 }
 0x3bc   : > { %v1248_v32 = vrot.slane %v1244_v28, 4  ;;  %v1260_v33 = vrot.slane %v1246_v29, 4 }
 0x3bd   : > { %v1254_v34 = vrot.slane %v1245_v30, 4  ;;  %v1266_v35 = vrot.slane %v1247_v31, 4 }
 0x3be   : > { %v1249_v36 = vadd.f32 %v1248_v32, %v1244_v28  ;;  %v1261_v41 = vadd.f32 %v1260_v33, %v1246_v29 }
 0x3bf   : > { %v1255_v44 = vadd.f32 %v1254_v34, %v1245_v30  ;;  %v1267_v45 = vadd.f32 %v1266_v35, %v1247_v31  ;;  %v1321_v31 = vrot.slane %v419_v8, %v7491_v23  ;;  %v1329_v34 = vrot.slane %v419_v8, %v7523_v9  ;;  %v1519_v8 = vld [vmem:[#allocation7 + $0x528] sm:$0xff] }
 0x3c0   : > { %v1250_v46 = vrot.slane %v1249_v36, 2  ;;  %v1262_v50 = vrot.slane %v1261_v41, 2 }
 0x3c1   : > { %v1256_v54 = vrot.slane %v1255_v44, 2  ;;  %v1268_v57 = vrot.slane %v1267_v45, 2 }
 0x3c2   : > { %v1251_v55 = vadd.f32 %v1250_v46, %v1249_v36  ;;  %v1263_v56 = vadd.f32 %v1262_v50, %v1261_v41 }
 0x3c3   : > { %v1257_v58 = vadd.f32 %v1256_v54, %v1255_v44  ;;  %v1269_v59 = vadd.f32 %v1268_v57, %v1267_v45  ;;  %v1490_v54 = vld [vmem:[#allocation7 + $0x440] sm:$0xff] }
 0x3c4   : > { %v1252_v60 = vrot.slane %v1251_v55, 1  ;;  %v1264_v61 = vrot.slane %v1263_v56, 1 }
 0x3c5   : > { %v1258_v62 = vrot.slane %v1257_v58, 1  ;;  %v1270_v63 = vrot.slane %v1269_v59, 1 }
 0x3c6   : > { %v1253_v0 = vadd.f32 %v1252_v60, %v1251_v55  ;;  %v1265_v37 = vadd.f32 %v1264_v61, %v1263_v56  ;;  %v1494_v55 = vld [vmem:[#allocation7 + $0x460] sm:$0xff]  ;;  %v1495_v56 = vld [vmem:[#allocation7 + $0x468] sm:$0xff] }
 0x3c7   : > { %v1259_v38 = vadd.f32 %v1258_v62, %v1257_v58  ;;  %v1271_v39 = vadd.f32 %v1270_v63, %v1269_v59  ;;  %v1498_v61 = vld [vmem:[#allocation7 + $0x480] sm:$0xff]  ;;  %v5771_v62 = vcombine.high %v1490_v54, %v1494_v55 }
 0x3c8   : > { %v1272_v40 = vmul.f32 0.125, %v1253_v0  ;;  %v1274_v42 = vmul.f32 0.125, %v1265_v37  ;;  %v1502_v0 = vld [vmem:[#allocation7 + $0x4a0] sm:$0xff]  ;;  %v1499_v37 = vld [vmem:[#allocation7 + $0x488] sm:$0xff] }
 0x3c9   : > { %v1273_v43 = vmul.f32 0.125, %v1259_v38  ;;  %v1275_v1 = vmul.f32 0.125, %v1271_v39  ;;  %v1503_v38 = vld [vmem:[#allocation7 + $0x4a8] sm:$0xff]  ;;  %v5778_v47 = vcombine.low %v1498_v61, %v1502_v0 }
 0x3ca   : > { %v1276_v2 = vadd.f32 0.8, %v1272_v40  ;;  %v1278_v3 = vadd.f32 0.8, %v1274_v42  ;;  %v5770_v40 = vcombine.low %v1490_v54, %v1494_v55  ;;  %v5780_v48 = vcombine.low %v1499_v37, %v1503_v38  ;;  %v1550_v55 = vld [vmem:[#allocation7 + $0x620] sm:$0xff] }
 0x3cb   : > { %v1277_v4 = vadd.f32 0.8, %v1273_v43  ;;  %v1279_v5 = vadd.f32 0.8, %v1275_v1  ;;  %v5779_v43 = vcombine.high %v1498_v61, %v1502_v0  ;;  %v5781_v1 = vcombine.high %v1499_v37, %v1503_v38  ;;  %v1554_v0 = vld [vmem:[#allocation7 + $0x640] sm:$0xff]  ;;  %v1555_v38 = vld [vmem:[#allocation7 + $0x648] sm:$0xff] }
 0x3cc   : > { %6850 = vrsqrt.f32 %v1276_v2  ;;  %v1506_v2 = vld [vmem:[#allocation7 + $0x4c0] sm:$0xff] }
 0x3cd   : > { %6852 = vrsqrt.f32 %v1278_v3  ;;  %v1510_v3 = vld [vmem:[#allocation7 + $0x4e0] sm:$0xff] }
 0x3ce   : > { %6854 = vrsqrt.f32 %v1277_v4  ;;  %v1507_v4 = vld [vmem:[#allocation7 + $0x4c8] sm:$0xff]  ;;  %v5787_v49 = vcombine.high %v1506_v2, %v1510_v3  ;;  %v1558_v37 = vld [vmem:[#allocation7 + $0x660] sm:$0xff] }
 0x3cf   : > { %6856 = vrsqrt.f32 %v1279_v5  ;;  %v1511_v5 = vld [vmem:[#allocation7 + $0x4e8] sm:$0xff] }
 0x3d0   : > { %v5789_v51 = vcombine.high %v1507_v4, %v1511_v5 }
 0x3d6   : > { %v6851_v11 = vpop.eup %6850 }
 0x3d7   : > { %v6853_v13 = vpop.eup %6852  ;;  %v1284_v14 = vmul.f32 %v6851_v11, %v1240_v24  ;;  %v5788_v11 = vcombine.low %v1507_v4, %v1511_v5  ;;  %v1566_v4 = vld [vmem:[#allocation7 + $0x6a0] sm:$0xff]  ;;  %v1563_v5 = vld [vmem:[#allocation7 + $0x688] sm:$0xff] }
 0x3d8   : > { %v6855_v17 = vpop.eup %6854  ;;  %v1286_v18 = vmul.f32 %v6853_v13, %v1242_v25  ;;  %v5797_v13 = vcombine.high %v1515_v6, %v1519_v8 }
 0x3d9   : > { %v6857_v28 = vpop.eup %6856  ;;  %v1309_v29 = vmul.f32 %v1292_v10, %v1284_v14  ;;  %v1285_v30 = vmul.f32 %v6855_v17, %v1241_v26  ;;  %v5786_v10 = vcombine.low %v1506_v2, %v1510_v3  ;;  %v1522_v14 = vld [vmem:[#allocation7 + $0x540] sm:$0xff]  ;;  %v1527_v17 = vld [vmem:[#allocation7 + $0x568] sm:$0xff] }
 0x3da   : > { %v1311_v32 = vmul.f32 %v1300_v12, %v1286_v18  ;;  %v1287_v33 = vmul.f32 %v6857_v28, %v1243_v27  ;;  %v1491_v27 = vld [vmem:[#allocation7 + $0x448] sm:$0xff]  ;;  %v1562_v3 = vld [vmem:[#allocation7 + $0x680] sm:$0xff] }
 0x3db   : > { %v1334_v24 = vadd.f32 %v1317_v15, %v1309_v29  ;;  %v1310_v35 = vmul.f32 %v1296_v16, %v1285_v30  ;;  %v5773_v63 = vcombine.high %v1491_v27, %v1495_v56  ;;  %v5772_v42 = vcombine.low %v1491_v27, %v1495_v56  ;;  %v1526_v15 = vld [vmem:[#allocation7 + $0x560] sm:$0xff]  ;;  %v1523_v16 = vld [vmem:[#allocation7 + $0x548] sm:$0xff] }
 0x3dc   : > { %v7533_v36 = vadd.f32 %v1325_v19, %v1311_v32  ;;  %v1312_v41 = vmul.f32 %v1304_v22, %v1287_v33  ;;  %v5796_v19 = vcombine.low %v1515_v6, %v1519_v8  ;;  %v5803_v22 = vcombine.high %v1522_v14, %v1526_v15  ;;  %v1530_v29 = vld [vmem:[#allocation7 + $0x580] sm:$0xff]  ;;  %v1535_v32 = vld [vmem:[#allocation7 + $0x5a8] sm:$0xff] }
 0x3dd   : > { %v1335_v44 = vadd.f32 %v1321_v31, %v1310_v35  ;;  %vm1338_vm4 = vcmp.gt.f32.partialorder %v1334_v24, 0.0  ;;  %v1342_v25 = vmul.f32 0.2, %v1334_v24  ;;  %v5805_v28 = vcombine.high %v1523_v16, %v1527_v17  ;;  %v1534_v30 = vld [vmem:[#allocation7 + $0x5a0] sm:$0xff]  ;;  %v1531_v31 = vld [vmem:[#allocation7 + $0x588] sm:$0xff] }
 0x3de   : > { %v1337_v45 = vadd.f32 %v1329_v34, %v1312_v41  ;;  %v5802_v33 = vcombine.low %v1522_v14, %v1526_v15  ;;  %v5804_v34 = vcombine.low %v1523_v16, %v1527_v17  ;;  %v5813_v35 = vcombine.high %v1531_v31, %v1535_v32  ;;  %v1538_v41 = vld [vmem:[#allocation7 + $0x5c0] sm:$0xff]  ;;  %v1547_v27 = vld [vmem:[#allocation7 + $0x608] sm:$0xff] }
 0x3df   : > { %vm1339_vm5 = vcmp.gt.f32.partialorder %v1335_v44, 0.0  ;;  %v1343_v46 = vmul.f32 0.2, %v1335_v44  ;;  %v1346_v50 = vsel %vm1338_vm4, %v1334_v24, %v1342_v25  ;;  %v5811_v24 = vcombine.high %v1530_v29, %v1534_v30  ;;  %v1539_v25 = vld [vmem:[#allocation7 + $0x5c8] sm:$0xff]  ;;  %v1574_v6 = vld [vmem:[#allocation7 + $0x6e0] sm:$0xff] }
 0x3e0   : > { %vm1341_vm6 = vcmp.gt.f32.partialorder %v1337_v45, 0.0  ;;  %v1345_v26 = vmul.f32 0.2, %v1337_v45  ;;  %v7537_v60 = vpack.c.bf16 %v1346_v50, %v1346_v50  ;;  %v5812_v50 = vcombine.low %v1531_v31, %v1535_v32  ;;  %v1551_v56 = vld [vmem:[#allocation7 + $0x628] sm:$0xff]  ;;  %v1578_v15 = vld [vmem:[#allocation7 + $0x700] sm:$0xff] }
 0x3e1   : > { %v1347_v57 = vsel %vm1339_vm5, %v1335_v44, %v1343_v46  ;;  %v1542_v44 = vld [vmem:[#allocation7 + $0x5e0] sm:$0xff]  ;;  %v5810_v46 = vcombine.low %v1530_v29, %v1534_v30  ;;  %v1571_v8 = vld [vmem:[#allocation7 + $0x6c8] sm:$0xff]  ;;  %vm1340_vm7 = vcmp.gt.f32.partialorder %v7533_v36, 0.0 }
 0x3e2   : > { %v7535_v58 = vpack.c.bf16 %v1347_v57, %v1347_v57  ;;  %v1349_v59 = vsel %vm1341_vm6, %v1337_v45, %v1345_v26  ;;  %v1543_v45 = vld [vmem:[#allocation7 + $0x5e8] sm:$0xff]  ;;  %v5819_v26 = vcombine.high %v1538_v41, %v1542_v44  ;;  %v1546_v57 = vld [vmem:[#allocation7 + $0x600] sm:$0xff] }
 0x3e3   : > { %v7543_v39 = vpack.c.bf16 %v1349_v59, %v1349_v59  ;;  %v5821_v54 = vcombine.high %v1539_v25, %v1543_v45  ;;  %v5818_v59 = vcombine.low %v1538_v41, %v1542_v44  ;;  %v5820_v61 = vcombine.low %v1539_v25, %v1543_v45  ;;  %v1582_v16 = vld [vmem:[#allocation7 + $0x720] sm:$0xff]  ;;  %v1579_v17 = vld [vmem:[#allocation7 + $0x708] sm:$0xff] }
 0x3e4   : > { %2922 = vmatprep.mubr.bf16.mxu0 %v7535_v58  ;;  %3004 = vmatprep.mubr.bf16.mxu1 %v7535_v58  ;;  %v1586_v30 = vld [vmem:[#allocation7 + $0x740] sm:$0xff]  ;;  %v1587_v32 = vld [vmem:[#allocation7 + $0x748] sm:$0xff] }
 0x3e5   : > { %2923 = vmatmul.mubr.bf16.vlgmr.msra.gmra.mrb[8].mxu0 %v7537_v60  ;;  %3005 = vmatmul.mubr.bf16.vlgmr.msra.gmra.mrb[8].mxu1 %v7537_v60  ;;  %v1590_v31 = vld [vmem:[#allocation7 + $0x760] sm:$0xff]  ;;  %v1595_v45 = vld [vmem:[#allocation7 + $0x788] sm:$0xff] }
 0x3e6   : > { %2932 = vmatpush1.bf16.msra.mxu0 %v5762_v52  ;;  %3014 = vmatpush1.bf16.msra.mxu1 %v5764_v53  ;;  %v1514_v52 = vld [vmem:[#allocation7 + $0x500] sm:$0xff] }
 0x3e7   : > { %2963 = vmatprep.mubr.bf16.mxu0 %v7543_v39  ;;  %3045 = vmatprep.mubr.bf16.mxu1 %v7543_v39  ;;  %v1518_v53 = vld [vmem:[#allocation7 + $0x520] sm:$0xff] }
 0x3e8   : > { %2933 = vmatprep.subr.bf16.mxu0 %v5771_v62  ;;  %3015 = vmatprep.subr.bf16.mxu1 %v5773_v63  ;;  %v5795_v12 = vcombine.high %v1514_v52, %v1518_v53  ;;  %v5794_v18 = vcombine.low %v1514_v52, %v1518_v53  ;;  %v5827_v62 = vcombine.high %v1546_v57, %v1550_v55  ;;  %v1570_v53 = vld [vmem:[#allocation7 + $0x6c0] sm:$0xff] }
 0x3e9   : > { %v5829_v63 = vcombine.high %v1547_v27, %v1551_v56  ;;  %v1594_v44 = vld [vmem:[#allocation7 + $0x780] sm:$0xff] }
 0x3ea   : > { %2934 = vmatpush1.bf16.msra.mxu0 %v5770_v40  ;;  %3016 = vmatpush1.bf16.msra.mxu1 %v5772_v42  ;;  %v1559_v40 = vld [vmem:[#allocation7 + $0x668] sm:$0xff]  ;;  %v5826_v42 = vcombine.low %v1546_v57, %v1550_v55  ;;  %v1598_v25 = vld [vmem:[#allocation7 + $0x7a0] sm:$0xff] }
 0x3eb   : > { %2935 = vmatprep.subr.bf16.mxu0 %v5779_v43  ;;  %3017 = vmatprep.subr.bf16.mxu1 %v5781_v1  ;;  %v5828_v43 = vcombine.low %v1547_v27, %v1551_v56  ;;  %v5835_v1 = vcombine.high %v1554_v0, %v1558_v37  ;;  %v5837_v2 = vcombine.high %v1555_v38, %v1559_v40  ;;  %v1602_v55 = vld [vmem:[#allocation7 + $0x7c0] sm:$0xff]  ;;  %v1603_v56 = vld [vmem:[#allocation7 + $0x7c8] sm:$0xff] }
 0x3ec   : > { %v1606_v27 = vld [vmem:[#allocation7 + $0x7e0] sm:$0xff] }
 0x3ee   : > { %2936 = vmatpush1.bf16.msra.mxu0 %v5778_v47  ;;  %3018 = vmatpush1.bf16.msra.mxu1 %v5780_v48  ;;  %v1567_v47 = vld [vmem:[#allocation7 + $0x6a8] sm:$0xff]  ;;  %v5834_v48 = vcombine.low %v1554_v0, %v1558_v37  ;;  %v1356_v37 = vld [vmem:[#allocation7 + $0x10] sm:$0xff] }
 0x3ef   : > { %2937 = vmatprep.subr.bf16.mxu0 %v5787_v49  ;;  %3019 = vmatprep.subr.bf16.mxu1 %v5789_v51  ;;  %v5836_v49 = vcombine.low %v1555_v38, %v1559_v40  ;;  %v5843_v51 = vcombine.high %v1562_v3, %v1566_v4  ;;  %v5845_v52 = vcombine.high %v1563_v5, %v1567_v47  ;;  %v1344_v38 = vmul.f32 0.2, %v7533_v36  ;;  %v1360_v40 = vld [vmem:[#allocation7 + $0x30] sm:$0xff] }
 0x3f2   : > { %2938 = vmatpush1.bf16.msra.mxu0 %v5786_v10  ;;  %3020 = vmatpush1.bf16.msra.mxu1 %v5788_v11  ;;  %v1575_v10 = vld [vmem:[#allocation7 + $0x6e8] sm:$0xff]  ;;  %v5842_v11 = vcombine.low %v1562_v3, %v1566_v4  ;;  %v5639_v3 = vcombine.high %v1356_v37, %v1360_v40 }
 0x3f3   : > { %2939 = vmatprep.subr.bf16.mxu0 %v5795_v12  ;;  %3021 = vmatprep.subr.bf16.mxu1 %v5797_v13  ;;  %v5844_v12 = vcombine.low %v1563_v5, %v1567_v47  ;;  %v5851_v13 = vcombine.high %v1570_v53, %v1574_v6  ;;  %v5853_v14 = vcombine.high %v1571_v8, %v1575_v10  ;;  %v1364_v47 = vld [vmem:[#allocation7 + $0x50] sm:$0xff] }
 0x3f4   : > { %v1348_v5 = vsel %vm1340_vm7, %v7533_v36, %v1344_v38  ;;  %v1373_v36 = vld [vmem:[#allocation7 + $0x98] sm:$0xff] }
 0x3f6   : > { %2940 = vmatpush1.bf16.msra.mxu0 %v5794_v18  ;;  %3022 = vmatpush1.bf16.msra.mxu1 %v5796_v19  ;;  %v1583_v18 = vld [vmem:[#allocation7 + $0x728] sm:$0xff]  ;;  %v5850_v19 = vcombine.low %v1570_v53, %v1574_v6  ;;  %v7556_v53 = vpack.c.bf16 %v1348_v5, %v1348_v5 }
 0x3f7   : > { %2941 = vmatprep.subr.bf16.mxu0 %v5803_v22  ;;  %3023 = vmatprep.subr.bf16.mxu1 %v5805_v28  ;;  %v5852_v22 = vcombine.low %v1571_v8, %v1575_v10  ;;  %v5859_v28 = vcombine.high %v1578_v15, %v1582_v16  ;;  %v5861_v29 = vcombine.high %v1579_v17, %v1583_v18 }
 0x3fa   : > { %2942 = vmatpush1.bf16.msra.mxu0 %v5802_v33  ;;  %3024 = vmatpush1.bf16.msra.mxu1 %v5804_v34  ;;  %v1591_v33 = vld [vmem:[#allocation7 + $0x768] sm:$0xff]  ;;  %v5858_v34 = vcombine.low %v1578_v15, %v1582_v16 }
 0x3fb   : > { %2943 = vmatprep.subr.bf16.mxu0 %v5811_v24  ;;  %3025 = vmatprep.subr.bf16.mxu1 %v5813_v35  ;;  %v5860_v24 = vcombine.low %v1579_v17, %v1583_v18  ;;  %v5867_v35 = vcombine.high %v1586_v30, %v1590_v31  ;;  %v5869_v41 = vcombine.high %v1587_v32, %v1591_v33  ;;  %v1380_v18 = vld [vmem:[#allocation7 + $0xd0] sm:$0xff] }
 0x3fe   : > { %2944 = vmatpush1.bf16.msra.mxu0 %v5810_v46  ;;  %3026 = vmatpush1.bf16.msra.mxu1 %v5812_v50  ;;  %v1599_v46 = vld [vmem:[#allocation7 + $0x7a8] sm:$0xff]  ;;  %v5866_v50 = vcombine.low %v1586_v30, %v1590_v31 }
 0x3ff   : > { %2945 = vmatprep.subr.bf16.mxu0 %v5819_v26  ;;  %3027 = vmatprep.subr.bf16.mxu1 %v5821_v54  ;;  %v5868_v26 = vcombine.low %v1587_v32, %v1591_v33  ;;  %v5875_v54 = vcombine.high %v1594_v44, %v1598_v25  ;;  %v5877_v57 = vcombine.high %v1595_v45, %v1599_v46  ;;  %v1388_v33 = vld [vmem:[#allocation7 + $0x110] sm:$0xff] }
 0x402   : > { %2946 = vmatpush1.bf16.msra.mxu0 %v5818_v59  ;;  %3028 = vmatpush1.bf16.msra.mxu1 %v5820_v61  ;;  %v1607_v59 = vld [vmem:[#allocation7 + $0x7e8] sm:$0xff]  ;;  %v5874_v61 = vcombine.low %v1594_v44, %v1598_v25 }
 0x403   : > { %2947 = vmatprep.subr.bf16.mxu0 %v5827_v62  ;;  %3029 = vmatprep.subr.bf16.mxu1 %v5829_v63  ;;  %v5876_v62 = vcombine.low %v1595_v45, %v1599_v46  ;;  %v5883_v63 = vcombine.high %v1602_v55, %v1606_v27  ;;  %v5885_v0 = vcombine.high %v1603_v56, %v1607_v59  ;;  %v1396_v45 = vld [vmem:[#allocation7 + $0x150] sm:$0xff] }
 0x404   : > { %v1400_v46 = vld [vmem:[#allocation7 + $0x170] sm:$0xff] }
 0x406   : > { %2948 = vmatpush1.bf16.msra.mxu0 %v5826_v42  ;;  %3030 = vmatpush1.bf16.msra.mxu1 %v5828_v43  ;;  %v1357_v42 = vld [vmem:[#allocation7 + $0x18] sm:$0xff] }
 0x407   : > { %2949 = vmatprep.subr.bf16.mxu0 %v5835_v1  ;;  %3031 = vmatprep.subr.bf16.mxu1 %v5837_v2  ;;  %v1361_v43 = vld [vmem:[#allocation7 + $0x38] sm:$0xff]  ;;  %v5882_v1 = vcombine.low %v1602_v55, %v1606_v27  ;;  %v5884_v2 = vcombine.low %v1603_v56, %v1607_v59  ;;  %v5679_v55 = vcombine.high %v1396_v45, %v1400_v46  ;;  %v1404_v56 = vld [vmem:[#allocation7 + $0x190] sm:$0xff] }
 0x408   : > { %v5641_v4 = vcombine.high %v1357_v42, %v1361_v43  ;;  %v5640_v6 = vcombine.low %v1357_v42, %v1361_v43  ;;  %v1408_v59 = vld [vmem:[#allocation7 + $0x1b0] sm:$0xff]  ;;  %v1413_v43 = vld [vmem:[#allocation7 + $0x1d8] sm:$0xff] }
 0x409   : > { %v1416_v42 = vld [vmem:[#allocation7 + $0x1f0] sm:$0xff] }
 0x40a   : > { %2950 = vmatpush1.bf16.msra.mxu0 %v5834_v48  ;;  %3032 = vmatpush1.bf16.msra.mxu1 %v5836_v49  ;;  %v1368_v48 = vld [vmem:[#allocation7 + $0x70] sm:$0xff]  ;;  %v1365_v49 = vld [vmem:[#allocation7 + $0x58] sm:$0xff] }
 0x40b   : > { %2951 = vmatprep.subr.bf16.mxu0 %v5843_v51  ;;  %3033 = vmatprep.subr.bf16.mxu1 %v5845_v52  ;;  %v1369_v51 = vld [vmem:[#allocation7 + $0x78] sm:$0xff]  ;;  %v5638_v52 = vcombine.low %v1356_v37, %v1360_v40  ;;  %v5647_v8 = vcombine.high %v1364_v47, %v1368_v48  ;;  %v5687_v37 = vcombine.high %v1404_v56, %v1408_v59  ;;  %v1412_v40 = vld [vmem:[#allocation7 + $0x1d0] sm:$0xff] }
 0x40c   : > { %v5649_v10 = vcombine.high %v1365_v49, %v1369_v51  ;;  %v5648_v15 = vcombine.low %v1365_v49, %v1369_v51  ;;  %v1421_v49 = vld [vmem:[#allocation7 + $0x218] sm:$0xff] }
 0x40d   : > { %v1425_v51 = vld [vmem:[#allocation7 + $0x238] sm:$0xff] }
 0x40e   : > { %2952 = vmatpush1.bf16.msra.mxu0 %v5842_v11  ;;  %3034 = vmatpush1.bf16.msra.mxu1 %v5844_v12  ;;  %v1372_v11 = vld [vmem:[#allocation7 + $0x90] sm:$0xff] }
 0x40f   : > { %2953 = vmatprep.subr.bf16.mxu0 %v5851_v13  ;;  %3035 = vmatprep.subr.bf16.mxu1 %v5853_v14  ;;  %v1376_v12 = vld [vmem:[#allocation7 + $0xb0] sm:$0xff]  ;;  %v1377_v13 = vld [vmem:[#allocation7 + $0xb8] sm:$0xff]  ;;  %v5646_v14 = vcombine.low %v1364_v47, %v1368_v48 }
 0x410   : > { %v5655_v16 = vcombine.high %v1372_v11, %v1376_v12  ;;  %v5657_v17 = vcombine.high %v1373_v36, %v1377_v13  ;;  %v5656_v30 = vcombine.low %v1373_v36, %v1377_v13  ;;  %v1420_v47 = vld [vmem:[#allocation7 + $0x210] sm:$0xff]  ;;  %v1429_v36 = vld [vmem:[#allocation7 + $0x258] sm:$0xff] }
 0x411   : > { %v1424_v48 = vld [vmem:[#allocation7 + $0x230] sm:$0xff]  ;;  %v1433_v13 = vld [vmem:[#allocation7 + $0x278] sm:$0xff] }
 0x412   : > { %2954 = vmatpush1.bf16.msra.mxu0 %v5850_v19  ;;  %3036 = vmatpush1.bf16.msra.mxu1 %v5852_v22  ;;  %v1384_v19 = vld [vmem:[#allocation7 + $0xf0] sm:$0xff]  ;;  %v1381_v22 = vld [vmem:[#allocation7 + $0xd8] sm:$0xff] }
 0x413   : > { %2955 = vmatprep.subr.bf16.mxu0 %v5859_v28  ;;  %3037 = vmatprep.subr.bf16.mxu1 %v5861_v29  ;;  %v1385_v28 = vld [vmem:[#allocation7 + $0xf8] sm:$0xff]  ;;  %v5654_v29 = vcombine.low %v1372_v11, %v1376_v12  ;;  %v5663_v31 = vcombine.high %v1380_v18, %v1384_v19  ;;  %v1428_v11 = vld [vmem:[#allocation7 + $0x250] sm:$0xff] }
 0x414   : > { %v5665_v32 = vcombine.high %v1381_v22, %v1385_v28  ;;  %v1432_v12 = vld [vmem:[#allocation7 + $0x270] sm:$0xff] }
 0x416   : > { %2956 = vmatpush1.bf16.msra.mxu0 %v5858_v34  ;;  %3038 = vmatpush1.bf16.msra.mxu1 %v5860_v24  ;;  %v1392_v34 = vld [vmem:[#allocation7 + $0x130] sm:$0xff]  ;;  %v1393_v24 = vld [vmem:[#allocation7 + $0x138] sm:$0xff] }
 0x417   : > { %2957 = vmatprep.subr.bf16.mxu0 %v5867_v35  ;;  %3039 = vmatprep.subr.bf16.mxu1 %v5869_v41  ;;  %v5662_v35 = vcombine.low %v1380_v18, %v1384_v19  ;;  %v5664_v41 = vcombine.low %v1381_v22, %v1385_v28  ;;  %v5671_v44 = vcombine.high %v1388_v33, %v1392_v34  ;;  %v1436_v18 = vld [vmem:[#allocation7 + $0x290] sm:$0xff]  ;;  %v1437_v22 = vld [vmem:[#allocation7 + $0x298] sm:$0xff] }
 0x418   : > { %v1440_v19 = vld [vmem:[#allocation7 + $0x2b0] sm:$0xff]  ;;  %v1441_v28 = vld [vmem:[#allocation7 + $0x2b8] sm:$0xff] }
 0x41a   : > { %2958 = vmatpush1.bf16.msra.mxu0 %v5866_v50  ;;  %3040 = vmatpush1.bf16.msra.mxu1 %v5868_v26  ;;  %v1397_v50 = vld [vmem:[#allocation7 + $0x158] sm:$0xff] }
 0x41b   : > { %2959 = vmatprep.subr.bf16.mxu0 %v5875_v54  ;;  %3041 = vmatprep.subr.bf16.mxu1 %v5877_v57  ;;  %v1401_v26 = vld [vmem:[#allocation7 + $0x178] sm:$0xff]  ;;  %v5670_v54 = vcombine.low %v1388_v33, %v1392_v34  ;;  %v1444_v33 = vld [vmem:[#allocation7 + $0x2d0] sm:$0xff] }
 0x41c   : > { %v5681_v27 = vcombine.high %v1397_v50, %v1401_v26  ;;  %v1448_v34 = vld [vmem:[#allocation7 + $0x2f0] sm:$0xff] }
 0x41e   : > { %2960 = vmatpush1.bf16.msra.mxu0 %v5874_v61  ;;  %3042 = vmatpush1.bf16.msra.mxu1 %v5876_v62  ;;  %v1405_v61 = vld [vmem:[#allocation7 + $0x198] sm:$0xff] }
 0x41f   : > { %2961 = vmatprep.subr.bf16.mxu0 %v5883_v63  ;;  %3043 = vmatprep.subr.bf16.mxu1 %v5885_v0  ;;  %v1409_v62 = vld [vmem:[#allocation7 + $0x1b8] sm:$0xff]  ;;  %v5678_v63 = vcombine.low %v1396_v45, %v1400_v46  ;;  %v5680_v0 = vcombine.low %v1397_v50, %v1401_v26  ;;  %v1452_v45 = vld [vmem:[#allocation7 + $0x310] sm:$0xff] }
 0x420   : > { %v5689_v38 = vcombine.high %v1405_v61, %v1409_v62  ;;  %v1456_v46 = vld [vmem:[#allocation7 + $0x330] sm:$0xff]  ;;  %v1453_v50 = vld [vmem:[#allocation7 + $0x318] sm:$0xff] }
 0x421   : > { %v1457_v26 = vld [vmem:[#allocation7 + $0x338] sm:$0xff] }
 0x422   : > { %2962 = vmatpush1.bf16.msra.mxu0 %v5882_v1  ;;  %3044 = vmatpush1.bf16.msra.mxu1 %v5884_v2  ;;  %v1417_v1 = vld [vmem:[#allocation7 + $0x1f8] sm:$0xff]  ;;  %v5686_v2 = vcombine.low %v1404_v56, %v1408_v59  ;;  %v1460_v56 = vld [vmem:[#allocation7 + $0x350] sm:$0xff] }
 0x423   : > { %3054 = vmatprep.subr.bf16.mxu0 %v5639_v3  ;;  %3136 = vmatprep.subr.bf16.mxu1 %v5641_v4  ;;  %v5688_v3 = vcombine.low %v1405_v61, %v1409_v62  ;;  %v5695_v4 = vcombine.high %v1412_v40, %v1416_v42  ;;  %v5697_v5 = vcombine.high %v1413_v43, %v1417_v1  ;;  %v1464_v59 = vld [vmem:[#allocation7 + $0x370] sm:$0xff]  ;;  %v1461_v61 = vld [vmem:[#allocation7 + $0x358] sm:$0xff] }
 0x424   : > { %v1465_v62 = vld [vmem:[#allocation7 + $0x378] sm:$0xff] }
 0x425   : > { %2964 = vmatmul.mubr.bf16.vlgmr.msra.gmra.mrb[8].mxu0 %v7556_v53  ;;  %3046 = vmatmul.mubr.bf16.vlgmr.msra.gmra.mrb[8].mxu1 %v7556_v53 }
 0x426   : > { %3055 = vmatpush1.bf16.msra.mxu0 %v5638_v52  ;;  %3086 = vmatprep.mubr.bf16.mxu0 %v7535_v58  ;;  %v5694_v52 = vcombine.low %v1412_v40, %v1416_v42  ;;  %v1468_v40 = vld [vmem:[#allocation7 + $0x390] sm:$0xff] }
 0x427   : > { %3137 = vmatpush1.bf16.msra.mxu1 %v5640_v6  ;;  %3168 = vmatprep.mubr.bf16.mxu1 %v7535_v58  ;;  %v1389_v58 = vld [vmem:[#allocation7 + $0x118] sm:$0xff]  ;;  %v5696_v6 = vcombine.low %v1413_v43, %v1417_v1  ;;  %v1472_v42 = vld [vmem:[#allocation7 + $0x3b0] sm:$0xff] }
 0x428   : > { %3056 = vmatprep.subr.bf16.mxu0 %v5647_v8  ;;  %3138 = vmatprep.subr.bf16.mxu1 %v5649_v10  ;;  %v5673_v25 = vcombine.high %v1389_v58, %v1393_v24  ;;  %v5672_v57 = vcombine.low %v1389_v58, %v1393_v24  ;;  %v5703_v8 = vcombine.high %v1420_v47, %v1424_v48  ;;  %v1445_v58 = vld [vmem:[#allocation7 + $0x2d8] sm:$0xff] }
 0x429   : > { %v5705_v10 = vcombine.high %v1421_v49, %v1425_v51  ;;  %v1449_v24 = vld [vmem:[#allocation7 + $0x2f8] sm:$0xff] }
 0x42a   : > { %3057 = vmatpush1.bf16.msra.mxu0 %v5646_v14  ;;  %v5702_v14 = vcombine.low %v1420_v47, %v1424_v48  ;;  %v1469_v43 = vld [vmem:[#allocation7 + $0x398] sm:$0xff]  ;;  %v1476_v47 = vld [vmem:[#allocation7 + $0x3d0] sm:$0xff] }
 0x42b   : > { %3139 = vmatpush1.bf16.msra.mxu1 %v5648_v15  ;;  %3058 = vmatprep.subr.bf16.mxu0 %v5655_v16  ;;  %v5704_v15 = vcombine.low %v1421_v49, %v1425_v51  ;;  %v5711_v16 = vcombine.high %v1428_v11, %v1432_v12  ;;  %v1473_v1 = vld [vmem:[#allocation7 + $0x3b8] sm:$0xff]  ;;  %v1480_v48 = vld [vmem:[#allocation7 + $0x3f0] sm:$0xff] }
 0x42c   : > { %3140 = vmatprep.subr.bf16.mxu1 %v5657_v17  ;;  %v5713_v17 = vcombine.high %v1429_v36, %v1433_v13  ;;  %v1477_v49 = vld [vmem:[#allocation7 + $0x3d8] sm:$0xff] }
 0x42d   : > { %v1481_v51 = vld [vmem:[#allocation7 + $0x3f8] sm:$0xff] }
 0x42e   : > { %3059 = vmatpush1.bf16.msra.mxu0 %v5654_v29  ;;  %v5710_v29 = vcombine.low %v1428_v11, %v1432_v12  ;;  %v1484_v11 = vld [vmem:[#allocation7 + $0x410] sm:$0xff] }
 0x42f   : > { %3141 = vmatpush1.bf16.msra.mxu1 %v5656_v30  ;;  %3060 = vmatprep.subr.bf16.mxu0 %v5663_v31  ;;  %v5712_v30 = vcombine.low %v1429_v36, %v1433_v13  ;;  %v5719_v31 = vcombine.high %v1436_v18, %v1440_v19  ;;  %v1488_v12 = vld [vmem:[#allocation7 + $0x430] sm:$0xff]  ;;  %v1485_v36 = vld [vmem:[#allocation7 + $0x418] sm:$0xff] }
 0x430   : > { %3142 = vmatprep.subr.bf16.mxu1 %v5665_v32  ;;  %v5721_v32 = vcombine.high %v1437_v22, %v1441_v28  ;;  %v1489_v13 = vld [vmem:[#allocation7 + $0x438] sm:$0xff] }
 0x432   : > { %3061 = vmatpush1.bf16.msra.mxu0 %v5662_v35  ;;  %v5718_v35 = vcombine.low %v1436_v18, %v1440_v19  ;;  %v1492_v18 = vld [vmem:[#allocation7 + $0x450] sm:$0xff] }
 0x433   : > { %3143 = vmatpush1.bf16.msra.mxu1 %v5664_v41  ;;  %3062 = vmatprep.subr.bf16.mxu0 %v5671_v44  ;;  %v5720_v41 = vcombine.low %v1437_v22, %v1441_v28  ;;  %v5727_v44 = vcombine.high %v1444_v33, %v1448_v34  ;;  %v1496_v19 = vld [vmem:[#allocation7 + $0x470] sm:$0xff]  ;;  %v5766_v22 = vcombine.low %v1484_v11, %v1488_v12  ;;  %v1493_v28 = vld [vmem:[#allocation7 + $0x458] sm:$0xff] }
 0x434   : > { %3144 = vmatprep.subr.bf16.mxu1 %v5673_v25  ;;  %v5729_v25 = vcombine.high %v1445_v58, %v1449_v24 }
 0x436   : > { %3063 = vmatpush1.bf16.msra.mxu0 %v5670_v54  ;;  %v5726_v54 = vcombine.low %v1444_v33, %v1448_v34  ;;  %v1504_v33 = vld [vmem:[#allocation7 + $0x4b0] sm:$0xff] }
 0x437   : > { %3145 = vmatpush1.bf16.msra.mxu1 %v5672_v57  ;;  %3064 = vmatprep.subr.bf16.mxu0 %v5679_v55  ;;  %v5728_v57 = vcombine.low %v1445_v58, %v1449_v24  ;;  %v5735_v55 = vcombine.high %v1452_v45, %v1456_v46  ;;  %v1501_v58 = vld [vmem:[#allocation7 + $0x498] sm:$0xff] }
 0x438   : > { %3146 = vmatprep.subr.bf16.mxu1 %v5681_v27  ;;  %v5737_v27 = vcombine.high %v1453_v50, %v1457_v26  ;;  %v1505_v24 = vld [vmem:[#allocation7 + $0x4b8] sm:$0xff] }
 0x43a   : > { %3065 = vmatpush1.bf16.msra.mxu0 %v5678_v63  ;;  %v5734_v63 = vcombine.low %v1452_v45, %v1456_v46  ;;  %v1508_v45 = vld [vmem:[#allocation7 + $0x4d0] sm:$0xff] }
 0x43b   : > { %3147 = vmatpush1.bf16.msra.mxu1 %v5680_v0  ;;  %3066 = vmatprep.subr.bf16.mxu0 %v5687_v37  ;;  %v5736_v0 = vcombine.low %v1453_v50, %v1457_v26  ;;  %v5743_v37 = vcombine.high %v1460_v56, %v1464_v59  ;;  %v1512_v46 = vld [vmem:[#allocation7 + $0x4f0] sm:$0xff]  ;;  %v1509_v50 = vld [vmem:[#allocation7 + $0x4d8] sm:$0xff] }
 0x43c   : > { %3148 = vmatprep.subr.bf16.mxu1 %v5689_v38  ;;  %v5745_v38 = vcombine.high %v1461_v61, %v1465_v62  ;;  %v1513_v26 = vld [vmem:[#allocation7 + $0x4f8] sm:$0xff] }
 0x43e   : > { %3067 = vmatpush1.bf16.msra.mxu0 %v5686_v2  ;;  %v5742_v2 = vcombine.low %v1460_v56, %v1464_v59  ;;  %v1520_v56 = vld [vmem:[#allocation7 + $0x530] sm:$0xff]  ;;  %v1517_v59 = vld [vmem:[#allocation7 + $0x518] sm:$0xff] }
 0x43f   : > { %3149 = vmatpush1.bf16.msra.mxu1 %v5688_v3  ;;  %3068 = vmatprep.subr.bf16.mxu0 %v5695_v4  ;;  %v5744_v3 = vcombine.low %v1461_v61, %v1465_v62  ;;  %v5751_v4 = vcombine.high %v1468_v40, %v1472_v42  ;;  %v1521_v61 = vld [vmem:[#allocation7 + $0x538] sm:$0xff]  ;;  %v5792_v62 = vcombine.low %v1509_v50, %v1513_v26 }
 0x440   : > { %3150 = vmatprep.subr.bf16.mxu1 %v5697_v5  ;;  %v5753_v5 = vcombine.high %v1469_v43, %v1473_v1 }
 0x442   : > { %3069 = vmatpush1.bf16.msra.mxu0 %v5694_v52  ;;  %v5750_v52 = vcombine.low %v1468_v40, %v1472_v42  ;;  %v1525_v40 = vld [vmem:[#allocation7 + $0x558] sm:$0xff] }
 0x443   : > { %3151 = vmatpush1.bf16.msra.mxu1 %v5696_v6  ;;  %3070 = vmatprep.subr.bf16.mxu0 %v5703_v8  ;;  %v5752_v6 = vcombine.low %v1469_v43, %v1473_v1  ;;  %v5759_v8 = vcombine.high %v1476_v47, %v1480_v48  ;;  %v1529_v42 = vld [vmem:[#allocation7 + $0x578] sm:$0xff]  ;;  %v5800_v1 = vcombine.low %v1517_v59, %v1521_v61 }
 0x444   : > { %3152 = vmatprep.subr.bf16.mxu1 %v5705_v10  ;;  %v5761_v10 = vcombine.high %v1477_v49, %v1481_v51 }
 0x446   : > { %3071 = vmatpush1.bf16.msra.mxu0 %v5702_v14  ;;  %v5758_v14 = vcombine.low %v1476_v47, %v1480_v48  ;;  %v1533_v47 = vld [vmem:[#allocation7 + $0x598] sm:$0xff] }
 0x447   : > { %3153 = vmatpush1.bf16.msra.mxu1 %v5704_v15  ;;  %3072 = vmatprep.subr.bf16.mxu0 %v5711_v16  ;;  %v5760_v15 = vcombine.low %v1477_v49, %v1481_v51  ;;  %v5767_v16 = vcombine.high %v1484_v11, %v1488_v12  ;;  %v1537_v48 = vld [vmem:[#allocation7 + $0x5b8] sm:$0xff]  ;;  %v5808_v51 = vcombine.low %v1525_v40, %v1529_v42 }
 0x448   : > { %3154 = vmatprep.subr.bf16.mxu1 %v5713_v17  ;;  %v5769_v17 = vcombine.high %v1485_v36, %v1489_v13  ;;  %v1541_v11 = vld [vmem:[#allocation7 + $0x5d8] sm:$0xff] }
 0x449   : > { %v1545_v12 = vld [vmem:[#allocation7 + $0x5f8] sm:$0xff] }
 0x44a   : > { %3073 = vmatpush1.bf16.msra.mxu0 %v5710_v29  ;;  %v1497_v29 = vld [vmem:[#allocation7 + $0x478] sm:$0xff] }
 0x44b   : > { %3155 = vmatpush1.bf16.msra.mxu1 %v5712_v30  ;;  %3074 = vmatprep.subr.bf16.mxu0 %v5719_v31  ;;  %v5768_v30 = vcombine.low %v1485_v36, %v1489_v13  ;;  %v5775_v31 = vcombine.high %v1492_v18, %v1496_v19  ;;  %v5777_v34 = vcombine.high %v1493_v28, %v1497_v29 }
 0x44c   : > { %3156 = vmatprep.subr.bf16.mxu1 %v5721_v32  ;;  %v1500_v32 = vld [vmem:[#allocation7 + $0x490] sm:$0xff]  ;;  %v5816_v13 = vcombine.low %v1533_v47, %v1537_v48 }
 0x44e   : > { %3075 = vmatpush1.bf16.msra.mxu0 %v5718_v35  ;;  %v5774_v35 = vcombine.low %v1492_v18, %v1496_v19  ;;  %v1549_v18 = vld [vmem:[#allocation7 + $0x618] sm:$0xff] }
 0x44f   : > { %3157 = vmatpush1.bf16.msra.mxu1 %v5720_v41  ;;  %3076 = vmatprep.subr.bf16.mxu0 %v5727_v44  ;;  %v5776_v41 = vcombine.low %v1493_v28, %v1497_v29  ;;  %v5783_v44 = vcombine.high %v1500_v32, %v1504_v33  ;;  %v1553_v19 = vld [vmem:[#allocation7 + $0x638] sm:$0xff]  ;;  %v5824_v28 = vcombine.low %v1541_v11, %v1545_v12 }
 0x450   : > { %3158 = vmatprep.subr.bf16.mxu1 %v5729_v25  ;;  %v5785_v25 = vcombine.high %v1501_v58, %v1505_v24 }
 0x452   : > { %3077 = vmatpush1.bf16.msra.mxu0 %v5726_v54  ;;  %v5782_v54 = vcombine.low %v1500_v32, %v1504_v33  ;;  %v1560_v32 = vld [vmem:[#allocation7 + $0x670] sm:$0xff]  ;;  %v1557_v33 = vld [vmem:[#allocation7 + $0x658] sm:$0xff] }
 0x453   : > { %3159 = vmatpush1.bf16.msra.mxu1 %v5728_v57  ;;  %3078 = vmatprep.subr.bf16.mxu0 %v5735_v55  ;;  %v5791_v57 = vcombine.high %v1508_v45, %v1512_v46  ;;  %v5793_v55 = vcombine.high %v1509_v50, %v1513_v26 }
 0x454   : > { %3160 = vmatprep.subr.bf16.mxu1 %v5737_v27  ;;  %v1516_v27 = vld [vmem:[#allocation7 + $0x510] sm:$0xff] }
 0x455   : > { %v5798_v43 = vcombine.low %v1516_v27, %v1520_v56 }
 0x456   : > { %3079 = vmatpush1.bf16.msra.mxu0 %v5734_v63  ;;  %v5799_v63 = vcombine.high %v1516_v27, %v1520_v56  ;;  %v1573_v27 = vld [vmem:[#allocation7 + $0x6d8] sm:$0xff] }
 0x457   : > { %3161 = vmatpush1.bf16.msra.mxu1 %v5736_v0  ;;  %3080 = vmatprep.subr.bf16.mxu0 %v5743_v37  ;;  %v5801_v0 = vcombine.high %v1517_v59, %v1521_v61  ;;  %v1524_v37 = vld [vmem:[#allocation7 + $0x550] sm:$0xff]  ;;  %v1577_v56 = vld [vmem:[#allocation7 + $0x6f8] sm:$0xff] }
 0x458   : > { %3162 = vmatprep.subr.bf16.mxu1 %v5745_v38  ;;  %v1528_v38 = vld [vmem:[#allocation7 + $0x570] sm:$0xff] }
 0x459   : > { %v5806_v49 = vcombine.low %v1524_v37, %v1528_v38 }
 0x45a   : > { %3081 = vmatpush1.bf16.msra.mxu0 %v5742_v2  ;;  %v5807_v2 = vcombine.high %v1524_v37, %v1528_v38  ;;  %v1581_v37 = vld [vmem:[#allocation7 + $0x718] sm:$0xff] }
 0x45b   : > { %3163 = vmatpush1.bf16.msra.mxu1 %v5744_v3  ;;  %3082 = vmatprep.subr.bf16.mxu0 %v5751_v4  ;;  %v5809_v3 = vcombine.high %v1525_v40, %v1529_v42  ;;  %v1532_v4 = vld [vmem:[#allocation7 + $0x590] sm:$0xff]  ;;  %v1585_v38 = vld [vmem:[#allocation7 + $0x738] sm:$0xff]  ;;  %v5856_v42 = vcombine.low %v1573_v27, %v1577_v56 }
 0x45c   : > { %3164 = vmatprep.subr.bf16.mxu1 %v5753_v5  ;;  %v1536_v5 = vld [vmem:[#allocation7 + $0x5b0] sm:$0xff] }
 0x45d   : > { %v5814_v36 = vcombine.low %v1532_v4, %v1536_v5 }
 0x45e   : > { %3083 = vmatpush1.bf16.msra.mxu0 %v5750_v52  ;;  %v5815_v52 = vcombine.high %v1532_v4, %v1536_v5  ;;  %v1589_v4 = vld [vmem:[#allocation7 + $0x758] sm:$0xff] }
 0x45f   : > { %3165 = vmatpush1.bf16.msra.mxu1 %v5752_v6  ;;  %3084 = vmatprep.subr.bf16.mxu0 %v5759_v8  ;;  %v5817_v6 = vcombine.high %v1533_v47, %v1537_v48  ;;  %v1540_v8 = vld [vmem:[#allocation7 + $0x5d0] sm:$0xff]  ;;  %v1593_v5 = vld [vmem:[#allocation7 + $0x778] sm:$0xff]  ;;  %v5864_v48 = vcombine.low %v1581_v37, %v1585_v38 }
 0x460   : > { %3166 = vmatprep.subr.bf16.mxu1 %v5761_v10  ;;  %v1544_v10 = vld [vmem:[#allocation7 + $0x5f0] sm:$0xff] }
 0x462   : > { %3085 = vmatpush1.bf16.msra.mxu0 %v5758_v14  ;;  %v5823_v14 = vcombine.high %v1540_v8, %v1544_v10 }
 0x463   : > { %3167 = vmatpush1.bf16.msra.mxu1 %v5760_v15  ;;  %3095 = vmatprep.subr.bf16.mxu0 %v5767_v16  ;;  %v5825_v15 = vcombine.high %v1541_v11, %v1545_v12  ;;  %v1548_v16 = vld [vmem:[#allocation7 + $0x610] sm:$0xff]  ;;  %v5872_v12 = vcombine.low %v1589_v4, %v1593_v5 }
 0x464   : > { %3177 = vmatprep.subr.bf16.mxu1 %v5769_v17  ;;  %v1552_v17 = vld [vmem:[#allocation7 + $0x630] sm:$0xff] }
 0x465   : > { %3087 = vmatmul.mubr.bf16.vlgmr.msra.gmra.mrb[12].mxu0 %v7537_v60  ;;  %v5831_v29 = vcombine.high %v1548_v16, %v1552_v17 }
 0x466   : > { %3169 = vmatmul.mubr.bf16.vlgmr.msra.gmra.mrb[12].mxu1 %v7537_v60  ;;  %3096 = vmatpush1.bf16.msra.mxu0 %v5766_v22  ;;  %v5784_v60 = vcombine.low %v1501_v58, %v1505_v24  ;;  %v5822_v22 = vcombine.low %v1540_v8, %v1544_v10  ;;  %v5830_v58 = vcombine.low %v1548_v16, %v1552_v17  ;;  %v1597_v8 = vld [vmem:[#allocation7 + $0x798] sm:$0xff] }
 0x467   : > { %3127 = vmatprep.mubr.bf16.mxu0 %v7543_v39  ;;  %3178 = vmatpush1.bf16.msra.mxu1 %v5768_v30  ;;  %v5833_v30 = vcombine.high %v1549_v18, %v1553_v19  ;;  %v5832_v24 = vcombine.low %v1549_v18, %v1553_v19  ;;  %v1601_v10 = vld [vmem:[#allocation7 + $0x7b8] sm:$0xff] }
 0x468   : > { %3209 = vmatprep.mubr.bf16.mxu1 %v7543_v39  ;;  %3097 = vmatprep.subr.bf16.mxu0 %v5775_v31  ;;  %v5790_v39 = vcombine.low %v1508_v45, %v1512_v46  ;;  %v1556_v31 = vld [vmem:[#allocation7 + $0x650] sm:$0xff]  ;;  %v1565_v45 = vld [vmem:[#allocation7 + $0x698] sm:$0xff]  ;;  %v5880_v19 = vcombine.low %v1597_v8, %v1601_v10 }
 0x469   : > { %3179 = vmatprep.subr.bf16.mxu1 %v5777_v34  ;;  %v1561_v34 = vld [vmem:[#allocation7 + $0x678] sm:$0xff]  ;;  %v5838_v50 = vcombine.low %v1556_v31, %v1560_v32 }
 0x46a   : > { %3098 = vmatpush1.bf16.msra.mxu0 %v5774_v35  ;;  %v5839_v35 = vcombine.high %v1556_v31, %v1560_v32  ;;  %v1569_v46 = vld [vmem:[#allocation7 + $0x6b8] sm:$0xff]  ;;  %v5840_v26 = vcombine.low %v1557_v33, %v1561_v34  ;;  %v6467_v32 = vld [vmem:[%s7460_s16 + $0xc] ss:$16 sps:$4 sm:$0xff]  }
 0x46b   : > { %3180 = vmatpush1.bf16.msra.mxu1 %v5776_v41  ;;  %3099 = vmatprep.subr.bf16.mxu0 %v5783_v44  ;;  %v5841_v41 = vcombine.high %v1557_v33, %v1561_v34  ;;  %v1564_v44 = vld [vmem:[#allocation7 + $0x690] sm:$0xff]  ;;  %v5848_v61 = vcombine.low %v1565_v45, %v1569_v46  ;;  %v1605_v16 = vld [vmem:[#allocation7 + $0x7d8] sm:$0xff] }
 0x46c   : > { %3181 = vmatprep.subr.bf16.mxu1 %v5785_v25  ;;  %v1568_v25 = vld [vmem:[#allocation7 + $0x6b0] sm:$0xff]  ;;  %v1609_v17 = vld [vmem:[#allocation7 + $0x7f8] sm:$0xff] }
 0x46d   : > { %v5846_v59 = vcombine.low %v1564_v44, %v1568_v25  ;;  %v6464_v31 = vld [vmem:[%s7460_s16 + $0x4] ss:$16 sps:$4 sm:$0xff]   ;;  %v6462_v33 = vld [vmem:[%s7460_s16] ss:$16 sps:$4 sm:$0xff]   ;;  %v6465_v34 = vld [vmem:[%s7460_s16 + $0x8] ss:$16 sps:$4 sm:$0xff]  }
 0x46e   : > { %3100 = vmatpush1.bf16.msra.mxu0 %v5782_v54  ;;  %v5847_v54 = vcombine.high %v1564_v44, %v1568_v25  ;;  %v6476_v44 = vld [vmem:[%s7460_s16 + $0x44] ss:$16 sps:$4 sm:$0xff]   ;;  %v6479_v25 = vld [vmem:[%s7460_s16 + $0x4c] ss:$16 sps:$4 sm:$0xff]  }
 0x46f   : > { %3182 = vmatpush1.bf16.msra.mxu1 %v5784_v60  ;;  %3101 = vmatprep.subr.bf16.mxu0 %v5791_v57  ;;  %v5849_v60 = vcombine.high %v1565_v45, %v1569_v46  ;;  %v1572_v57 = vld [vmem:[#allocation7 + $0x6d0] sm:$0xff]  ;;  %v6474_v45 = vld [vmem:[%s7460_s16 + $0x40] ss:$16 sps:$4 sm:$0xff]  }
 0x470   : > { %3183 = vmatprep.subr.bf16.mxu1 %v5793_v55  ;;  %v1576_v55 = vld [vmem:[#allocation7 + $0x6f0] sm:$0xff] }
 0x471   : > { %v5854_v40 = vcombine.low %v1572_v57, %v1576_v55  ;;  %v6477_v46 = vld [vmem:[%s7460_s16 + $0x48] ss:$16 sps:$4 sm:$0xff]  }
 0x472   : > { %3102 = vmatpush1.bf16.msra.mxu0 %v5790_v39  ;;  %v5855_v39 = vcombine.high %v1572_v57, %v1576_v55  ;;  %v6491_v57 = vld [vmem:[%s7460_s16 + $0x8c] ss:$16 sps:$4 sm:$0xff]   ;;  %v6486_v55 = vld [vmem:[%s7460_s16 + $0x80] ss:$16 sps:$4 sm:$0xff]  }
 0x473   : > { %3184 = vmatpush1.bf16.msra.mxu1 %v5792_v62  ;;  %3103 = vmatprep.subr.bf16.mxu0 %v5799_v63  ;;  %v5857_v62 = vcombine.high %v1573_v27, %v1577_v56  ;;  %v1580_v63 = vld [vmem:[#allocation7 + $0x710] sm:$0xff]  ;;  %v6494_v56 = vld [vmem:[%s7460_s16 + $0xa4] ss:$16 sps:$4 sm:$0xff]  }
 0x474   : > { %3185 = vmatprep.subr.bf16.mxu1 %v5801_v0  ;;  %v1584_v0 = vld [vmem:[#allocation7 + $0x730] sm:$0xff] }
 0x475   : > { %v5862_v47 = vcombine.low %v1580_v63, %v1584_v0  ;;  %v6489_v27 = vld [vmem:[%s7460_s16 + $0x88] ss:$16 sps:$4 sm:$0xff]  }
 0x476   : > { %3104 = vmatpush1.bf16.msra.mxu0 %v5798_v43  ;;  %v5863_v43 = vcombine.high %v1580_v63, %v1584_v0  ;;  %v6503_v63 = vld [vmem:[%s7460_s16 + $0xcc] ss:$16 sps:$4 sm:$0xff]   ;;  %v6498_v0 = vld [vmem:[%s7460_s16 + $0xc0] ss:$16 sps:$4 sm:$0xff]  }
 0x477   : > { %3186 = vmatpush1.bf16.msra.mxu1 %v5800_v1  ;;  %3105 = vmatprep.subr.bf16.mxu0 %v5807_v2  ;;  %v5865_v1 = vcombine.high %v1581_v37, %v1585_v38  ;;  %v1588_v2 = vld [vmem:[#allocation7 + $0x750] sm:$0xff]  ;;  %v6506_v38 = vld [vmem:[%s7460_s16 + $0xe4] ss:$16 sps:$4 sm:$0xff]  }
 0x478   : > { %3187 = vmatprep.subr.bf16.mxu1 %v5809_v3  ;;  %v1592_v3 = vld [vmem:[#allocation7 + $0x770] sm:$0xff] }
 0x479   : > { %v5870_v11 = vcombine.low %v1588_v2, %v1592_v3  ;;  %v6501_v37 = vld [vmem:[%s7460_s16 + $0xc8] ss:$16 sps:$4 sm:$0xff]  }
 0x47a   : > { %3106 = vmatpush1.bf16.msra.mxu0 %v5806_v49  ;;  %v5871_v49 = vcombine.high %v1588_v2, %v1592_v3  ;;  %v6515_v2 = vld [vmem:[%s7460_s16 + $0x10c] ss:$16 sps:$4 sm:$0xff]   ;;  %v6510_v3 = vld [vmem:[%s7460_s16 + $0x100] ss:$16 sps:$4 sm:$0xff]  }
 0x47b   : > { %3188 = vmatpush1.bf16.msra.mxu1 %v5808_v51  ;;  %3107 = vmatprep.subr.bf16.mxu0 %v5815_v52  ;;  %v5873_v51 = vcombine.high %v1589_v4, %v1593_v5  ;;  %v1596_v52 = vld [vmem:[#allocation7 + $0x790] sm:$0xff]  ;;  %v6518_v5 = vld [vmem:[%s7460_s16 + $0x124] ss:$16 sps:$4 sm:$0xff]  }
 0x47c   : > { %3189 = vmatprep.subr.bf16.mxu1 %v5817_v6  ;;  %v1600_v6 = vld [vmem:[#allocation7 + $0x7b0] sm:$0xff] }
 0x47d   : > { %v5878_v18 = vcombine.low %v1596_v52, %v1600_v6  ;;  %v6513_v4 = vld [vmem:[%s7460_s16 + $0x108] ss:$16 sps:$4 sm:$0xff]  }
 0x47e   : > { %3108 = vmatpush1.bf16.msra.mxu0 %v5814_v36  ;;  %v5879_v36 = vcombine.high %v1596_v52, %v1600_v6  ;;  %v6527_v52 = vld [vmem:[%s7460_s16 + $0x14c] ss:$16 sps:$4 sm:$0xff]   ;;  %v6522_v6 = vld [vmem:[%s7460_s16 + $0x140] ss:$16 sps:$4 sm:$0xff]  }
 0x47f   : > { %3190 = vmatpush1.bf16.msra.mxu1 %v5816_v13  ;;  %3109 = vmatprep.subr.bf16.mxu0 %v5823_v14  ;;  %v5881_v13 = vcombine.high %v1597_v8, %v1601_v10  ;;  %v1604_v14 = vld [vmem:[#allocation7 + $0x7d0] sm:$0xff]  ;;  %v6530_v10 = vld [vmem:[%s7460_s16 + $0x164] ss:$16 sps:$4 sm:$0xff]  }
 0x480   : > { %3191 = vmatprep.subr.bf16.mxu1 %v5825_v15  ;;  %v1608_v15 = vld [vmem:[#allocation7 + $0x7f0] sm:$0xff] }
 0x481   : > { %v6525_v8 = vld [vmem:[%s7460_s16 + $0x148] ss:$16 sps:$4 sm:$0xff]  }
 0x482   : > { %3110 = vmatpush1.bf16.msra.mxu0 %v5822_v22  ;;  %v5887_v22 = vcombine.high %v1604_v14, %v1608_v15 }
 0x483   : > { %3192 = vmatpush1.bf16.msra.mxu1 %v5824_v28  ;;  %3111 = vmatprep.subr.bf16.mxu0 %v5831_v29  ;;  %v5889_v28 = vcombine.high %v1605_v16, %v1609_v17  ;;  %v5886_v29 = vcombine.low %v1604_v14, %v1608_v15  ;;  %v6539_v14 = vld [vmem:[%s7460_s16 + $0x18c] ss:$16 sps:$4 sm:$0xff]   ;;  %v6534_v15 = vld [vmem:[%s7460_s16 + $0x180] ss:$16 sps:$4 sm:$0xff]  }
 0x484   : > { %3193 = vmatprep.subr.bf16.mxu1 %v5833_v30  ;;  %v5888_v30 = vcombine.low %v1605_v16, %v1609_v17  ;;  %v6537_v16 = vld [vmem:[%s7460_s16 + $0x188] ss:$16 sps:$4 sm:$0xff]   ;;  %v6542_v17 = vld [vmem:[%s7460_s16 + $0x1a4] ss:$16 sps:$4 sm:$0xff]  }
 0x486   : > { %3112 = vmatpush1.bf16.msra.mxu0 %v5830_v58  ;;  %v6470_v58 = vld [vmem:[%s7460_s16 + $0x24] ss:$16 sps:$4 sm:$0xff]  }
 0x487   : > { %3194 = vmatpush1.bf16.msra.mxu1 %v5832_v24  ;;  %3113 = vmatprep.subr.bf16.mxu0 %v5839_v35  ;;  %v6473_v24 = vld [vmem:[%s7460_s16 + $0x2c] ss:$16 sps:$4 sm:$0xff]   ;;  %v6468_v35 = vld [vmem:[%s7460_s16 + $0x20] ss:$16 sps:$4 sm:$0xff]  }
 0x488   : > { %3195 = vmatprep.subr.bf16.mxu1 %v5841_v41  ;;  %v6471_v41 = vld [vmem:[%s7460_s16 + $0x28] ss:$16 sps:$4 sm:$0xff]  }
 0x48a   : > { %3114 = vmatpush1.bf16.msra.mxu0 %v5838_v50  ;;  %v6485_v50 = vld [vmem:[%s7460_s16 + $0x6c] ss:$16 sps:$4 sm:$0xff]  }
 0x48b   : > { %3196 = vmatpush1.bf16.msra.mxu1 %v5840_v26  ;;  %3115 = vmatprep.subr.bf16.mxu0 %v5847_v54  ;;  %v6480_v26 = vld [vmem:[%s7460_s16 + $0x60] ss:$16 sps:$4 sm:$0xff]   ;;  %v6483_v54 = vld [vmem:[%s7460_s16 + $0x68] ss:$16 sps:$4 sm:$0xff]  }
 0x48c   : > { %3197 = vmatprep.subr.bf16.mxu1 %v5849_v60  ;;  %v6488_v60 = vld [vmem:[%s7460_s16 + $0x84] ss:$16 sps:$4 sm:$0xff]  }
 0x48e   : > { %3116 = vmatpush1.bf16.msra.mxu0 %v5846_v59  ;;  %v6497_v59 = vld [vmem:[%s7460_s16 + $0xac] ss:$16 sps:$4 sm:$0xff]  }
 0x48f   : > { %3198 = vmatpush1.bf16.msra.mxu1 %v5848_v61  ;;  %3117 = vmatprep.subr.bf16.mxu0 %v5855_v39  ;;  %v6492_v61 = vld [vmem:[%s7460_s16 + $0xa0] ss:$16 sps:$4 sm:$0xff]   ;;  %v6495_v39 = vld [vmem:[%s7460_s16 + $0xa8] ss:$16 sps:$4 sm:$0xff]  }
 0x490   : > { %3199 = vmatprep.subr.bf16.mxu1 %v5857_v62  ;;  %v6500_v62 = vld [vmem:[%s7460_s16 + $0xc4] ss:$16 sps:$4 sm:$0xff]  }
 0x492   : > { %3118 = vmatpush1.bf16.msra.mxu0 %v5854_v40  ;;  %v6509_v40 = vld [vmem:[%s7460_s16 + $0xec] ss:$16 sps:$4 sm:$0xff]  }
 0x493   : > { %3200 = vmatpush1.bf16.msra.mxu1 %v5856_v42  ;;  %3119 = vmatprep.subr.bf16.mxu0 %v5863_v43  ;;  %v6504_v42 = vld [vmem:[%s7460_s16 + $0xe0] ss:$16 sps:$4 sm:$0xff]   ;;  %v6507_v43 = vld [vmem:[%s7460_s16 + $0xe8] ss:$16 sps:$4 sm:$0xff]  }
 0x494   : > { %3201 = vmatprep.subr.bf16.mxu1 %v5865_v1  ;;  %v6512_v1 = vld [vmem:[%s7460_s16 + $0x104] ss:$16 sps:$4 sm:$0xff]  }
 0x496   : > { %3120 = vmatpush1.bf16.msra.mxu0 %v5862_v47  ;;  %v6521_v47 = vld [vmem:[%s7460_s16 + $0x12c] ss:$16 sps:$4 sm:$0xff]  }
 0x497   : > { %3202 = vmatpush1.bf16.msra.mxu1 %v5864_v48  ;;  %3121 = vmatprep.subr.bf16.mxu0 %v5871_v49  ;;  %v6516_v48 = vld [vmem:[%s7460_s16 + $0x120] ss:$16 sps:$4 sm:$0xff]   ;;  %v6519_v49 = vld [vmem:[%s7460_s16 + $0x128] ss:$16 sps:$4 sm:$0xff]  }
 0x498   : > { %3203 = vmatprep.subr.bf16.mxu1 %v5873_v51  ;;  %v6524_v51 = vld [vmem:[%s7460_s16 + $0x144] ss:$16 sps:$4 sm:$0xff]  }
 0x49a   : > { %3122 = vmatpush1.bf16.msra.mxu0 %v5870_v11  ;;  %v6533_v11 = vld [vmem:[%s7460_s16 + $0x16c] ss:$16 sps:$4 sm:$0xff]  }
 0x49b   : > { %3204 = vmatpush1.bf16.msra.mxu1 %v5872_v12  ;;  %3123 = vmatprep.subr.bf16.mxu0 %v5879_v36  ;;  %v6528_v12 = vld [vmem:[%s7460_s16 + $0x160] ss:$16 sps:$4 sm:$0xff]   ;;  %v6531_v36 = vld [vmem:[%s7460_s16 + $0x168] ss:$16 sps:$4 sm:$0xff]  }
 0x49c   : > { %3205 = vmatprep.subr.bf16.mxu1 %v5881_v13  ;;  %v6536_v13 = vld [vmem:[%s7460_s16 + $0x184] ss:$16 sps:$4 sm:$0xff]  }
 0x49e   : > { %3124 = vmatpush1.bf16.msra.mxu0 %v5878_v18  ;;  %v6545_v18 = vld [vmem:[%s7460_s16 + $0x1ac] ss:$16 sps:$4 sm:$0xff]  }
 0x49f   : > { %3206 = vmatpush1.bf16.msra.mxu1 %v5880_v19  ;;  %3125 = vmatprep.subr.bf16.mxu0 %v5887_v22  ;;  %v6540_v19 = vld [vmem:[%s7460_s16 + $0x1a0] ss:$16 sps:$4 sm:$0xff]   ;;  %v6543_v22 = vld [vmem:[%s7460_s16 + $0x1a8] ss:$16 sps:$4 sm:$0xff]  }
 0x4a0   : > { %3207 = vmatprep.subr.bf16.mxu1 %v5889_v28  ;;  %v6548_v28 = vld [vmem:[%s7460_s16 + $0x1c4] ss:$16 sps:$4 sm:$0xff]  }
 0x4a2   : > { %3126 = vmatpush1.bf16.msra.mxu0 %v5886_v29  ;;  %v6551_v29 = vld [vmem:[%s7460_s16 + $0x1cc] ss:$16 sps:$4 sm:$0xff]  }
 0x4a3   : > { %3208 = vmatpush1.bf16.msra.mxu1 %v5888_v30  ;;  %5062 = vmatprep.subr.bf16.mxu0 %v6464_v31  ;;  %v6546_v30 = vld [vmem:[%s7460_s16 + $0x1c0] ss:$16 sps:$4 sm:$0xff]   ;;  %v6549_v31 = vld [vmem:[%s7460_s16 + $0x1c8] ss:$16 sps:$4 sm:$0xff]  }
 0x4a4   : > { %5226 = vmatprep.subr.bf16.mxu1 %v6467_v32  ;;  %v6554_v32 = vld [vmem:[%s7460_s16 + $0x1e4] ss:$16 sps:$4 sm:$0xff]  }
 0x4a5   : > { %3128 = vmatmul.mubr.bf16.vlgmr.msra.gmra.mrb[12].mxu0 %v7556_v53 }
 0x4a6   : > { %3210 = vmatmul.mubr.bf16.vlgmr.msra.gmra.mrb[12].mxu1 %v7556_v53  ;;  %5063 = vmatpush1.bf16.msra.mxu0 %v6462_v33  ;;  %v6482_v53 = vld [vmem:[%s7460_s16 + $0x64] ss:$16 sps:$4 sm:$0xff]   ;;  %v6557_v33 = vld [vmem:[%s7460_s16 + $0x1ec] ss:$16 sps:$4 sm:$0xff]  }
 0x4a7   : > { %5227 = vmatpush1.bf16.msra.mxu1 %v6465_v34  ;;  %5064 = vmatprep.subr.bf16.mxu0 %v6470_v58  ;;  %v6552_v34 = vld [vmem:[%s7460_s16 + $0x1e0] ss:$16 sps:$4 sm:$0xff]   ;;  %v6555_v58 = vld [vmem:[%s7460_s16 + $0x1e8] ss:$16 sps:$4 sm:$0xff]  }
 0x4a8   : > { %5228 = vmatprep.subr.bf16.mxu1 %v6473_v24  ;;  %v6560_v24 = vld [vmem:[%s7460_s16 + $0x204] ss:$16 sps:$4 sm:$0xff]  }
 0x4aa   : > { %5065 = vmatpush1.bf16.msra.mxu0 %v6468_v35  ;;  %v6563_v35 = vld [vmem:[%s7460_s16 + $0x20c] ss:$16 sps:$4 sm:$0xff]  }
 0x4ab   : > { %5229 = vmatpush1.bf16.msra.mxu1 %v6471_v41  ;;  %5066 = vmatprep.subr.bf16.mxu0 %v6476_v44 }
 0x4ac   : > { %5230 = vmatprep.subr.bf16.mxu1 %v6479_v25 }
 0x4ae   : > { %5067 = vmatpush1.bf16.msra.mxu0 %v6474_v45 }
 0x4af   : > { %5231 = vmatpush1.bf16.msra.mxu1 %v6477_v46  ;;  %5068 = vmatprep.subr.bf16.mxu0 %v6482_v53 }
 0x4b0   : > { %5232 = vmatprep.subr.bf16.mxu1 %v6485_v50 }
 0x4b2   : > { %5069 = vmatpush1.bf16.msra.mxu0 %v6480_v26 }
 0x4b3   : > { %5233 = vmatpush1.bf16.msra.mxu1 %v6483_v54  ;;  %5070 = vmatprep.subr.bf16.mxu0 %v6488_v60 }
 0x4b4   : > { %5234 = vmatprep.subr.bf16.mxu1 %v6491_v57 }
 0x4b6   : > { %5071 = vmatpush1.bf16.msra.mxu0 %v6486_v55 }
 0x4b7   : > { %5235 = vmatpush1.bf16.msra.mxu1 %v6489_v27  ;;  %5072 = vmatprep.subr.bf16.mxu0 %v6494_v56 }
 0x4b8   : > { %5236 = vmatprep.subr.bf16.mxu1 %v6497_v59 }
 0x4ba   : > { %5073 = vmatpush1.bf16.msra.mxu0 %v6492_v61 }
 0x4bb   : > { %5237 = vmatpush1.bf16.msra.mxu1 %v6495_v39  ;;  %5074 = vmatprep.subr.bf16.mxu0 %v6500_v62 }
 0x4bc   : > { %5238 = vmatprep.subr.bf16.mxu1 %v6503_v63 }
 0x4be   : > { %5075 = vmatpush1.bf16.msra.mxu0 %v6498_v0 }
 0x4bf   : > { %5239 = vmatpush1.bf16.msra.mxu1 %v6501_v37  ;;  %5076 = vmatprep.subr.bf16.mxu0 %v6506_v38 }
 0x4c0   : > { %5240 = vmatprep.subr.bf16.mxu1 %v6509_v40 }
 0x4c2   : > { %5077 = vmatpush1.bf16.msra.mxu0 %v6504_v42 }
 0x4c3   : > { %5241 = vmatpush1.bf16.msra.mxu1 %v6507_v43  ;;  %5078 = vmatprep.subr.bf16.mxu0 %v6512_v1 }
 0x4c4   : > { %5242 = vmatprep.subr.bf16.mxu1 %v6515_v2 }
 0x4c6   : > { %5079 = vmatpush1.bf16.msra.mxu0 %v6510_v3 }
 0x4c7   : > { %5243 = vmatpush1.bf16.msra.mxu1 %v6513_v4  ;;  %5080 = vmatprep.subr.bf16.mxu0 %v6518_v5 }
 0x4c8   : > { %5244 = vmatprep.subr.bf16.mxu1 %v6521_v47 }
 0x4ca   : > { %5081 = vmatpush1.bf16.msra.mxu0 %v6516_v48 }
 0x4cb   : > { %5245 = vmatpush1.bf16.msra.mxu1 %v6519_v49  ;;  %5082 = vmatprep.subr.bf16.mxu0 %v6524_v51 }
 0x4cc   : > { %5246 = vmatprep.subr.bf16.mxu1 %v6527_v52 }
 0x4ce   : > { %5083 = vmatpush1.bf16.msra.mxu0 %v6522_v6 }
 0x4cf   : > { %5247 = vmatpush1.bf16.msra.mxu1 %v6525_v8  ;;  %5084 = vmatprep.subr.bf16.mxu0 %v6530_v10 }
 0x4d0   : > { %5248 = vmatprep.subr.bf16.mxu1 %v6533_v11 }
 0x4d2   : > { %5085 = vmatpush1.bf16.msra.mxu0 %v6528_v12 }
 0x4d3   : > { %5249 = vmatpush1.bf16.msra.mxu1 %v6531_v36  ;;  %5086 = vmatprep.subr.bf16.mxu0 %v6536_v13 }
 0x4d4   : > { %5250 = vmatprep.subr.bf16.mxu1 %v6539_v14 }
 0x4d6   : > { %5087 = vmatpush1.bf16.msra.mxu0 %v6534_v15 }
 0x4d7   : > { %5251 = vmatpush1.bf16.msra.mxu1 %v6537_v16  ;;  %5088 = vmatprep.subr.bf16.mxu0 %v6542_v17 }
 0x4d8   : > { %5252 = vmatprep.subr.bf16.mxu1 %v6545_v18 }
 0x4da   : > { %5089 = vmatpush1.bf16.msra.mxu0 %v6540_v19 }
 0x4db   : > { %5253 = vmatpush1.bf16.msra.mxu1 %v6543_v22  ;;  %5090 = vmatprep.subr.bf16.mxu0 %v6548_v28 }
 0x4dc   : > { %5254 = vmatprep.subr.bf16.mxu1 %v6551_v29 }
 0x4de   : > { %5091 = vmatpush1.bf16.msra.mxu0 %v6546_v30 }
 0x4df   : > { %5255 = vmatpush1.bf16.msra.mxu1 %v6549_v31  ;;  %5092 = vmatprep.subr.bf16.mxu0 %v6554_v32 }
 0x4e0   : > { %5256 = vmatprep.subr.bf16.mxu1 %v6557_v33 }
 0x4e2   : > { %5093 = vmatpush1.bf16.msra.mxu0 %v6552_v34 }
 0x4e3   : > { %5257 = vmatpush1.bf16.msra.mxu1 %v6555_v58  ;;  %5103 = vmatprep.subr.bf16.mxu0 %v6560_v24 }
 0x4e4   : > { %5267 = vmatprep.subr.bf16.mxu1 %v6563_v35 }
 0x4f8   : > { %v2965_v41 = vpop.f32.mrb[8].mxu0  ;;  %v7634_v44 = vpop.f32.mrb[8].mxu1 }
 0x4f9   : > { %v3218_v25 = vrot.slane %v2965_v41, 4  ;;  %v2967_v45 = vpop.f32.mrb[9].mxu0  ;;  %v3049_v46 = vpop.f32.mrb[9].mxu1  ;;  %v3230_v12 = vrot.slane %v7634_v44, 4 }
 0x4fa   : > { %v3224_v53 = vrot.slane %v2967_v45, 4  ;;  %v3236_v50 = vrot.slane %v3049_v46, 4  ;;  %v2969_v26 = vpop.f32.mrb[10].mxu0  ;;  %v3051_v54 = vpop.f32.mrb[10].mxu1 }
 0x4fb   : > { %v3219_v60 = vadd.f32 %v3218_v25, %v2965_v41  ;;  %v2970_v57 = vpop.f32.mrb[11].mxu0  ;;  %v3052_v55 = vpop.f32.mrb[11].mxu1  ;;  %v3231_v18 = vadd.f32 %v3230_v12, %v7634_v44  ;;  %v425_v54 = vld [vmem:[#allocation9 + $0x6] ss:$8 sm:$0xf] }
 0x4fc   : > { %v3225_v27 = vadd.f32 %v3224_v53, %v2967_v45  ;;  %v3237_v56 = vadd.f32 %v3236_v50, %v3049_v46  ;;  %v421_v53 = vld [vmem:[#allocation9 + $0x5] ss:$8 sm:$0xf]  ;;  %v6558_v12 = vld [vmem:[%s7460_s16 + $0x200] ss:$16 sps:$4 sm:$0xff]  }
 0x4fd   : > { %v3220_v59 = vrot.slane %v3219_v60, 2  ;;  %v3232_v32 = vrot.slane %v3231_v18, 2  ;;  %v422_v50 = vld [vmem:[#allocation9 + $0x5] ss:$8 sm:$0xf0] }
 0x4fe   : > { %v3226_v61 = vrot.slane %v3225_v27, 2  ;;  %v3238_v39 = vrot.slane %v3237_v56, 2  ;;  %v7638_v57 = vor.u32 %v422_v50, %v421_v53  ;;  %v6585_v53 = vld [vmem:[%s7460_s16 + $0x288] ss:$16 sps:$4 sm:$0xff]  }
 0x4ff   : > { %v3221_v62 = vadd.f32 %v3220_v59, %v3219_v60  ;;  %v3233_v25 = vadd.f32 %v3232_v32, %v3231_v18  ;;  %v426_v60 = vld [vmem:[#allocation9 + $0x6] ss:$8 sm:$0xf0]  ;;  %v6573_v32 = vld [vmem:[%s7460_s16 + $0x248] ss:$16 sps:$4 sm:$0xff]  }
 0x500   : > { %v3227_v63 = vadd.f32 %v3226_v61, %v3225_v27  ;;  %v3239_v0 = vadd.f32 %v3238_v39, %v3237_v56  ;;  %v7640_v55 = vor.u32 %v426_v60, %v425_v54  ;;  %v3374_v56 = vrot.slane %v7638_v57, %v7488_v21  ;;  %v6593_v54 = vld [vmem:[%s7460_s16 + $0x2ac] ss:$16 sps:$4 sm:$0xff]   ;;  %v6588_v60 = vld [vmem:[%s7460_s16 + $0x2a0] ss:$16 sps:$4 sm:$0xff]  }
 0x501   : > { %v3222_v37 = vrot.slane %v3221_v62, 1  ;;  %v3234_v26 = vrot.slane %v3233_v25, 1 }
 0x502   : > { %v3228_v38 = vrot.slane %v3227_v63, 1  ;;  %v3240_v40 = vrot.slane %v3239_v0, 1  ;;  %v3423_v39 = vrot.slane %v7640_v55, %v7488_v21 }
 0x503   : > { %v3223_v42 = vadd.f32 %v3222_v37, %v3221_v62  ;;  %v3235_v27 = vadd.f32 %v3234_v26, %v3233_v25  ;;  %v3386_v37 = vrot.slane %v7638_v57, %v7523_v9  ;;  %v6584_v25 = vld [vmem:[%s7460_s16 + $0x284] ss:$16 sps:$4 sm:$0xff]  }
 0x504   : > { %v3229_v43 = vadd.f32 %v3228_v38, %v3227_v63  ;;  %v3241_v1 = vadd.f32 %v3240_v40, %v3239_v0  ;;  %v3378_v63 = vrot.slane %v7638_v57, %v7491_v23  ;;  %v6590_v26 = vld [vmem:[%s7460_s16 + $0x2a4] ss:$16 sps:$4 sm:$0xff]  }
 0x505   : > { %v3266_v2 = vmul.f32 0.125, %v3223_v42  ;;  %v3268_v62 = vmul.f32 0.125, %v3235_v27  ;;  %v6591_v27 = vld [vmem:[%s7460_s16 + $0x2a8] ss:$16 sps:$4 sm:$0xff]  }
 0x506   : > { %v3267_v3 = vmul.f32 0.125, %v3229_v43  ;;  %v3269_v4 = vmul.f32 0.125, %v3241_v1  ;;  %v3427_v43 = vrot.slane %v7640_v55, %v7491_v23 }
 0x507   : > { %v3274_v5 = vsub.f32 %v2965_v41, %v3266_v2  ;;  %v3435_v2 = vrot.slane %v7640_v55, %v7523_v9 }
 0x508   : > { %v3275_v47 = vsub.f32 %v2967_v45, %v3267_v3  ;;  %v3277_v48 = vsub.f32 %v3049_v46, %v3269_v4  ;;  %v7655_v4 = vsub.f32 %v7634_v44, %v3268_v62  ;;  %v6597_v62 = vld [vmem:[%s7460_s16 + $0x2c8] ss:$16 sps:$4 sm:$0xff]  }
 0x509   : > { %v3282_v49 = vmul.f32 %v3274_v5, %v3274_v5 }
 0x50a   : > { %v3283_v51 = vmul.f32 %v3275_v47, %v3275_v47  ;;  %v3285_v52 = vmul.f32 %v3277_v48, %v3277_v48 }
 0x50b   : > { %v3290_v6 = vrot.slane %v3282_v49, 4 }
 0x50c   : > { %v3296_v8 = vrot.slane %v3283_v51, 4  ;;  %v3308_v10 = vrot.slane %v3285_v52, 4 }
 0x50d   : > { %v3291_v11 = vadd.f32 %v3290_v6, %v3282_v49 }
 0x50e   : > { %v3297_v36 = vadd.f32 %v3296_v8, %v3283_v51  ;;  %v3309_v13 = vadd.f32 %v3308_v10, %v3285_v52 }
 0x50f   : > { %v3292_v14 = vrot.slane %v3291_v11, 2 }
 0x510   : > { %v3298_v15 = vrot.slane %v3297_v36, 2  ;;  %v3310_v16 = vrot.slane %v3309_v13, 2 }
 0x511   : > { %v3293_v17 = vadd.f32 %v3292_v14, %v3291_v11 }
 0x512   : > { %v3299_v19 = vadd.f32 %v3298_v15, %v3297_v36  ;;  %v3311_v22 = vadd.f32 %v3310_v16, %v3309_v13  ;;  %v6561_v36 = vld [vmem:[%s7460_s16 + $0x208] ss:$16 sps:$4 sm:$0xff]   ;;  %v6566_v16 = vld [vmem:[%s7460_s16 + $0x224] ss:$16 sps:$4 sm:$0xff]  }
 0x513   : > { %v3294_v28 = vrot.slane %v3293_v17, 1 }
 0x514   : > { %v3300_v29 = vrot.slane %v3299_v19, 1  ;;  %v3312_v30 = vrot.slane %v3311_v22, 1 }
 0x515   : > { %v3295_v31 = vadd.f32 %v3294_v28, %v3293_v17  ;;  %v6569_v17 = vld [vmem:[%s7460_s16 + $0x22c] ss:$16 sps:$4 sm:$0xff]  }
 0x516   : > { %v3301_v33 = vadd.f32 %v3300_v29, %v3299_v19  ;;  %v3313_v34 = vadd.f32 %v3312_v30, %v3311_v22  ;;  %v6564_v19 = vld [vmem:[%s7460_s16 + $0x220] ss:$16 sps:$4 sm:$0xff]   ;;  %v6567_v22 = vld [vmem:[%s7460_s16 + $0x228] ss:$16 sps:$4 sm:$0xff]   ;;  %v6572_v29 = vld [vmem:[%s7460_s16 + $0x244] ss:$16 sps:$4 sm:$0xff]  }
 0x517   : > { %v3338_v58 = vmul.f32 0.125, %v3295_v31  ;;  %v6575_v30 = vld [vmem:[%s7460_s16 + $0x24c] ss:$16 sps:$4 sm:$0xff]   ;;  %v6570_v31 = vld [vmem:[%s7460_s16 + $0x240] ss:$16 sps:$4 sm:$0xff]  }
 0x518   : > { %v3339_v24 = vmul.f32 0.125, %v3301_v33  ;;  %v3341_v35 = vmul.f32 0.125, %v3313_v34  ;;  %v6578_v34 = vld [vmem:[%s7460_s16 + $0x264] ss:$16 sps:$4 sm:$0xff]  }
 0x519   : > { %v3346_v41 = vadd.f32 0.8, %v3338_v58  ;;  %v6581_v58 = vld [vmem:[%s7460_s16 + $0x26c] ss:$16 sps:$4 sm:$0xff]  }
 0x51a   : > { %v3347_v45 = vadd.f32 0.8, %v3339_v24  ;;  %v3349_v46 = vadd.f32 0.8, %v3341_v35  ;;  %v6576_v24 = vld [vmem:[%s7460_s16 + $0x260] ss:$16 sps:$4 sm:$0xff]  }
 0x51b   : > { %6858 = vrsqrt.f32 %v3346_v41  ;;  %v6579_v35 = vld [vmem:[%s7460_s16 + $0x268] ss:$16 sps:$4 sm:$0xff]  }
 0x51c   : > { %6860 = vrsqrt.f32 %v3347_v45  ;;  %v6587_v45 = vld [vmem:[%s7460_s16 + $0x28c] ss:$16 sps:$4 sm:$0xff]  }
 0x51d   : > { %6862 = vrsqrt.f32 %v3349_v46  ;;  %v6582_v46 = vld [vmem:[%s7460_s16 + $0x280] ss:$16 sps:$4 sm:$0xff]  }
 0x525   : > { %v6859_v59 = vpop.eup %6858 }
 0x526   : > { %v3362_v61 = vmul.f32 %v6859_v59, %v3274_v5  ;;  %v6861_v0 = vpop.eup %6860  ;;  %v6596_v59 = vld [vmem:[%s7460_s16 + $0x2c4] ss:$16 sps:$4 sm:$0xff]  }
 0x527   : > { %v6863_v38 = vpop.eup %6862  ;;  %v3363_v42 = vmul.f32 %v6861_v0, %v3275_v47  ;;  %v3284_v47 = vmul.f32 %v7655_v4, %v7655_v4  ;;  %v6602_v0 = vld [vmem:[%s7460_s16 + $0x2e4] ss:$16 sps:$4 sm:$0xff]  }
 0x528   : > { %v3411_v40 = vmul.f32 %v3374_v56, %v3362_v61  ;;  %v3365_v1 = vmul.f32 %v6863_v38, %v3277_v48  ;;  %v6599_v61 = vld [vmem:[%s7460_s16 + $0x2cc] ss:$16 sps:$4 sm:$0xff]   ;;  %v6600_v38 = vld [vmem:[%s7460_s16 + $0x2e0] ss:$16 sps:$4 sm:$0xff]  }
 0x529   : > { %v3412_v5 = vmul.f32 %v3378_v63, %v3363_v42  ;;  %v3302_v14 = vrot.slane %v3284_v47, 4 }
 0x52a   : > { %v3460_v3 = vadd.f32 %v3423_v39, %v3411_v40  ;;  %v3414_v49 = vmul.f32 %v3386_v37, %v3365_v1  ;;  %v6594_v39 = vld [vmem:[%s7460_s16 + $0x2c0] ss:$16 sps:$4 sm:$0xff]   ;;  %v6605_v37 = vld [vmem:[%s7460_s16 + $0x2ec] ss:$16 sps:$4 sm:$0xff]   ;;  %v6603_v40 = vld [vmem:[%s7460_s16 + $0x2e8] ss:$16 sps:$4 sm:$0xff]  }
 0x52b   : > { %v3461_v51 = vadd.f32 %v3427_v43, %v3412_v5  ;;  %v3303_v28 = vadd.f32 %v3302_v14, %v3284_v47  ;;  %v6608_v43 = vld [vmem:[%s7460_s16 + $0x304] ss:$16 sps:$4 sm:$0xff]   ;;  %v6611_v1 = vld [vmem:[%s7460_s16 + $0x30c] ss:$16 sps:$4 sm:$0xff]  }
 0x52c   : > { %vm3468_vm8 = vcmp.gt.f32.partialorder %v3460_v3, 0.0  ;;  %v3476_v52 = vmul.f32 0.2, %v3460_v3  ;;  %v3463_v6 = vadd.f32 %v3435_v2, %v3414_v49  ;;  %v6606_v2 = vld [vmem:[%s7460_s16 + $0x300] ss:$16 sps:$4 sm:$0xff]  }
 0x52d   : > { %vm3469_vm9 = vcmp.gt.f32.partialorder %v3461_v51, 0.0  ;;  %v3477_v48 = vmul.f32 0.2, %v3461_v51  ;;  %v3304_v33 = vrot.slane %v3303_v28, 2  ;;  %v6614_v5 = vld [vmem:[%s7460_s16 + $0x324] ss:$16 sps:$4 sm:$0xff]  }
 0x52e   : > { %v3484_v8 = vsel %vm3468_vm8, %v3460_v3, %v3476_v52  ;;  %vm3471_vm10 = vcmp.gt.f32.partialorder %v3463_v6, 0.0  ;;  %v3479_v10 = vmul.f32 0.2, %v3463_v6  ;;  %v6609_v3 = vld [vmem:[%s7460_s16 + $0x308] ss:$16 sps:$4 sm:$0xff]  }
 0x52f   : > { %v3485_v11 = vsel %vm3469_vm9, %v3461_v51, %v3477_v48  ;;  %v3492_v15 = vpack.c.bf16 %v3484_v8, %v3484_v8  ;;  %v3305_v41 = vadd.f32 %v3304_v33, %v3303_v28  ;;  %v6617_v49 = vld [vmem:[%s7460_s16 + $0x32c] ss:$16 sps:$4 sm:$0xff]   ;;  %v6612_v51 = vld [vmem:[%s7460_s16 + $0x320] ss:$16 sps:$4 sm:$0xff]   ;;  %v6615_v52 = vld [vmem:[%s7460_s16 + $0x328] ss:$16 sps:$4 sm:$0xff]  }
 0x530   : > { %v3493_v44 = vpack.c.bf16 %v3485_v11, %v3485_v11  ;;  %v3487_v13 = vsel %vm3471_vm10, %v3463_v6, %v3479_v10  ;;  %v6620_v6 = vld [vmem:[%s7460_s16 + $0x344] ss:$16 sps:$4 sm:$0xff]   ;;  %v6623_v47 = vld [vmem:[%s7460_s16 + $0x34c] ss:$16 sps:$4 sm:$0xff]   ;;  %v6618_v48 = vld [vmem:[%s7460_s16 + $0x340] ss:$16 sps:$4 sm:$0xff]  }
 0x531   : > { %v3495_v18 = vpack.c.bf16 %v3487_v13, %v3487_v13  ;;  %v3306_v50 = vrot.slane %v3305_v41, 1  ;;  %v6621_v8 = vld [vmem:[%s7460_s16 + $0x348] ss:$16 sps:$4 sm:$0xff]   ;;  %v6626_v10 = vld [vmem:[%s7460_s16 + $0x364] ss:$16 sps:$4 sm:$0xff]  }
 0x532   : > { %5094 = vmatprep.mubr.bf16.mxu0 %v3493_v44  ;;  %5258 = vmatprep.mubr.bf16.mxu1 %v3493_v44  ;;  %v6629_v11 = vld [vmem:[%s7460_s16 + $0x36c] ss:$16 sps:$4 sm:$0xff]   ;;  %v6632_v13 = vld [vmem:[%s7460_s16 + $0x384] ss:$16 sps:$4 sm:$0xff]  }
 0x533   : > { %5095 = vmatmul.mubr.bf16.vlgmr.msra.gmra.mrb[16].mxu0 %v3492_v15  ;;  %5259 = vmatmul.mubr.bf16.vlgmr.msra.gmra.mrb[16].mxu1 %v3492_v15  ;;  %v3307_v56 = vadd.f32 %v3306_v50, %v3305_v41  ;;  %v6635_v14 = vld [vmem:[%s7460_s16 + $0x38c] ss:$16 sps:$4 sm:$0xff]  }
 0x534   : > { %5104 = vmatpush1.bf16.msra.mxu0 %v6558_v12  ;;  %5268 = vmatpush1.bf16.msra.mxu1 %v6561_v36  ;;  %v6624_v12 = vld [vmem:[%s7460_s16 + $0x360] ss:$16 sps:$4 sm:$0xff]   ;;  %v6627_v36 = vld [vmem:[%s7460_s16 + $0x368] ss:$16 sps:$4 sm:$0xff]  }
 0x535   : > { %5135 = vmatprep.mubr.bf16.mxu0 %v3495_v18  ;;  %5299 = vmatprep.mubr.bf16.mxu1 %v3495_v18  ;;  %v3340_v63 = vmul.f32 0.125, %v3307_v56  ;;  %v6633_v18 = vld [vmem:[%s7460_s16 + $0x388] ss:$16 sps:$4 sm:$0xff]   ;;  %v6665_v56 = vld [vmem:[%s7460_s16 + $0x42c] ss:$16 sps:$4 sm:$0xff]  }
 0x536   : > { %5105 = vmatprep.subr.bf16.mxu0 %v6566_v16  ;;  %5269 = vmatprep.subr.bf16.mxu1 %v6569_v17  ;;  %v3382_v16 = vrot.slane %v7638_v57, %v7520_v7  ;;  %v6630_v17 = vld [vmem:[%s7460_s16 + $0x380] ss:$16 sps:$4 sm:$0xff]  }
 0x537   : > { %v3348_v42 = vadd.f32 0.8, %v3340_v63 }
 0x538   : > { %5106 = vmatpush1.bf16.msra.mxu0 %v6564_v19  ;;  %5270 = vmatpush1.bf16.msra.mxu1 %v6567_v22  ;;  %v6638_v19 = vld [vmem:[%s7460_s16 + $0x3a4] ss:$16 sps:$4 sm:$0xff]   ;;  %v6641_v22 = vld [vmem:[%s7460_s16 + $0x3ac] ss:$16 sps:$4 sm:$0xff]  }
 0x539   : > { %5107 = vmatprep.subr.bf16.mxu0 %v6572_v29  ;;  %5271 = vmatprep.subr.bf16.mxu1 %v6575_v30  ;;  %6864 = vrsqrt.f32 %v3348_v42  ;;  %v3431_v29 = vrot.slane %v7640_v55, %v7520_v7  ;;  %v6639_v30 = vld [vmem:[%s7460_s16 + $0x3a8] ss:$16 sps:$4 sm:$0xff]  }
 0x53c   : > { %5108 = vmatpush1.bf16.msra.mxu0 %v6570_v31  ;;  %5272 = vmatpush1.bf16.msra.mxu1 %v6573_v32  ;;  %v6644_v31 = vld [vmem:[%s7460_s16 + $0x3c4] ss:$16 sps:$4 sm:$0xff]   ;;  %v6647_v32 = vld [vmem:[%s7460_s16 + $0x3cc] ss:$16 sps:$4 sm:$0xff]  }
 0x53d   : > { %5109 = vmatprep.subr.bf16.mxu0 %v6578_v34  ;;  %5273 = vmatprep.subr.bf16.mxu1 %v6581_v58  ;;  %v6642_v34 = vld [vmem:[%s7460_s16 + $0x3c0] ss:$16 sps:$4 sm:$0xff]   ;;  %v6645_v58 = vld [vmem:[%s7460_s16 + $0x3c8] ss:$16 sps:$4 sm:$0xff]  }
 0x540   : > { %5110 = vmatpush1.bf16.msra.mxu0 %v6576_v24  ;;  %5274 = vmatpush1.bf16.msra.mxu1 %v6579_v35  ;;  %v6650_v24 = vld [vmem:[%s7460_s16 + $0x3e4] ss:$16 sps:$4 sm:$0xff]   ;;  %v6653_v35 = vld [vmem:[%s7460_s16 + $0x3ec] ss:$16 sps:$4 sm:$0xff]  }
 0x541   : > { %5111 = vmatprep.subr.bf16.mxu0 %v6584_v25  ;;  %5275 = vmatprep.subr.bf16.mxu1 %v6587_v45  ;;  %v6648_v25 = vld [vmem:[%s7460_s16 + $0x3e0] ss:$16 sps:$4 sm:$0xff]   ;;  %v6651_v45 = vld [vmem:[%s7460_s16 + $0x3e8] ss:$16 sps:$4 sm:$0xff]  }
 0x543   : > { %v6865_v44 = vpop.eup %6864 }
 0x544   : > { %5112 = vmatpush1.bf16.msra.mxu0 %v6582_v46  ;;  %5276 = vmatpush1.bf16.msra.mxu1 %v6585_v53  ;;  %v3364_v15 = vmul.f32 %v6865_v44, %v7655_v4  ;;  %v6636_v4 = vld [vmem:[%s7460_s16 + $0x3a0] ss:$16 sps:$4 sm:$0xff]   ;;  %v6656_v46 = vld [vmem:[%s7460_s16 + $0x404] ss:$16 sps:$4 sm:$0xff]   ;;  %v6659_v53 = vld [vmem:[%s7460_s16 + $0x40c] ss:$16 sps:$4 sm:$0xff]  }
 0x545   : > { %5113 = vmatprep.subr.bf16.mxu0 %v6590_v26  ;;  %5277 = vmatprep.subr.bf16.mxu1 %v6593_v54  ;;  %v6654_v26 = vld [vmem:[%s7460_s16 + $0x400] ss:$16 sps:$4 sm:$0xff]   ;;  %v6657_v54 = vld [vmem:[%s7460_s16 + $0x408] ss:$16 sps:$4 sm:$0xff]  }
 0x546   : > { %v3413_v28 = vmul.f32 %v3382_v16, %v3364_v15  ;;  %v6675_v44 = vld [vmem:[%s7460_s16 + $0x468] ss:$16 sps:$4 sm:$0xff]  }
 0x548   : > { %5114 = vmatpush1.bf16.msra.mxu0 %v6588_v60  ;;  %5278 = vmatpush1.bf16.msra.mxu1 %v6591_v27  ;;  %v3462_v33 = vadd.f32 %v3431_v29, %v3413_v28  ;;  %v6662_v27 = vld [vmem:[%s7460_s16 + $0x424] ss:$16 sps:$4 sm:$0xff]  }
 0x549   : > { %5115 = vmatprep.subr.bf16.mxu0 %v6596_v59  ;;  %5279 = vmatprep.subr.bf16.mxu1 %v6599_v61  ;;  %v6660_v59 = vld [vmem:[%s7460_s16 + $0x420] ss:$16 sps:$4 sm:$0xff]   ;;  %v6663_v61 = vld [vmem:[%s7460_s16 + $0x428] ss:$16 sps:$4 sm:$0xff]   ;;  %v6686_v29 = vld [vmem:[%s7460_s16 + $0x4a4] ss:$16 sps:$4 sm:$0xff]  }
 0x54a   : > { %v3478_v41 = vmul.f32 0.2, %v3462_v33  ;;  %vm3470_vm11 = vcmp.gt.f32.partialorder %v3462_v33, 0.0 }
 0x54c   : > { %5116 = vmatpush1.bf16.msra.mxu0 %v6594_v39  ;;  %5280 = vmatpush1.bf16.msra.mxu1 %v6597_v62  ;;  %v3486_v50 = vsel %vm3470_vm11, %v3462_v33, %v3478_v41  ;;  %v6668_v39 = vld [vmem:[%s7460_s16 + $0x444] ss:$16 sps:$4 sm:$0xff]   ;;  %v6671_v62 = vld [vmem:[%s7460_s16 + $0x44c] ss:$16 sps:$4 sm:$0xff]  }
 0x54d   : > { %5117 = vmatprep.subr.bf16.mxu0 %v6602_v0  ;;  %5281 = vmatprep.subr.bf16.mxu1 %v6605_v37  ;;  %v3494_v60 = vpack.c.bf16 %v3486_v50, %v3486_v50  ;;  %v6666_v0 = vld [vmem:[%s7460_s16 + $0x440] ss:$16 sps:$4 sm:$0xff]   ;;  %v6669_v37 = vld [vmem:[%s7460_s16 + $0x448] ss:$16 sps:$4 sm:$0xff]   ;;  %v6692_v41 = vld [vmem:[%s7460_s16 + $0x4c4] ss:$16 sps:$4 sm:$0xff]  }
 0x550   : > { %5118 = vmatpush1.bf16.msra.mxu0 %v6600_v38  ;;  %5282 = vmatpush1.bf16.msra.mxu1 %v6603_v40 }
 0x551   : > { %5119 = vmatprep.subr.bf16.mxu0 %v6608_v43  ;;  %5283 = vmatprep.subr.bf16.mxu1 %v6611_v1  ;;  %v6674_v43 = vld [vmem:[%s7460_s16 + $0x464] ss:$16 sps:$4 sm:$0xff]  }
 0x554   : > { %5120 = vmatpush1.bf16.msra.mxu0 %v6606_v2  ;;  %5284 = vmatpush1.bf16.msra.mxu1 %v6609_v3 }
 0x555   : > { %5121 = vmatprep.subr.bf16.mxu0 %v6614_v5  ;;  %5285 = vmatprep.subr.bf16.mxu1 %v6617_v49  ;;  %v6677_v5 = vld [vmem:[%s7460_s16 + $0x46c] ss:$16 sps:$4 sm:$0xff]  }
 0x558   : > { %5122 = vmatpush1.bf16.msra.mxu0 %v6612_v51  ;;  %5286 = vmatpush1.bf16.msra.mxu1 %v6615_v52 }
 0x559   : > { %5123 = vmatprep.subr.bf16.mxu0 %v6620_v6  ;;  %5287 = vmatprep.subr.bf16.mxu1 %v6623_v47 }
 0x55c   : > { %5124 = vmatpush1.bf16.msra.mxu0 %v6618_v48  ;;  %5288 = vmatpush1.bf16.msra.mxu1 %v6621_v8 }
 0x55d   : > { %5125 = vmatprep.subr.bf16.mxu0 %v6626_v10  ;;  %5289 = vmatprep.subr.bf16.mxu1 %v6629_v11  ;;  %v6672_v11 = vld [vmem:[%s7460_s16 + $0x460] ss:$16 sps:$4 sm:$0xff]  }
 0x560   : > { %5126 = vmatpush1.bf16.msra.mxu0 %v6624_v12  ;;  %5290 = vmatpush1.bf16.msra.mxu1 %v6627_v36  ;;  %v6680_v36 = vld [vmem:[%s7460_s16 + $0x484] ss:$16 sps:$4 sm:$0xff]  }
 0x561   : > { %5127 = vmatprep.subr.bf16.mxu0 %v6632_v13  ;;  %5291 = vmatprep.subr.bf16.mxu1 %v6635_v14  ;;  %v6683_v13 = vld [vmem:[%s7460_s16 + $0x48c] ss:$16 sps:$4 sm:$0xff]  }
 0x564   : > { %5128 = vmatpush1.bf16.msra.mxu0 %v6630_v17  ;;  %5292 = vmatpush1.bf16.msra.mxu1 %v6633_v18 }
 0x565   : > { %5129 = vmatprep.subr.bf16.mxu0 %v6638_v19  ;;  %5293 = vmatprep.subr.bf16.mxu1 %v6641_v22  ;;  %v6678_v19 = vld [vmem:[%s7460_s16 + $0x480] ss:$16 sps:$4 sm:$0xff]   ;;  %v6681_v22 = vld [vmem:[%s7460_s16 + $0x488] ss:$16 sps:$4 sm:$0xff]  }
 0x568   : > { %5130 = vmatpush1.bf16.msra.mxu0 %v6636_v4  ;;  %5294 = vmatpush1.bf16.msra.mxu1 %v6639_v30  ;;  %v6689_v4 = vld [vmem:[%s7460_s16 + $0x4ac] ss:$16 sps:$4 sm:$0xff]  }
 0x569   : > { %5131 = vmatprep.subr.bf16.mxu0 %v6644_v31  ;;  %5295 = vmatprep.subr.bf16.mxu1 %v6647_v32 }
 0x56c   : > { %5132 = vmatpush1.bf16.msra.mxu0 %v6642_v34  ;;  %5296 = vmatpush1.bf16.msra.mxu1 %v6645_v58  ;;  %v6684_v58 = vld [vmem:[%s7460_s16 + $0x4a0] ss:$16 sps:$4 sm:$0xff]  }
 0x56d   : > { %5133 = vmatprep.subr.bf16.mxu0 %v6650_v24  ;;  %5297 = vmatprep.subr.bf16.mxu1 %v6653_v35  ;;  %v6687_v24 = vld [vmem:[%s7460_s16 + $0x4a8] ss:$16 sps:$4 sm:$0xff]  }
 0x570   : > { %5134 = vmatpush1.bf16.msra.mxu0 %v6648_v25  ;;  %5298 = vmatpush1.bf16.msra.mxu1 %v6651_v45  ;;  %v6695_v25 = vld [vmem:[%s7460_s16 + $0x4cc] ss:$16 sps:$4 sm:$0xff]  }
 0x571   : > { %5144 = vmatprep.subr.bf16.mxu0 %v6656_v46  ;;  %5308 = vmatprep.subr.bf16.mxu1 %v6659_v53 }
 0x573   : > { %5136 = vmatmul.mubr.bf16.vlgmr.msra.gmra.mrb[16].mxu0 %v3494_v60  ;;  %5300 = vmatmul.mubr.bf16.vlgmr.msra.gmra.mrb[16].mxu1 %v3494_v60  ;;  %v6693_v60 = vld [vmem:[%s7460_s16 + $0x4c8] ss:$16 sps:$4 sm:$0xff]  }
 0x574   : > { %5145 = vmatpush1.bf16.msra.mxu0 %v6654_v26  ;;  %5309 = vmatpush1.bf16.msra.mxu1 %v6657_v54  ;;  %v6690_v54 = vld [vmem:[%s7460_s16 + $0x4c0] ss:$16 sps:$4 sm:$0xff]  }
 0x575   : > { %5146 = vmatprep.subr.bf16.mxu0 %v6662_v27  ;;  %5310 = vmatprep.subr.bf16.mxu1 %v6665_v56  ;;  %v6698_v56 = vld [vmem:[%s7460_s16 + $0x4e4] ss:$16 sps:$4 sm:$0xff]  }
 0x578   : > { %v3129_v63 = vpop.f32.mrb[12].mxu0  ;;  %5147 = vmatpush1.bf16.msra.mxu0 %v6660_v59  ;;  %5311 = vmatpush1.bf16.msra.mxu1 %v6663_v61  ;;  %v6701_v59 = vld [vmem:[%s7460_s16 + $0x4ec] ss:$16 sps:$4 sm:$0xff]  }
 0x579   : > { %v3242_v38 = vrot.slane %v3129_v63, 4  ;;  %v7738_v40 = vpop.f32.mrb[12].mxu1  ;;  %v3131_v42 = vpop.f32.mrb[13].mxu0  ;;  %5148 = vmatprep.subr.bf16.mxu0 %v6668_v39  ;;  %5312 = vmatprep.subr.bf16.mxu1 %v6671_v62 }
 0x57a   : > { %v3248_v1 = vrot.slane %v3131_v42, 4  ;;  %v3213_v2 = vpop.f32.mrb[13].mxu1  ;;  %v3133_v3 = vpop.f32.mrb[14].mxu0 }
 0x57b   : > { %v3243_v49 = vadd.f32 %v3242_v38, %v3129_v63  ;;  %v3260_v51 = vrot.slane %v3213_v2, 4  ;;  %v3215_v52 = vpop.f32.mrb[14].mxu1  ;;  %v3134_v6 = vpop.f32.mrb[15].mxu0  ;;  %v6699_v38 = vld [vmem:[%s7460_s16 + $0x4e8] ss:$16 sps:$4 sm:$0xff]  }
 0x57c   : > { %v3249_v47 = vadd.f32 %v3248_v1, %v3131_v42  ;;  %v3216_v48 = vpop.f32.mrb[15].mxu1  ;;  %5149 = vmatpush1.bf16.msra.mxu0 %v6666_v0  ;;  %5313 = vmatpush1.bf16.msra.mxu1 %v6669_v37  ;;  %v6696_v37 = vld [vmem:[%s7460_s16 + $0x4e0] ss:$16 sps:$4 sm:$0xff]   ;;  %v6704_v1 = vld [vmem:[%s7460_s16 + $0x504] ss:$16 sps:$4 sm:$0xff]  }
 0x57d   : > { %v3244_v8 = vrot.slane %v3243_v49, 2  ;;  %v3261_v10 = vadd.f32 %v3260_v51, %v3213_v2  ;;  %5150 = vmatprep.subr.bf16.mxu0 %v6674_v43  ;;  %5314 = vmatprep.subr.bf16.mxu1 %v6677_v5  ;;  %v6702_v6 = vld [vmem:[%s7460_s16 + $0x500] ss:$16 sps:$4 sm:$0xff]  }
 0x57e   : > { %v3250_v12 = vrot.slane %v3249_v47, 2 }
 0x57f   : > { %v3245_v14 = vadd.f32 %v3244_v8, %v3243_v49  ;;  %v3262_v15 = vrot.slane %v3261_v10, 2 }
 0x580   : > { %v3251_v16 = vadd.f32 %v3250_v12, %v3249_v47  ;;  %5151 = vmatpush1.bf16.msra.mxu0 %v6672_v11  ;;  %5315 = vmatpush1.bf16.msra.mxu1 %v6675_v44  ;;  %v6705_v47 = vld [vmem:[%s7460_s16 + $0x508] ss:$16 sps:$4 sm:$0xff]   ;;  %v6713_v11 = vld [vmem:[%s7460_s16 + $0x52c] ss:$16 sps:$4 sm:$0xff]  }
 0x581   : > { %v3246_v17 = vrot.slane %v3245_v14, 1  ;;  %v3263_v18 = vadd.f32 %v3262_v15, %v3261_v10  ;;  %5152 = vmatprep.subr.bf16.mxu0 %v6680_v36  ;;  %5316 = vmatprep.subr.bf16.mxu1 %v6683_v13  ;;  %v6710_v10 = vld [vmem:[%s7460_s16 + $0x524] ss:$16 sps:$4 sm:$0xff]   ;;  %v6708_v15 = vld [vmem:[%s7460_s16 + $0x520] ss:$16 sps:$4 sm:$0xff]  }
 0x582   : > { %v3252_v28 = vrot.slane %v3251_v16, 1 }
 0x583   : > { %v3247_v30 = vadd.f32 %v3246_v17, %v3245_v14  ;;  %v3264_v31 = vrot.slane %v3263_v18, 1 }
 0x584   : > { %v3253_v32 = vadd.f32 %v3252_v28, %v3251_v16  ;;  %5153 = vmatpush1.bf16.msra.mxu0 %v6678_v19  ;;  %5317 = vmatpush1.bf16.msra.mxu1 %v6681_v22  ;;  %v6711_v16 = vld [vmem:[%s7460_s16 + $0x528] ss:$16 sps:$4 sm:$0xff]   ;;  %v6716_v19 = vld [vmem:[%s7460_s16 + $0x544] ss:$16 sps:$4 sm:$0xff]   ;;  %v6719_v22 = vld [vmem:[%s7460_s16 + $0x54c] ss:$16 sps:$4 sm:$0xff]  }
 0x585   : > { %v3270_v33 = vmul.f32 0.125, %v3247_v30  ;;  %v3265_v34 = vadd.f32 %v3264_v31, %v3263_v18  ;;  %5154 = vmatprep.subr.bf16.mxu0 %v6686_v29  ;;  %5318 = vmatprep.subr.bf16.mxu1 %v6689_v4  ;;  %v6714_v30 = vld [vmem:[%s7460_s16 + $0x540] ss:$16 sps:$4 sm:$0xff]  }
 0x586   : > { %v3271_v35 = vmul.f32 0.125, %v3253_v32 }
 0x587   : > { %v7754_v45 = vsub.f32 %v3129_v63, %v3270_v33  ;;  %v3273_v46 = vmul.f32 0.125, %v3265_v34  ;;  %v6717_v33 = vld [vmem:[%s7460_s16 + $0x548] ss:$16 sps:$4 sm:$0xff]  }
 0x588   : > { %v7756_v53 = vsub.f32 %v3131_v42, %v3271_v35  ;;  %5155 = vmatpush1.bf16.msra.mxu0 %v6684_v58  ;;  %5319 = vmatpush1.bf16.msra.mxu1 %v6687_v24  ;;  %v3254_v42 = vrot.slane %v7738_v40, 4  ;;  %v6722_v24 = vld [vmem:[%s7460_s16 + $0x564] ss:$16 sps:$4 sm:$0xff]   ;;  %v6725_v35 = vld [vmem:[%s7460_s16 + $0x56c] ss:$16 sps:$4 sm:$0xff]  }
 0x589   : > { %v3286_v50 = vmul.f32 %v7754_v45, %v7754_v45  ;;  %v7760_v26 = vsub.f32 %v3213_v2, %v3273_v46  ;;  %5156 = vmatprep.subr.bf16.mxu0 %v6692_v41  ;;  %5320 = vmatprep.subr.bf16.mxu1 %v6695_v25  ;;  %v6707_v2 = vld [vmem:[%s7460_s16 + $0x50c] ss:$16 sps:$4 sm:$0xff]   ;;  %v6720_v25 = vld [vmem:[%s7460_s16 + $0x560] ss:$16 sps:$4 sm:$0xff]   ;;  %v6723_v46 = vld [vmem:[%s7460_s16 + $0x568] ss:$16 sps:$4 sm:$0xff]  }
 0x58a   : > { %v3287_v27 = vmul.f32 %v7756_v53, %v7756_v53  ;;  %v3255_v48 = vadd.f32 %v3254_v42, %v7738_v40  ;;  %v6732_v42 = vld [vmem:[%s7460_s16 + $0x5a0] ss:$16 sps:$4 sm:$0xff]  }
 0x58b   : > { %v3314_v61 = vrot.slane %v3286_v50, 4  ;;  %v3289_v39 = vmul.f32 %v7760_v26, %v7760_v26 }
 0x58c   : > { %v3320_v62 = vrot.slane %v3287_v27, 4  ;;  %5157 = vmatpush1.bf16.msra.mxu0 %v6690_v54  ;;  %5321 = vmatpush1.bf16.msra.mxu1 %v6693_v60  ;;  %v3256_v17 = vrot.slane %v3255_v48, 2  ;;  %v6728_v54 = vld [vmem:[%s7460_s16 + $0x584] ss:$16 sps:$4 sm:$0xff]   ;;  %v6731_v60 = vld [vmem:[%s7460_s16 + $0x58c] ss:$16 sps:$4 sm:$0xff]  }
 0x58d   : > { %v3315_v63 = vadd.f32 %v3314_v61, %v3286_v50  ;;  %v3332_v0 = vrot.slane %v3289_v39, 4  ;;  %5158 = vmatprep.subr.bf16.mxu0 %v6698_v56  ;;  %5322 = vmatprep.subr.bf16.mxu1 %v6701_v59  ;;  %v6726_v56 = vld [vmem:[%s7460_s16 + $0x580] ss:$16 sps:$4 sm:$0xff]   ;;  %v6729_v59 = vld [vmem:[%s7460_s16 + $0x588] ss:$16 sps:$4 sm:$0xff]  }
 0x58e   : > { %v3321_v43 = vadd.f32 %v3320_v62, %v3287_v27  ;;  %v3257_v34 = vadd.f32 %v3256_v17, %v3255_v48  ;;  %v3389_v27 = vsub.s32 4, %v7485_v20  ;;  %v6734_v62 = vld [vmem:[%s7460_s16 + $0x5a4] ss:$16 sps:$4 sm:$0xff]  }
 0x58f   : > { %v3316_v3 = vrot.slane %v3315_v63, 2  ;;  %v3333_v5 = vadd.f32 %v3332_v0, %v3289_v39  ;;  %v3393_v39 = vsub.s32 5, %v7485_v20  ;;  %v3401_v0 = vsub.s32 7, %v7485_v20 }
 0x590   : > { %v3322_v49 = vrot.slane %v3321_v43, 2  ;;  %5159 = vmatpush1.bf16.msra.mxu0 %v6696_v37  ;;  %5323 = vmatpush1.bf16.msra.mxu1 %v6699_v38  ;;  %v3258_v50 = vrot.slane %v3257_v34, 1  ;;  %v3390_v37 = vrot.slane %v7638_v57, %v3389_v27 }
 0x591   : > { %v3317_v51 = vadd.f32 %v3316_v3, %v3315_v63  ;;  %v3334_v52 = vrot.slane %v3333_v5, 2  ;;  %5160 = vmatprep.subr.bf16.mxu0 %v6704_v1  ;;  %5324 = vmatprep.subr.bf16.mxu1 %v6707_v2  ;;  %v6737_v63 = vld [vmem:[%s7460_s16 + $0x5ac] ss:$16 sps:$4 sm:$0xff]   ;;  %v3439_v2 = vrot.slane %v7640_v55, %v3389_v27 }
 0x592   : > { %v3323_v8 = vadd.f32 %v3322_v49, %v3321_v43  ;;  %v3259_v61 = vadd.f32 %v3258_v50, %v3257_v34  ;;  %v6735_v43 = vld [vmem:[%s7460_s16 + $0x5a8] ss:$16 sps:$4 sm:$0xff]   ;;  %v6740_v49 = vld [vmem:[%s7460_s16 + $0x5c4] ss:$16 sps:$4 sm:$0xff]   ;;  %v6750_v34 = vld [vmem:[%s7460_s16 + $0x600] ss:$16 sps:$4 sm:$0xff]  }
 0x593   : > { %v3318_v44 = vrot.slane %v3317_v51, 1  ;;  %v3335_v12 = vadd.f32 %v3334_v52, %v3333_v5  ;;  %v3394_v5 = vrot.slane %v7638_v57, %v3393_v39 }
 0x594   : > { %v3324_v36 = vrot.slane %v3323_v8, 1  ;;  %5161 = vmatpush1.bf16.msra.mxu0 %v6702_v6  ;;  %5325 = vmatpush1.bf16.msra.mxu1 %v6705_v47  ;;  %v3272_v3 = vmul.f32 0.125, %v3259_v61  ;;  %v3402_v6 = vrot.slane %v7638_v57, %v3401_v0  ;;  %v6762_v61 = vld [vmem:[%s7460_s16 + $0x640] ss:$16 sps:$4 sm:$0xff]  }
 0x595   : > { %v3319_v13 = vadd.f32 %v3318_v44, %v3317_v51  ;;  %v3336_v14 = vrot.slane %v3335_v12, 1  ;;  %5162 = vmatprep.subr.bf16.mxu0 %v6710_v10  ;;  %5326 = vmatprep.subr.bf16.mxu1 %v6713_v11  ;;  %v6743_v51 = vld [vmem:[%s7460_s16 + $0x5cc] ss:$16 sps:$4 sm:$0xff]   ;;  %v6738_v11 = vld [vmem:[%s7460_s16 + $0x5c0] ss:$16 sps:$4 sm:$0xff]  }
 0x596   : > { %v3325_v18 = vadd.f32 %v3324_v36, %v3323_v8  ;;  %v3443_v8 = vrot.slane %v7640_v55, %v3393_v39  ;;  %v6741_v44 = vld [vmem:[%s7460_s16 + $0x5c8] ss:$16 sps:$4 sm:$0xff]  }
 0x597   : > { %v3342_v28 = vmul.f32 0.125, %v3319_v13  ;;  %v3337_v29 = vadd.f32 %v3336_v14, %v3335_v12  ;;  %v3451_v12 = vrot.slane %v7640_v55, %v3401_v0  ;;  %v7815_v13 = vsub.f32 %v7738_v40, %v3272_v3  ;;  %v6765_v39 = vld [vmem:[%s7460_s16 + $0x648] ss:$16 sps:$4 sm:$0xff]   ;;  %v6773_v0 = vld [vmem:[%s7460_s16 + $0x66c] ss:$16 sps:$4 sm:$0xff]  }
 0x598   : > { %v3343_v4 = vmul.f32 0.125, %v3325_v18  ;;  %5163 = vmatpush1.bf16.msra.mxu0 %v6708_v15  ;;  %5327 = vmatpush1.bf16.msra.mxu1 %v6711_v16  ;;  %v6749_v15 = vld [vmem:[%s7460_s16 + $0x5ec] ss:$16 sps:$4 sm:$0xff]   ;;  %v6744_v18 = vld [vmem:[%s7460_s16 + $0x5e0] ss:$16 sps:$4 sm:$0xff]  }
 0x599   : > { %v3350_v31 = vadd.f32 0.8, %v3342_v28  ;;  %v3345_v32 = vmul.f32 0.125, %v3337_v29  ;;  %5164 = vmatprep.subr.bf16.mxu0 %v6716_v19  ;;  %5328 = vmatprep.subr.bf16.mxu1 %v6719_v22  ;;  %v6747_v19 = vld [vmem:[%s7460_s16 + $0x5e8] ss:$16 sps:$4 sm:$0xff]   ;;  %v3288_v40 = vmul.f32 %v7815_v13, %v7815_v13 }
 0x59a   : > { %v3351_v58 = vadd.f32 0.8, %v3343_v4  ;;  %v6752_v22 = vld [vmem:[%s7460_s16 + $0x604] ss:$16 sps:$4 sm:$0xff]   ;;  %v6755_v4 = vld [vmem:[%s7460_s16 + $0x60c] ss:$16 sps:$4 sm:$0xff]  }
 0x59b   : > { %6866 = vrsqrt.f32 %v3350_v31  ;;  %v3353_v41 = vadd.f32 0.8, %v3345_v32  ;;  %v6777_v3 = vld [vmem:[%s7460_s16 + $0x688] ss:$16 sps:$4 sm:$0xff]  }
 0x59c   : > { %6868 = vrsqrt.f32 %v3351_v58  ;;  %5165 = vmatpush1.bf16.msra.mxu0 %v6714_v30  ;;  %5329 = vmatpush1.bf16.msra.mxu1 %v6717_v33  ;;  %v6753_v58 = vld [vmem:[%s7460_s16 + $0x608] ss:$16 sps:$4 sm:$0xff]  }
 0x59d   : > { %6870 = vrsqrt.f32 %v3353_v41  ;;  %5166 = vmatprep.subr.bf16.mxu0 %v6722_v24  ;;  %5330 = vmatprep.subr.bf16.mxu1 %v6725_v35  ;;  %v3326_v35 = vrot.slane %v3288_v40, 4 }
 0x59f   : > { %v3327_v27 = vadd.f32 %v3326_v35, %v3288_v40  ;;  %v6812_v40 = vld [vmem:[%s7460_s16 + $0x744] ss:$16 sps:$4 sm:$0xff]  }
 0x5a0   : > { %5167 = vmatpush1.bf16.msra.mxu0 %v6720_v25  ;;  %5331 = vmatpush1.bf16.msra.mxu1 %v6723_v46  ;;  %v6758_v25 = vld [vmem:[%s7460_s16 + $0x624] ss:$16 sps:$4 sm:$0xff]   ;;  %v6761_v46 = vld [vmem:[%s7460_s16 + $0x62c] ss:$16 sps:$4 sm:$0xff]  }
 0x5a1   : > { %5168 = vmatprep.subr.bf16.mxu0 %v6728_v54  ;;  %5332 = vmatprep.subr.bf16.mxu1 %v6731_v60  ;;  %v6756_v54 = vld [vmem:[%s7460_s16 + $0x620] ss:$16 sps:$4 sm:$0xff]   ;;  %v6759_v60 = vld [vmem:[%s7460_s16 + $0x628] ss:$16 sps:$4 sm:$0xff]   ;;  %v6824_v35 = vld [vmem:[%s7460_s16 + $0x784] ss:$16 sps:$4 sm:$0xff]  }
 0x5a4   : > { %5169 = vmatpush1.bf16.msra.mxu0 %v6726_v56  ;;  %5333 = vmatpush1.bf16.msra.mxu1 %v6729_v59  ;;  %v6764_v56 = vld [vmem:[%s7460_s16 + $0x644] ss:$16 sps:$4 sm:$0xff]   ;;  %v6767_v59 = vld [vmem:[%s7460_s16 + $0x64c] ss:$16 sps:$4 sm:$0xff]  }
 0x5a5   : > { %v6867_v38 = vpop.eup %6866  ;;  %5170 = vmatprep.subr.bf16.mxu0 %v6734_v62  ;;  %5334 = vmatprep.subr.bf16.mxu1 %v6737_v63  ;;  %v3328_v62 = vrot.slane %v3327_v27, 2  ;;  %v6770_v63 = vld [vmem:[%s7460_s16 + $0x664] ss:$16 sps:$4 sm:$0xff]  }
 0x5a6   : > { %v3366_v1 = vmul.f32 %v6867_v38, %v7754_v45  ;;  %v6869_v52 = vpop.eup %6868  ;;  %v6771_v38 = vld [vmem:[%s7460_s16 + $0x668] ss:$16 sps:$4 sm:$0xff]  }
 0x5a7   : > { %v6871_v47 = vpop.eup %6870  ;;  %v3367_v45 = vmul.f32 %v6869_v52, %v7756_v53  ;;  %v6746_v53 = vld [vmem:[%s7460_s16 + $0x5e4] ss:$16 sps:$4 sm:$0xff]   ;;  %v6780_v52 = vld [vmem:[%s7460_s16 + $0x6a0] ss:$16 sps:$4 sm:$0xff]  }
 0x5a8   : > { %v3415_v48 = vmul.f32 %v3390_v37, %v3366_v1  ;;  %v3369_v10 = vmul.f32 %v6871_v47, %v7760_v26  ;;  %5171 = vmatpush1.bf16.msra.mxu0 %v6732_v42  ;;  %5335 = vmatpush1.bf16.msra.mxu1 %v6735_v43  ;;  %v6768_v37 = vld [vmem:[%s7460_s16 + $0x660] ss:$16 sps:$4 sm:$0xff]   ;;  %v3329_v42 = vadd.f32 %v3328_v62, %v3327_v27  ;;  %v6776_v43 = vld [vmem:[%s7460_s16 + $0x684] ss:$16 sps:$4 sm:$0xff]   ;;  %v6779_v1 = vld [vmem:[%s7460_s16 + $0x68c] ss:$16 sps:$4 sm:$0xff]  }
 0x5a9   : > { %v3416_v14 = vmul.f32 %v3394_v5, %v3367_v45  ;;  %5172 = vmatprep.subr.bf16.mxu0 %v6740_v49  ;;  %5336 = vmatprep.subr.bf16.mxu1 %v6743_v51  ;;  %v6782_v49 = vld [vmem:[%s7460_s16 + $0x6a4] ss:$16 sps:$4 sm:$0xff]   ;;  %v6785_v51 = vld [vmem:[%s7460_s16 + $0x6ac] ss:$16 sps:$4 sm:$0xff]   ;;  %v6834_v62 = vld [vmem:[%s7460_s16 + $0x7c0] ss:$16 sps:$4 sm:$0xff]  }
 0x5aa   : > { %v3464_v36 = vadd.f32 %v3439_v2, %v3415_v48  ;;  %v3418_v26 = vmul.f32 %v3402_v6, %v3369_v10  ;;  %v6774_v2 = vld [vmem:[%s7460_s16 + $0x680] ss:$16 sps:$4 sm:$0xff]   ;;  %v3330_v5 = vrot.slane %v3329_v42, 1  ;;  %v6783_v6 = vld [vmem:[%s7460_s16 + $0x6a8] ss:$16 sps:$4 sm:$0xff]  }
 0x5ab   : > { %v3465_v16 = vadd.f32 %v3443_v8, %v3416_v14  ;;  %v6788_v48 = vld [vmem:[%s7460_s16 + $0x6c4] ss:$16 sps:$4 sm:$0xff]   ;;  %v6791_v45 = vld [vmem:[%s7460_s16 + $0x6cc] ss:$16 sps:$4 sm:$0xff]   ;;  %v6786_v8 = vld [vmem:[%s7460_s16 + $0x6c0] ss:$16 sps:$4 sm:$0xff]  }
 0x5ac   : > { %vm3472_vm12 = vcmp.gt.f32.partialorder %v3464_v36, 0.0  ;;  %v3480_v17 = vmul.f32 0.2, %v3464_v36  ;;  %5173 = vmatpush1.bf16.msra.mxu0 %v6738_v11  ;;  %5337 = vmatpush1.bf16.msra.mxu1 %v6741_v44  ;;  %v3467_v28 = vadd.f32 %v3451_v12, %v3418_v26  ;;  %v3331_v47 = vadd.f32 %v3330_v5, %v3329_v42  ;;  %v6789_v10 = vld [vmem:[%s7460_s16 + $0x6c8] ss:$16 sps:$4 sm:$0xff]  }
 0x5ad   : > { %5174 = vmatprep.subr.bf16.mxu0 %v6746_v53  ;;  %5338 = vmatprep.subr.bf16.mxu1 %v6749_v15  ;;  %vm3473_vm13 = vcmp.gt.f32.partialorder %v3465_v16, 0.0  ;;  %v3481_v29 = vmul.f32 0.2, %v3465_v16  ;;  %v6794_v44 = vld [vmem:[%s7460_s16 + $0x6e4] ss:$16 sps:$4 sm:$0xff]  }
 0x5ae   : > { %v3488_v30 = vsel %vm3472_vm12, %v3464_v36, %v3480_v17  ;;  %vm3475_vm14 = vcmp.gt.f32.partialorder %v3467_v28, 0.0  ;;  %v3483_v31 = vmul.f32 0.2, %v3467_v28  ;;  %v3344_v11 = vmul.f32 0.125, %v3331_v47  ;;  %v6797_v12 = vld [vmem:[%s7460_s16 + $0x6ec] ss:$16 sps:$4 sm:$0xff]  }
 0x5af   : > { %v3489_v32 = vsel %vm3473_vm13, %v3465_v16, %v3481_v29  ;;  %v3496_v41 = vpack.c.bf16 %v3488_v30, %v3488_v30  ;;  %v6792_v36 = vld [vmem:[%s7460_s16 + $0x6e0] ss:$16 sps:$4 sm:$0xff]   ;;  %v6795_v14 = vld [vmem:[%s7460_s16 + $0x6e8] ss:$16 sps:$4 sm:$0xff]   ;;  %v6800_v15 = vld [vmem:[%s7460_s16 + $0x704] ss:$16 sps:$4 sm:$0xff]  }
 0x5b0   : > { %5175 = vmatpush1.bf16.msra.mxu0 %v6744_v18  ;;  %5339 = vmatpush1.bf16.msra.mxu1 %v6747_v19  ;;  %v3497_v33 = vpack.c.bf16 %v3489_v32, %v3489_v32  ;;  %v3491_v24 = vsel %vm3475_vm14, %v3467_v28, %v3483_v31  ;;  %v3352_v53 = vadd.f32 0.8, %v3344_v11  ;;  %v6803_v26 = vld [vmem:[%s7460_s16 + $0x70c] ss:$16 sps:$4 sm:$0xff]   ;;  %v6798_v16 = vld [vmem:[%s7460_s16 + $0x700] ss:$16 sps:$4 sm:$0xff]  }
 0x5b1   : > { %5185 = vmatprep.subr.bf16.mxu0 %v6752_v22  ;;  %5349 = vmatprep.subr.bf16.mxu1 %v6755_v4  ;;  %v3499_v50 = vpack.c.bf16 %v3491_v24, %v3491_v24  ;;  %v6801_v17 = vld [vmem:[%s7460_s16 + $0x708] ss:$16 sps:$4 sm:$0xff]   ;;  %v6806_v18 = vld [vmem:[%s7460_s16 + $0x724] ss:$16 sps:$4 sm:$0xff]   ;;  %v6809_v19 = vld [vmem:[%s7460_s16 + $0x72c] ss:$16 sps:$4 sm:$0xff]  }
 0x5b2   : > { %5176 = vmatprep.mubr.bf16.mxu0 %v3497_v33  ;;  %5340 = vmatprep.mubr.bf16.mxu1 %v3497_v33  ;;  %6872 = vrsqrt.f32 %v3352_v53  ;;  %v6804_v22 = vld [vmem:[%s7460_s16 + $0x720] ss:$16 sps:$4 sm:$0xff]   ;;  %v6807_v28 = vld [vmem:[%s7460_s16 + $0x728] ss:$16 sps:$4 sm:$0xff]   ;;  %v6815_v29 = vld [vmem:[%s7460_s16 + $0x74c] ss:$16 sps:$4 sm:$0xff]  }
 0x5b3   : > { %5177 = vmatmul.mubr.bf16.vlgmr.msra.gmra.mrb[16].mxu0 %v3496_v41  ;;  %5341 = vmatmul.mubr.bf16.vlgmr.msra.gmra.mrb[16].mxu1 %v3496_v41  ;;  %v6810_v4 = vld [vmem:[%s7460_s16 + $0x740] ss:$16 sps:$4 sm:$0xff]   ;;  %v6813_v30 = vld [vmem:[%s7460_s16 + $0x748] ss:$16 sps:$4 sm:$0xff]   ;;  %v6818_v31 = vld [vmem:[%s7460_s16 + $0x764] ss:$16 sps:$4 sm:$0xff]  }
 0x5b4   : > { %5186 = vmatpush1.bf16.msra.mxu0 %v6750_v34  ;;  %5350 = vmatpush1.bf16.msra.mxu1 %v6753_v58  ;;  %v6821_v32 = vld [vmem:[%s7460_s16 + $0x76c] ss:$16 sps:$4 sm:$0xff]   ;;  %v3397_v33 = vsub.s32 6, %v7485_v20  ;;  %v6816_v58 = vld [vmem:[%s7460_s16 + $0x760] ss:$16 sps:$4 sm:$0xff]  }
 0x5b5   : > { %5217 = vmatprep.mubr.bf16.mxu0 %v3499_v50  ;;  %5381 = vmatprep.mubr.bf16.mxu1 %v3499_v50  ;;  %v6819_v24 = vld [vmem:[%s7460_s16 + $0x768] ss:$16 sps:$4 sm:$0xff]   ;;  %v6827_v41 = vld [vmem:[%s7460_s16 + $0x78c] ss:$16 sps:$4 sm:$0xff]   ;;  %v6822_v20 = vld [vmem:[%s7460_s16 + $0x780] ss:$16 sps:$4 sm:$0xff]  }
 0x5b6   : > { %5187 = vmatprep.subr.bf16.mxu0 %v6758_v25  ;;  %5351 = vmatprep.subr.bf16.mxu1 %v6761_v46  ;;  %v3398_v46 = vrot.slane %v7638_v57, %v3397_v33  ;;  %v6825_v50 = vld [vmem:[%s7460_s16 + $0x788] ss:$16 sps:$4 sm:$0xff]   ;;  %v6828_v57 = vld [vmem:[%s7460_s16 + $0x7a0] ss:$16 sps:$4 sm:$0xff]  }
 0x5b7   : > { %v6843_v42 = vld [vmem:[%s7460_s16 + $0x7e8] ss:$16 sps:$4 sm:$0xff]  }
 0x5b8   : > { %5188 = vmatpush1.bf16.msra.mxu0 %v6756_v54  ;;  %5352 = vmatpush1.bf16.msra.mxu1 %v6759_v60  ;;  %v6830_v54 = vld [vmem:[%s7460_s16 + $0x7a4] ss:$16 sps:$4 sm:$0xff]   ;;  %v6833_v60 = vld [vmem:[%s7460_s16 + $0x7ac] ss:$16 sps:$4 sm:$0xff]  }
 0x5b9   : > { %5189 = vmatprep.subr.bf16.mxu0 %v6764_v56  ;;  %5353 = vmatprep.subr.bf16.mxu1 %v6767_v59  ;;  %v3447_v56 = vrot.slane %v7640_v55, %v3397_v33  ;;  %v6836_v59 = vld [vmem:[%s7460_s16 + $0x7c4] ss:$16 sps:$4 sm:$0xff]  }
 0x5ba   : > { %v6842_v55 = vld [vmem:[%s7460_s16 + $0x7e4] ss:$16 sps:$4 sm:$0xff]  }
 0x5bc   : > { %5190 = vmatpush1.bf16.msra.mxu0 %v6762_v61  ;;  %5354 = vmatpush1.bf16.msra.mxu1 %v6765_v39  ;;  %v6873_v34 = vpop.eup %6872  ;;  %v6839_v61 = vld [vmem:[%s7460_s16 + $0x7cc] ss:$16 sps:$4 sm:$0xff]  }
 0x5bd   : > { %5191 = vmatprep.subr.bf16.mxu0 %v6770_v63  ;;  %5355 = vmatprep.subr.bf16.mxu1 %v6773_v0  ;;  %v3368_v25 = vmul.f32 %v6873_v34, %v7815_v13  ;;  %v6831_v13 = vld [vmem:[%s7460_s16 + $0x7a8] ss:$16 sps:$4 sm:$0xff]   ;;  %v6845_v0 = vld [vmem:[%s7460_s16 + $0x7ec] ss:$16 sps:$4 sm:$0xff]  }
 0x5be   : > { %v6837_v63 = vld [vmem:[%s7460_s16 + $0x7c8] ss:$16 sps:$4 sm:$0xff]  }
 0x5bf   : > { %v3417_v27 = vmul.f32 %v3398_v46, %v3368_v25 }
 0x5c0   : > { %5192 = vmatpush1.bf16.msra.mxu0 %v6768_v37  ;;  %5356 = vmatpush1.bf16.msra.mxu1 %v6771_v38  ;;  %v6840_v38 = vld [vmem:[%s7460_s16 + $0x7e0] ss:$16 sps:$4 sm:$0xff]  }
 0x5c1   : > { %5193 = vmatprep.subr.bf16.mxu0 %v6776_v43  ;;  %5357 = vmatprep.subr.bf16.mxu1 %v6779_v1  ;;  %v3466_v39 = vadd.f32 %v3447_v56, %v3417_v27 }
 0x5c3   : > { %v3482_v37 = vmul.f32 0.2, %v3466_v39  ;;  %vm3474_vm15 = vcmp.gt.f32.partialorder %v3466_v39, 0.0 }
 0x5c4   : > { %5194 = vmatpush1.bf16.msra.mxu0 %v6774_v2  ;;  %5358 = vmatpush1.bf16.msra.mxu1 %v6777_v3  ;;  %v3504_v2 = vld [vmem:[%s3503_s22] sm:$0xf] }
 0x5c5   : > { %5195 = vmatprep.subr.bf16.mxu0 %v6782_v49  ;;  %5359 = vmatprep.subr.bf16.mxu1 %v6785_v51  ;;  %v3490_v43 = vsel %vm3474_vm15, %v3466_v39, %v3482_v37  ;;  %v3765_v3 = vrot.slane %v3504_v2, %v7488_v21  ;;  %v3773_v5 = vrot.slane %v3504_v2, %v7520_v7 }
 0x5c6   : > { %v3498_v1 = vpack.c.bf16 %v3490_v43, %v3490_v43  ;;  %v3769_v49 = vrot.slane %v3504_v2, %v7491_v23  ;;  %v3777_v51 = vrot.slane %v3504_v2, %v7523_v9 }
 0x5c8   : > { %5196 = vmatpush1.bf16.msra.mxu0 %v6780_v52  ;;  %5360 = vmatpush1.bf16.msra.mxu1 %v6783_v6 }
 0x5c9   : > { %5197 = vmatprep.subr.bf16.mxu0 %v6788_v48  ;;  %5361 = vmatprep.subr.bf16.mxu1 %v6791_v45 }
 0x5cc   : > { %5198 = vmatpush1.bf16.msra.mxu0 %v6786_v8  ;;  %5362 = vmatpush1.bf16.msra.mxu1 %v6789_v10 }
 0x5cd   : > { %5199 = vmatprep.subr.bf16.mxu0 %v6794_v44  ;;  %5363 = vmatprep.subr.bf16.mxu1 %v6797_v12 }
 0x5d0   : > { %5200 = vmatpush1.bf16.msra.mxu0 %v6792_v36  ;;  %5364 = vmatpush1.bf16.msra.mxu1 %v6795_v14 }
 0x5d1   : > { %5201 = vmatprep.subr.bf16.mxu0 %v6800_v15  ;;  %5365 = vmatprep.subr.bf16.mxu1 %v6803_v26 }
 0x5d4   : > { %5202 = vmatpush1.bf16.msra.mxu0 %v6798_v16  ;;  %5366 = vmatpush1.bf16.msra.mxu1 %v6801_v17 }
 0x5d5   : > { %5203 = vmatprep.subr.bf16.mxu0 %v6806_v18  ;;  %5367 = vmatprep.subr.bf16.mxu1 %v6809_v19 }
 0x5d8   : > { %5204 = vmatpush1.bf16.msra.mxu0 %v6804_v22  ;;  %5368 = vmatpush1.bf16.msra.mxu1 %v6807_v28 }
 0x5d9   : > { %5205 = vmatprep.subr.bf16.mxu0 %v6812_v40  ;;  %5369 = vmatprep.subr.bf16.mxu1 %v6815_v29 }
 0x5dc   : > { %5206 = vmatpush1.bf16.msra.mxu0 %v6810_v4  ;;  %5370 = vmatpush1.bf16.msra.mxu1 %v6813_v30 }
 0x5dd   : > { %5207 = vmatprep.subr.bf16.mxu0 %v6818_v31  ;;  %5371 = vmatprep.subr.bf16.mxu1 %v6821_v32 }
 0x5e0   : > { %5208 = vmatpush1.bf16.msra.mxu0 %v6816_v58  ;;  %5372 = vmatpush1.bf16.msra.mxu1 %v6819_v24 }
 0x5e1   : > { %5209 = vmatprep.subr.bf16.mxu0 %v6824_v35  ;;  %5373 = vmatprep.subr.bf16.mxu1 %v6827_v41 }
 0x5e4   : > { %5210 = vmatpush1.bf16.msra.mxu0 %v6822_v20  ;;  %5374 = vmatpush1.bf16.msra.mxu1 %v6825_v50 }
 0x5e5   : > { %5211 = vmatprep.subr.bf16.mxu0 %v6830_v54  ;;  %5375 = vmatprep.subr.bf16.mxu1 %v6833_v60 }
 0x5e8   : > { %5212 = vmatpush1.bf16.msra.mxu0 %v6828_v57  ;;  %5376 = vmatpush1.bf16.msra.mxu1 %v6831_v13 }
 0x5e9   : > { %5213 = vmatprep.subr.bf16.mxu0 %v6836_v59  ;;  %5377 = vmatprep.subr.bf16.mxu1 %v6839_v61 }
 0x5ec   : > { %5214 = vmatpush1.bf16.msra.mxu0 %v6834_v62  ;;  %5378 = vmatpush1.bf16.msra.mxu1 %v6837_v63 }
 0x5ed   : > { %5215 = vmatprep.subr.bf16.mxu0 %v6842_v55  ;;  %5379 = vmatprep.subr.bf16.mxu1 %v6845_v0 }
 0x5f0   : > { %5216 = vmatpush1.bf16.msra.mxu0 %v6840_v38  ;;  %5380 = vmatpush1.bf16.msra.mxu1 %v6843_v42 }
 0x5f3   : > { %5218 = vmatmul.mubr.bf16.vlgmr.msra.gmra.mrb[16].mxu0 %v3498_v1  ;;  %5382 = vmatmul.mubr.bf16.vlgmr.msra.gmra.mrb[16].mxu1 %v3498_v1 }
 0x6c6   : > { %v5219_v52 = vpop.f32.mrb[16].mxu0  ;;  %v5383_v6 = vpop.f32.mrb[16].mxu1 }
 0x6c7   : > { %v6179_v47 = vadd.f32 %v5219_v52, %v3765_v3  ;;  %v5221_v48 = vpop.f32.mrb[17].mxu0  ;;  %v5385_v45 = vpop.f32.mrb[17].mxu1  ;;  %v6181_v8 = vadd.f32 %v5383_v6, %v3773_v5 }
 0x6c8   : > { %v6180_v10 = vadd.f32 %v5221_v48, %v3769_v49  ;;  %v5223_v11 = vpop.f32.mrb[18].mxu0  ;;  %v5387_v21 = vpop.f32.mrb[18].mxu1  ;;  %v6182_v7 = vadd.f32 %v5385_v45, %v3777_v51 }
 0x6c9   : > { %6874 = vtanh.f32 %v6179_v47  ;;  %v5224_v44 = vpop.f32.mrb[19].mxu0  ;;  %v5388_v23 = vpop.f32.mrb[19].mxu1 }
 0x6ca   : > { %6876 = vtanh.f32 %v6180_v10 }
 0x6cb   : > { %6878 = vtanh.f32 %v6181_v8 }
 0x6cc   : > { %6880 = vtanh.f32 %v6182_v7 }
 0x6d3   : > { %v6875_v9 = vpop.eup %6874 }
 0x6d4   : > { %5394 = vst [vmem:[%s406_s19] sm:$0xff] %v6875_v9  ;;  %v6877_v12 = vpop.eup %6876 }
 0x6d5   : > { %v6879_v36 = vpop.eup %6878  ;;  %5395 = vst [vmem:[%s406_s19 + $0x8] sm:$0xff] %v6877_v12 }
 0x6d6   : > { %v6881_v14 = vpop.eup %6880  ;;  %5396 = vst [vmem:[%s406_s19 + $0x10] sm:$0xff] %v6879_v36 }
 0x6d7   : > { %5397 = vst [vmem:[%s406_s19 + $0x18] sm:$0xff] %v6881_v14 }
 0x6d8 PF: > { %p19_p8 = scmp.ge.s32.totalorder %s7375_s15, 4   ;;  %s7946_s27 = smov %s7122_s28 }
 0x6d9   : > { %s7947_s28 = smov %s7126_s29  ;;  %s7948_s29 = smov %s7387_s24 }
 0x6da   : > { %s7949_s30 = smov %s7375_s15  ;;  %21 = sbr.rel (!%p19_p8) target bundleno = 5 (0x5), region = 122 }
 0x6e1   :  { %5420 = vsyncpa [#allocation3], 1 }
 0x6e2   :  { %5422 = vsyncpa [#allocation3 + $0x1], 1 }
 0x6e3   :  { %5423 = vsyncpa [#allocation5], 1 }
 0x6e4   :  { %5424 = vsyncpa [#allocation8], 1 }
 0x6e5   :  { %5425 = vsyncpa [#allocation11], 1 }

</bundles_post_ra>
